<compile_context>
chip_gen: v5e
topology: v5e:2x2
jax: 0.10.0
libtpu: 0.0.40
codegen_flags: <defaults>
</compile_context>

<pallas_src>
import functools

import jax
import jax.numpy as jnp
from jax.experimental import pallas as pl
from jax.experimental.pallas import tpu as pltpu


def _self_attention_kernel(gamma_ref,      # SMEM (1,) f32
                           x_ref,          # (1, C, N) f32   channel-major block
                           w_ref,          # (Wtot, C) bf16  packed [Wq; Wk; Wv]
                           b_ref,          # (Wtot, 1) f32   packed biases
                           o_ref,          # (1, C, N) f32
                           proj_ref,       # VMEM scratch (Wtot, N) f32
                           *, c_qk, c_v):
    n = x_ref.shape[2]                                   # tokens (H*W), static

    # Packed channel-major projection: proj[o, t] = sum_c W[o, c] * x[c, t] + b[o].
    # bf16 operands, f32 accumulation; result parked in VMEM scratch so the
    # q/k/v slices stream from VMEM instead of spilling a 160 KiB traced value.
    proj_ref[...] = (
        jnp.dot(w_ref[...], x_ref[0].astype(jnp.bfloat16),
                preferred_element_type=jnp.float32)
        + b_ref[...])                                     # (Wtot, N)

    q_cm = proj_ref[pl.ds(0, c_qk), :].astype(jnp.bfloat16)       # (Cqk, N)
    k_cm = proj_ref[pl.ds(c_qk, c_qk), :].astype(jnp.bfloat16)    # (Cqk, N)

    # Token-major q via an identity NT matmul on the MXU (exact: identity just
    # copies bf16 values) -- avoids an XLU transpose / lhs-transposed dot.
    rows = jax.lax.broadcasted_iota(jnp.int32, (n, n), 0)
    cols = jax.lax.broadcasted_iota(jnp.int32, (n, n), 1)
    eye = (rows == cols).astype(jnp.bfloat16)                     # (N, N)
    q_tok = jax.lax.dot_general(eye, q_cm, (((1,), (1,)), ((), ())),
                                preferred_element_type=jnp.float32
                                ).astype(jnp.bfloat16)            # (N, Cqk)

    # energy[i, j] = q_i . k_j ; softmax over keys j.
    energy = jnp.dot(q_tok, k_cm, preferred_element_type=jnp.float32)   # (N, N)
    m = jnp.max(energy, axis=-1, keepdims=True)
    p = jnp.exp(energy - m)
    l = jnp.sum(p, axis=-1, keepdims=True)
    r = pl.reciprocal(l, approx=True)
    r = r * (2.0 - l * r)                      # one Newton step: near-exact
    attn = (p * r).astype(jnp.bfloat16)        # (N, N)

    v_cm = proj_ref[pl.ds(2 * c_qk, c_v), :].astype(jnp.bfloat16)       # (C, N)
    # out[c, i] = sum_j v[c, j] * attn[i, j]  (NT contraction over keys)
    out_cm = jax.lax.dot_general(v_cm, attn, (((1,), (1,)), ((), ())),
                                 preferred_element_type=jnp.float32)    # (C, N)

    # Exact f32 residual.
    o_ref[0] = (gamma_ref[0] * out_cm + x_ref[0]).astype(o_ref.dtype)


def pack_params(params):
    """Pack projection weights ONCE per parameter set (outside the jitted step).

    Rows are just the stacked conv weights [Wq; Wk; Wv] -> (2*Cqk + C, C_in):
    no transpose, no zero padding, cast to bf16 for the MXU.
    """
    w_all = jnp.concatenate([params["wq"], params["wk"], params["wv"]],
                            axis=0).astype(jnp.bfloat16)              # (Wtot, C)
    b_all = jnp.concatenate([params["bq"], params["bk"], params["bv"]]
                            ).astype(jnp.float32)[:, None]            # (Wtot, 1)
    gamma = params["gamma"].reshape(1).astype(jnp.float32)
    return {"w_all": w_all, "b_all": b_all, "gamma": gamma}


def self_attention(x_nchw, packed):
    """x_nchw: (B, C, H, W) f32; packed: output of pack_params. Returns NCHW f32."""
    B, C, H, W = x_nchw.shape
    N = H * W
    w_all = packed["w_all"]                    # (Wtot, C) bf16
    b_all = packed["b_all"]                    # (Wtot, 1) f32
    gamma = packed["gamma"]                    # (1,) f32
    Wtot = w_all.shape[0]
    Cqk = (Wtot - C) // 2

    # Channel-major tokens: pure reshape, no HBM transpose.
    x_bcn = x_nchw.reshape(B, C, N)

    kernel = functools.partial(_self_attention_kernel, c_qk=Cqk, c_v=C)

    # Explicit VMEM budget (blocks are double-buffered; weights resident once).
    blk = C * N * 4
    est = (2 * 2 * blk                         # x + out blocks, double-buffered
           + 2 * Wtot * C * 2                  # weight slab (+ buffer slack)
           + 2 * Wtot * 128 * 4                # bias column (lane-padded)
           + Wtot * max(N, 128) * 4            # proj scratch (lane-padded)
           + 6 * N * max(N, 128) * 4 + 2 * blk)  # softmax temporaries, headroom
    vmem_limit = int(min(max(2 * est, 16 * 1024 * 1024), 32 * 1024 * 1024))

    cost = pl.CostEstimate(
        flops=B * (2 * Wtot * C * N + 2 * N * N * (2 * Cqk + C)),
        transcendentals=B * N * N,
        bytes_accessed=2 * B * C * N * 4 + Wtot * C * 2 + Wtot * 4 + 4,
    )

    out_bcn = pl.pallas_call(
        kernel,
        out_shape=jax.ShapeDtypeStruct((B, C, N), jnp.float32),
        grid=(B,),
        in_specs=[
            pl.BlockSpec(memory_space=pltpu.SMEM),                 # gamma (scalar)
            pl.BlockSpec((1, C, N), lambda b: (b, 0, 0)),          # x, per-batch
            pl.BlockSpec((Wtot, C), lambda b: (0, 0)),             # weights (resident)
            pl.BlockSpec((Wtot, 1), lambda b: (0, 0)),             # biases (resident)
        ],
        out_specs=pl.BlockSpec((1, C, N), lambda b: (b, 0, 0)),
        scratch_shapes=[pltpu.VMEM((Wtot, N), jnp.float32)],        # packed projection
        compiler_params=pltpu.CompilerParams(
            dimension_semantics=("parallel",),
            vmem_limit_bytes=vmem_limit),
        cost_estimate=cost,
    )(gamma, x_bcn, w_all, b_all)

    return out_bcn.reshape(B, C, H, W)         # pure reshape, no transpose


def reference(x_nchw, params):
    """Pure-JAX f32 replica of the PyTorch forward, for verification."""
    B, C, H, W = x_nchw.shape
    N = H * W
    xf = x_nchw.reshape(B, C, N)                                      # (B, C, N)

    def conv1x1(w, b):                                                # w: (Cout, Cin)
        return jnp.einsum("oc,bcn->bon", w, xf) + b[None, :, None]

    q = conv1x1(params["wq"], params["bq"])                           # (B, Cqk, N)
    k = conv1x1(params["wk"], params["bk"])                           # (B, Cqk, N)
    v = conv1x1(params["wv"], params["bv"])                           # (B, C,   N)

    energy = jnp.einsum("bci,bcj->bij", q, k)                         # (B, N, N)
    attn = jax.nn.softmax(energy, axis=-1)
    out = jnp.einsum("bcj,bij->bci", v, attn).reshape(B, C, H, W)
    return params["gamma"] * out + x_nchw


if __name__ == "__main__":
    # Module hardcodes 512 in-channels, 64 q/k channels; keep those, small spatial.
    B, C, H, W = 2, 512, 8, 8
    Cqk = 64

    key = jax.random.PRNGKey(0)
    ks = jax.random.split(key, 8)
    scale = 0.02
    params = {
        "wq": scale * jax.random.normal(ks[0], (Cqk, C), jnp.float32),
        "bq": scale * jax.random.normal(ks[1], (Cqk,), jnp.float32),
        "wk": scale * jax.random.normal(ks[2], (Cqk, C), jnp.float32),
        "bk": scale * jax.random.normal(ks[3], (Cqk,), jnp.float32),
        "wv": scale * jax.random.normal(ks[4], (C, C), jnp.float32),
        "bv": scale * jax.random.normal(ks[5], (C,), jnp.float32),
        # Module inits gamma=0 (residual-only); use a nonzero value so the
        # attention path is actually exercised.
        "gamma": jnp.array(0.1, jnp.float32),
    }
    x = jax.random.normal(ks[6], (B, C, H, W), jnp.float32)

    packed = pack_params(params)               # one-time weight packing/cast
    fwd = jax.jit(self_attention)
    out = jax.block_until_ready(fwd(x, packed))
    ref = jax.block_until_ready(reference(x, params))

    assert out.shape == (B, C, H, W)
    err = float(jnp.max(jnp.abs(out - ref)))
    # bf16 matmul operands throughout the attention branch (f32 accumulation,
    # exact f32 residual): observed error is ~1e-3; keep the loosened tolerance.
    assert err < 2e-2, err
    print("KERNEL_OK")
</pallas_src>

<mosaic_0001>
module attributes {stable_mosaic.version = 11 : i64} {
  func.func @_self_attention_kernel(%arg0: i32, %arg1: memref<1xf32, #tpu.memory_space<smem>>, %arg2: memref<1x512x64xf32, #tpu.memory_space<vmem>>, %arg3: memref<640x512xbf16, #tpu.memory_space<vmem>>, %arg4: memref<640x1xf32, #tpu.memory_space<vmem>>, %arg5: memref<1x512x64xf32, #tpu.memory_space<vmem>>, %arg6: memref<640x64xf32, #tpu.memory_space<vmem>>) attributes {dimension_semantics = [#tpu.dimension_semantics<parallel>], iteration_bounds = array<i64: 2>, scalar_prefetch = 0 : i64, scratch_operands = 1 : i64, tpu.core_type = #tpu.core_type<tc>, window_params = [{transform_indices = @transform_0, window_bounds = array<i64: 1>}, {transform_indices = @transform_1, window_bounds = array<i64: 1, 512, 64>}, {pipeline_mode = #tpu.pipeline_mode<synchronous>, transform_indices = @transform_2, window_bounds = array<i64: 640, 512>}, {pipeline_mode = #tpu.pipeline_mode<synchronous>, transform_indices = @transform_3, window_bounds = array<i64: 640, 1>}, {transform_indices = @transform_4, window_bounds = array<i64: 1, 512, 64>}]} {
    %c0 = arith.constant 0 : index
    %c0_0 = arith.constant 0 : index
    %0 = vector.load %arg3[%c0, %c0_0] : memref<640x512xbf16, #tpu.memory_space<vmem>>, vector<640x512xbf16>
    %c0_1 = arith.constant 0 : index
    %c0_2 = arith.constant 0 : index
    %c0_3 = arith.constant 0 : index
    %1 = vector.load %arg2[%c0_1, %c0_2, %c0_3] : memref<1x512x64xf32, #tpu.memory_space<vmem>>, vector<1x512x64xf32>
    %2 = vector.shape_cast %1 : vector<1x512x64xf32> to vector<512x64xf32>
    %3 = arith.truncf %2 : vector<512x64xf32> to vector<512x64xbf16>
    %cst = arith.constant dense<0.000000e+00> : vector<640x64xf32>
    %4 = tpu.matmul %0, %3, %cst {dimension_numbers = #tpu.dot_dimension_numbers<[1], [0], [0], [1], [0, 0, 1, 1], [], []>} : vector<640x512xbf16>, vector<512x64xbf16>, vector<640x64xf32> -> vector<640x64xf32>
    %c0_4 = arith.constant 0 : index
    %c0_5 = arith.constant 0 : index
    %5 = vector.load %arg4[%c0_4, %c0_5] : memref<640x1xf32, #tpu.memory_space<vmem>>, vector<640x1xf32>
    %6 = vector.broadcast %5 : vector<640x1xf32> to vector<640x64xf32>
    %7 = arith.addf %4, %6 : vector<640x64xf32>
    %c0_6 = arith.constant 0 : index
    %c0_7 = arith.constant 0 : index
    %8 = vector.load %arg6[%c0_6, %c0_7] : memref<640x64xf32, #tpu.memory_space<vmem>>, vector<640x64xf32>
    tpu.vector_store %arg6[%c0_6, %c0_7], %7 {strides = array<i32>} : memref<640x64xf32, #tpu.memory_space<vmem>>, vector<640x64xf32>,
    %c0_8 = arith.constant 0 : index
    %c0_9 = arith.constant 0 : index
    %9 = vector.load %arg6[%c0_8, %c0_9] : memref<640x64xf32, #tpu.memory_space<vmem>>, vector<64x64xf32>
    %10 = arith.truncf %9 : vector<64x64xf32> to vector<64x64xbf16>
    %c64 = arith.constant 64 : index
    %c0_10 = arith.constant 0 : index
    %11 = vector.load %arg6[%c64, %c0_10] : memref<640x64xf32, #tpu.memory_space<vmem>>, vector<64x64xf32>
    %12 = arith.truncf %11 : vector<64x64xf32> to vector<64x64xbf16>
    %13 = tpu.iota {dimensions = array<i32: 0>} : vector<64x64xi32>
    %14 = tpu.iota {dimensions = array<i32: 1>} : vector<64x64xi32>
    %15 = arith.cmpi eq, %13, %14 : vector<64x64xi32>
    %16 = arith.extui %15 : vector<64x64xi1> to vector<64x64xi32>
    %17 = arith.sitofp %16 : vector<64x64xi32> to vector<64x64xf32>
    %18 = arith.truncf %17 : vector<64x64xf32> to vector<64x64xbf16>
    %cst_11 = arith.constant dense<0.000000e+00> : vector<64x64xf32>
    %19 = tpu.matmul %18, %10, %cst_11 {dimension_numbers = #tpu.dot_dimension_numbers<[1], [1], [0], [0], [0, 0, 1, 0], [], []>} : vector<64x64xbf16>, vector<64x64xbf16>, vector<64x64xf32> -> vector<64x64xf32>
    %20 = arith.truncf %19 : vector<64x64xf32> to vector<64x64xbf16>
    %cst_12 = arith.constant dense<0.000000e+00> : vector<64x64xf32>
    %21 = tpu.matmul %20, %12, %cst_12 {dimension_numbers = #tpu.dot_dimension_numbers<[1], [0], [0], [1], [0, 0, 1, 1], [], []>} : vector<64x64xbf16>, vector<64x64xbf16>, vector<64x64xf32> -> vector<64x64xf32>
    %cst_13 = arith.constant dense<0xFF800000> : vector<64xf32>
    %22 = vector.multi_reduction <maximumf>, %21, %cst_13 [1] : vector<64x64xf32> to vector<64xf32>
    %23 = vector.shape_cast %22 : vector<64xf32> to vector<64x1xf32>
    %24 = vector.broadcast %23 : vector<64x1xf32> to vector<64x64xf32>
    %25 = arith.subf %21, %24 : vector<64x64xf32>
    %26 = math.exp %25 : vector<64x64xf32>
    %cst_14 = arith.constant dense<0.000000e+00> : vector<64xf32>
    %27 = vector.multi_reduction <add>, %26, %cst_14 [1] : vector<64x64xf32> to vector<64xf32>
    %28 = vector.shape_cast %27 : vector<64xf32> to vector<64x1xf32>
    %29 = tpu.reciprocal %28 {approx = true} : vector<64x1xf32> -> vector<64x1xf32>
    %30 = arith.mulf %28, %29 : vector<64x1xf32>
    %cst_15 = arith.constant 2.000000e+00 : f32
    %31 = vector.broadcast %cst_15 : f32 to vector<64x1xf32>
    %32 = arith.subf %31, %30 : vector<64x1xf32>
    %33 = arith.mulf %29, %32 : vector<64x1xf32>
    %34 = vector.broadcast %33 : vector<64x1xf32> to vector<64x64xf32>
    %35 = arith.mulf %26, %34 : vector<64x64xf32>
    %36 = arith.truncf %35 : vector<64x64xf32> to vector<64x64xbf16>
    %c128 = arith.constant 128 : index
    %c0_16 = arith.constant 0 : index
    %37 = vector.load %arg6[%c128, %c0_16] : memref<640x64xf32, #tpu.memory_space<vmem>>, vector<512x64xf32>
    %38 = arith.truncf %37 : vector<512x64xf32> to vector<512x64xbf16>
    %cst_17 = arith.constant dense<0.000000e+00> : vector<512x64xf32>
    %39 = tpu.matmul %38, %36, %cst_17 {dimension_numbers = #tpu.dot_dimension_numbers<[1], [1], [0], [0], [0, 0, 1, 0], [], []>} : vector<512x64xbf16>, vector<64x64xbf16>, vector<512x64xf32> -> vector<512x64xf32>
    %c0_18 = arith.constant 0 : index
    %40 = memref.load %arg1[%c0_18] : memref<1xf32, #tpu.memory_space<smem>>
    %41 = vector.broadcast %40 : f32 to vector<512x64xf32>
    %42 = arith.mulf %41, %39 : vector<512x64xf32>
    %c0_19 = arith.constant 0 : index
    %c0_20 = arith.constant 0 : index
    %c0_21 = arith.constant 0 : index
    %43 = vector.load %arg2[%c0_19, %c0_20, %c0_21] : memref<1x512x64xf32, #tpu.memory_space<vmem>>, vector<1x512x64xf32>
    %44 = vector.shape_cast %43 : vector<1x512x64xf32> to vector<512x64xf32>
    %45 = arith.addf %42, %44 : vector<512x64xf32>
    %c0_22 = arith.constant 0 : index
    %c0_23 = arith.constant 0 : index
    %c0_24 = arith.constant 0 : index
    %46 = vector.load %arg5[%c0_22, %c0_23, %c0_24] : memref<1x512x64xf32, #tpu.memory_space<vmem>>, vector<1x512x64xf32>
    %47 = vector.shape_cast %46 : vector<1x512x64xf32> to vector<512x64xf32>
    %48 = vector.shape_cast %45 : vector<512x64xf32> to vector<1x512x64xf32>
    tpu.vector_store %arg5[%c0_22, %c0_23, %c0_24], %48 {strides = array<i32>} : memref<1x512x64xf32, #tpu.memory_space<vmem>>, vector<1x512x64xf32>,
    return
  }
  func.func @transform_0(%arg0: i32) -> i32 {
    %c0_i32 = arith.constant 0 : i32
    %c0_i32_0 = arith.constant 0 : i32
    return %c0_i32 : i32
  }
  func.func @transform_1(%arg0: i32) -> (i32, i32, i32) {
    %c0_i32 = arith.constant 0 : i32
    %c0_i32_0 = arith.constant 0 : i32
    %c0_i32_1 = arith.constant 0 : i32
    return %arg0, %c0_i32, %c0_i32_0 : i32, i32, i32
  }
  func.func @transform_2(%arg0: i32) -> (i32, i32) {
    %c0_i32 = arith.constant 0 : i32
    %c0_i32_0 = arith.constant 0 : i32
    %c0_i32_1 = arith.constant 0 : i32
    return %c0_i32, %c0_i32_0 : i32, i32
  }
  func.func @transform_3(%arg0: i32) -> (i32, i32) {
    %c0_i32 = arith.constant 0 : i32
    %c0_i32_0 = arith.constant 0 : i32
    %c0_i32_1 = arith.constant 0 : i32
    return %c0_i32, %c0_i32_0 : i32, i32
  }
  func.func @transform_4(%arg0: i32) -> (i32, i32, i32) {
    %c0_i32 = arith.constant 0 : i32
    %c0_i32_0 = arith.constant 0 : i32
    %c0_i32_1 = arith.constant 0 : i32
    return %arg0, %c0_i32, %c0_i32_0 : i32, i32, i32
  }
}

</mosaic_0001>

<bundles_post_ra>
// kernel: self_attention.1
= control target key start
LH: loop header
LB: loop body
LE: loop exit
PB: predicated region body
PF: predicated region fallthrough
CT: control target
= control target key end

     0   :  { %s4584_s17 = smov 0   ;;  %s7239_s0 = inlined_call_operand.<no memory space> [shape: f32[1], index: 0, kind: input, shape index: {}]   ;;  %s7240_s1 = inlined_call_operand.vmem [shape: f32[2,512,64], index: 1, kind: input, shape index: {}]   ;;  %s7241_s2 = inlined_call_operand.vmem [shape: bf16[640,512], index: 2, kind: input, shape index: {}]   ;;  %s7242_s3 = inlined_call_operand.vmem [shape: f32[640,1], index: 3, kind: input, shape index: {}]   ;;  %s7243_s4 = inlined_call_operand.vmem [shape: f32[2,512,64], index: 4, kind: output, shape index: {}]  }
   0x1   :  { %9 = sst [smem:[#allocation3]] %s7239_s0 }
   0x2 LB: > { %s3616_s18 = sadd.s32 4294967295, %s4552_s17   ;;  %p3620_p0 = scmp.ge.s32.totalorder %s4552_s17, 1  ;;  %s4552_s17 = sphi %s4584_s17, %s15_s17  }
   0x3   : > { %p163_p1 = scmp.lt.s32.totalorder %s4552_s17, 3 }
   0x5   : > { %p164_p2 = pnand %p3620_p0, %p163_p1 }
   0x7   : > { %167 = sbr.rel (%p164_p2) target bundleno = 2094 (0x82e), region = 36 }
   0xc   : > { %p189_p3 = scmp.lt.s32.totalorder %s3616_s18, 1  ;;  %v462_v0 = vld [vmem:[%s7242_s3 + $0x30] sm:$0xff]  ;;  %v4554_v1 = vmov 0   ;;  %v463_v10 = vld [vmem:[%s7242_s3 + $0x38] sm:$0xff]  ;;  %v460_v11 = vld [vmem:[%s7242_s3 + $0x20] sm:$0xff]  ;;  %vm2572_vm0 = vcmask 523264  }
   0xd   : > { %4511 = vset.pattern.permute.xlu0 %v4554_v1  ;;  %4512 = vset.pattern.permute.xlu1 %v4554_v1  ;;  %v456_v16 = vld [vmem:[%s7242_s3] sm:$0xff]  ;;  %v461_v19 = vld [vmem:[%s7242_s3 + $0x28] sm:$0xff]  ;;  %v4319_v32 = vld [vmem:[%s7241_s2 + $0xc] sm:$0xf0]  ;;  %s3303_s14 = sld [smem:[#allocation3]] }
   0xe   : > { %s7631_s18 = smov (!%p189_p3, %s3616_s18), 1  ;;  %568 = vperm.xlu0 %4511, %v462_v0   ;;  %4513 = vset.pattern.permute.xlu2 %v4554_v1  ;;  %v457_v26 = vld [vmem:[%s7242_s3 + $0x8] sm:$0xff]  ;;  %v3627_v30 = vld [vmem:[%s7241_s2] sm:$0xf]  ;;  %v4455_v34 = vld [vmem:[%s7241_s2 + $0x44c] sm:$0xf0] }
   0xf   : > { %s4315_s0 = sshll.u32 %s7631_s18, 9  ;;  %558 = vperm.xlu1 %4512, %v460_v11   ;;  %v4171_v33 = vld [vmem:[%s7241_s2 + $0x440] sm:$0xf]  ;;  %v3628_v35 = vor.u32 %v4319_v32, %v3627_v30  ;;  %v4323_v38 = vld [vmem:[%s7241_s2 + $0x2c] sm:$0xf0]  ;;  %v459_v44 = vld [vmem:[%s7242_s3 + $0x18] sm:$0xff] }
  0x10   : > { %s4603_s23 = scalar_lea.vmem %s7240_s1, %s4315_s0  ;;  %v4172_v36 = vor.u32 %v4455_v34, %v4171_v33  ;;  %v3643_v37 = vld [vmem:[%s7241_s2 + $0x20] sm:$0xf]  ;;  %v4459_v40 = vld [vmem:[%s7241_s2 + $0x46c] sm:$0xf0]  ;;  %v471_v54 = vld [vmem:[%s7242_s3 + $0x78] sm:$0xff]  ;;  %s6942_s19 = scalar_lea.vmem %s7243_s4, %s4315_s0 }
  0x11   : > { %v374_v2 = vld [vmem:[%s4603_s23 + $0x70] sm:$0xff]  ;;  %v375_v3 = vld [vmem:[%s4603_s23 + $0x78] sm:$0xff]  ;;  %v372_v4 = vld [vmem:[%s4603_s23 + $0x60] sm:$0xff]  ;;  %v3644_v41 = vor.u32 %v4323_v38, %v3643_v37 }
  0x12   : > { %v431_v5 = vpack.c.bf16 %v375_v3, %v374_v2  ;;  %v373_v6 = vld [vmem:[%s4603_s23 + $0x68] sm:$0xff]  ;;  %v370_v8 = vld [vmem:[%s4603_s23 + $0x50] sm:$0xff]  ;;  %v371_v9 = vld [vmem:[%s4603_s23 + $0x58] sm:$0xff] }
  0x13   : > { %v430_v7 = vpack.c.bf16 %v373_v6, %v372_v4  ;;  %v429_v12 = vpack.c.bf16 %v371_v9, %v370_v8  ;;  %v368_v13 = vld [vmem:[%s4603_s23 + $0x40] sm:$0xff]  ;;  %v369_v14 = vld [vmem:[%s4603_s23 + $0x48] sm:$0xff]  ;;  %v366_v17 = vld [vmem:[%s4603_s23 + $0x30] sm:$0xff] }
  0x14   : > { %1736 = vmatpush.bf16.msra.mxu0 %v431_v5  ;;  %4477 = vmatpush.bf16.msra.mxu1 %v431_v5  ;;  %v428_v15 = vpack.c.bf16 %v369_v14, %v368_v13  ;;  %v367_v18 = vld [vmem:[%s4603_s23 + $0x38] sm:$0xff]  ;;  %v364_v21 = vld [vmem:[%s4603_s23 + $0x20] sm:$0xff]  ;;  %v365_v22 = vld [vmem:[%s4603_s23 + $0x28] sm:$0xff] }
  0x15   : > { %v427_v20 = vpack.c.bf16 %v367_v18, %v366_v17  ;;  %v426_v23 = vpack.c.bf16 %v365_v22, %v364_v21  ;;  %v362_v24 = vld [vmem:[%s4603_s23 + $0x10] sm:$0xff]  ;;  %v363_v25 = vld [vmem:[%s4603_s23 + $0x18] sm:$0xff]  ;;  %v360_v28 = vld [vmem:[%s4603_s23] sm:$0xff] }
  0x16   : > { %573 = vperm.xlu0 %4511, %v463_v10   ;;  %v425_v27 = vpack.c.bf16 %v363_v25, %v362_v24  ;;  %v361_v29 = vld [vmem:[%s4603_s23 + $0x8] sm:$0xff]  ;;  %v4187_v39 = vld [vmem:[%s7241_s2 + $0x460] sm:$0xf]  ;;  %v458_v43 = vld [vmem:[%s7242_s3 + $0x10] sm:$0xff] }
  0x17   : > { %563 = vperm.xlu1 %4512, %v461_v19   ;;  %v424_v31 = vpack.c.bf16 %v361_v29, %v360_v28  ;;  %v4188_v42 = vor.u32 %v4459_v40, %v4187_v39  ;;  %548 = vperm.xlu2 %4513, %v458_v43   ;;  %v3659_v45 = vld [vmem:[%s7241_s2 + $0x40] sm:$0xf]  ;;  %v4327_v46 = vld [vmem:[%s7241_s2 + $0x4c] sm:$0xf0]  ;;  %v391_v52 = vld [vmem:[%s4603_s23 + $0xf8] sm:$0xff] }
  0x18   : > { %1737 = vmatpush.bf16.msra.mxu0 %v430_v7  ;;  %4478 = vmatpush.bf16.msra.mxu1 %v430_v7  ;;  %v4203_v47 = vld [vmem:[%s7241_s2 + $0x480] sm:$0xf]  ;;  %v4463_v48 = vld [vmem:[%s7241_s2 + $0x48c] sm:$0xf0]  ;;  %v3660_v49 = vor.u32 %v4327_v46, %v3659_v45  ;;  %v389_v56 = vld [vmem:[%s4603_s23 + $0xe8] sm:$0xff] }
  0x19   : > { %v4204_v50 = vor.u32 %v4463_v48, %v4203_v47  ;;  %v390_v51 = vld [vmem:[%s4603_s23 + $0xf0] sm:$0xff]  ;;  %v388_v55 = vld [vmem:[%s4603_s23 + $0xe0] sm:$0xff]  ;;  %v387_v59 = vld [vmem:[%s4603_s23 + $0xd8] sm:$0xff] }
  0x1a   : > { %v439_v53 = vpack.c.bf16 %v391_v52, %v390_v51  ;;  %v438_v57 = vpack.c.bf16 %v389_v56, %v388_v55  ;;  %v386_v58 = vld [vmem:[%s4603_s23 + $0xd0] sm:$0xff]  ;;  %v384_v62 = vld [vmem:[%s4603_s23 + $0xc0] sm:$0xff]  ;;  %v385_v63 = vld [vmem:[%s4603_s23 + $0xc8] sm:$0xff] }
  0x1b   : > { %v437_v60 = vpack.c.bf16 %v387_v59, %v386_v58  ;;  %v466_v61 = vld [vmem:[%s7242_s3 + $0x50] sm:$0xff]  ;;  %v3675_v0 = vld [vmem:[%s7241_s2 + $0x60] sm:$0xf]  ;;  %v436_v4 = vpack.c.bf16 %v385_v63, %v384_v62  ;;  %v383_v8 = vld [vmem:[%s4603_s23 + $0xb8] sm:$0xff] }
  0x1c   : > { %1738 = vmatpush.bf16.msra.mxu0 %v429_v12  ;;  %4479 = vmatpush.bf16.msra.mxu1 %v429_v12  ;;  %v4331_v1 = vld [vmem:[%s7241_s2 + $0x6c] sm:$0xf0]  ;;  %v4219_v2 = vld [vmem:[%s7241_s2 + $0x4a0] sm:$0xf]  ;;  %v465_v11 = vld [vmem:[%s7242_s3 + $0x48] sm:$0xff] }
  0x1d   : > { %v4467_v3 = vld [vmem:[%s7241_s2 + $0x4ac] sm:$0xf0]  ;;  %v3676_v5 = vor.u32 %v4331_v1, %v3675_v0  ;;  %v380_v12 = vld [vmem:[%s4603_s23 + $0xa0] sm:$0xff]  ;;  %v381_v13 = vld [vmem:[%s4603_s23 + $0xa8] sm:$0xff] }
  0x1e   : > { %538 = vperm.xlu0 %4511, %v456_v16   ;;  %v4220_v6 = vor.u32 %v4467_v3, %v4219_v2  ;;  %v382_v7 = vld [vmem:[%s4603_s23 + $0xb0] sm:$0xff]  ;;  %v434_v14 = vpack.c.bf16 %v381_v13, %v380_v12  ;;  %v379_v16 = vld [vmem:[%s4603_s23 + $0x98] sm:$0xff]  ;;  %v468_v17 = vld [vmem:[%s7242_s3 + $0x60] sm:$0xff] }
  0x1f   : > { %543 = vperm.xlu1 %4512, %v457_v26   ;;  %553 = vperm.xlu2 %4513, %v459_v44   ;;  %v435_v9 = vpack.c.bf16 %v383_v8, %v382_v7  ;;  %v470_v10 = vld [vmem:[%s7242_s3 + $0x70] sm:$0xff]  ;;  %v469_v19 = vld [vmem:[%s7242_s3 + $0x68] sm:$0xff]  ;;  %v3691_v22 = vld [vmem:[%s7241_s2 + $0x80] sm:$0xf] }
  0x20   : > { %1739 = vmatpush.bf16.msra.mxu0 %v428_v15  ;;  %4480 = vmatpush.bf16.msra.mxu1 %v428_v15  ;;  %v378_v15 = vld [vmem:[%s4603_s23 + $0x90] sm:$0xff]  ;;  %v377_v21 = vld [vmem:[%s4603_s23 + $0x88] sm:$0xff]  ;;  %v4235_v24 = vld [vmem:[%s7241_s2 + $0x4c0] sm:$0xf] }
  0x21   : > { %v433_v18 = vpack.c.bf16 %v379_v16, %v378_v15  ;;  %v4471_v25 = vld [vmem:[%s7241_s2 + $0x4cc] sm:$0xf0]  ;;  %v464_v29 = vld [vmem:[%s7242_s3 + $0x40] sm:$0xff]  ;;  %v467_v30 = vld [vmem:[%s7242_s3 + $0x58] sm:$0xff] }
  0x22   : > { %v4236_v28 = vor.u32 %v4471_v25, %v4235_v24  ;;  %v4339_v32 = vld [vmem:[%s7241_s2 + $0xac] sm:$0xf0]  ;;  %v4251_v33 = vld [vmem:[%s7241_s2 + $0x4e0] sm:$0xf]  ;;  %v4317_v39 = vld [vmem:[%s7241_s2 + $0x4] sm:$0xf] }
  0x23   : > { %v4475_v34 = vld [vmem:[%s7241_s2 + $0x4ec] sm:$0xf0]  ;;  %v3723_v37 = vld [vmem:[%s7241_s2 + $0xc0] sm:$0xf]  ;;  %v3629_v40 = vld [vmem:[%s7241_s2 + $0x10] sm:$0xf0] }
  0x24   : > { %1740 = vmatpush.bf16.msra.mxu0 %v427_v20  ;;  %4481 = vmatpush.bf16.msra.mxu1 %v427_v20  ;;  %v376_v20 = vld [vmem:[%s4603_s23 + $0x80] sm:$0xff]  ;;  %v4343_v38 = vld [vmem:[%s7241_s2 + $0xcc] sm:$0xf0]  ;;  %v3645_v46 = vld [vmem:[%s7241_s2 + $0x30] sm:$0xf0] }
  0x25   : > { %v432_v26 = vpack.c.bf16 %v377_v21, %v376_v20  ;;  %v3739_v43 = vld [vmem:[%s7241_s2 + $0xe0] sm:$0xf]  ;;  %v4347_v44 = vld [vmem:[%s7241_s2 + $0xec] sm:$0xf0]  ;;  %v4321_v45 = vld [vmem:[%s7241_s2 + $0x24] sm:$0xf] }
  0x26   : > { %613 = vperm.xlu0 %4511, %v471_v54   ;;  %v3740_v47 = vor.u32 %v4347_v44, %v3739_v43  ;;  %v3648_v48 = vor.u32 %v4321_v45, %v3645_v46  ;;  %v4325_v51 = vld [vmem:[%s7241_s2 + $0x44] sm:$0xf]  ;;  %v3661_v52 = vld [vmem:[%s7241_s2 + $0x50] sm:$0xf0]  ;;  %v3771_v59 = vld [vmem:[%s7241_s2 + $0x120] sm:$0xf] }
  0x27   : > { %608 = vperm.xlu2 %4513, %v470_v10   ;;  %598 = vperm.xlu1 %4512, %v468_v17   ;;  %v3664_v54 = vor.u32 %v4325_v51, %v3661_v52  ;;  %v3677_v62 = vld [vmem:[%s7241_s2 + $0x70] sm:$0xf0]  ;;  %v4333_v7 = vld [vmem:[%s7241_s2 + $0x84] sm:$0xf]  ;;  %v3803_v15 = vld [vmem:[%s7241_s2 + $0x160] sm:$0xf] }
  0x28   : > { %1741 = vmatpush.bf16.msra.mxu0 %v426_v23  ;;  %4482 = vmatpush.bf16.msra.mxu1 %v426_v23  ;;  %v4335_v23 = vld [vmem:[%s7241_s2 + $0x8c] sm:$0xf0]  ;;  %v3693_v8 = vld [vmem:[%s7241_s2 + $0x90] sm:$0xf0]  ;;  %v4337_v17 = vld [vmem:[%s7241_s2 + $0xa4] sm:$0xf] }
  0x29   : > { %v3696_v10 = vor.u32 %v4333_v7, %v3693_v8  ;;  %v4363_v16 = vld [vmem:[%s7241_s2 + $0x16c] sm:$0xf0] }
  0x2a   : > { %v3804_v20 = vor.u32 %v4363_v16, %v3803_v15  ;;  %v4375_v51 = vld [vmem:[%s7241_s2 + $0x1cc] sm:$0xf0] }
  0x2c   : > { %1742 = vmatpush.bf16.msra.mxu0 %v425_v27  ;;  %4483 = vmatpush.bf16.msra.mxu1 %v425_v27  ;;  %v3692_v27 = vor.u32 %v4335_v23, %v3691_v22 }
  0x2e   : > { %588 = vperm.xlu0 %4511, %v466_v61   ;;  %v4329_v61 = vld [vmem:[%s7241_s2 + $0x64] sm:$0xf] }
  0x2f   : > { %603 = vperm.xlu2 %4513, %v469_v19   ;;  %593 = vperm.xlu1 %4512, %v467_v30   ;;  %v3680_v0 = vor.u32 %v4329_v61, %v3677_v62  ;;  %v4367_v30 = vld [vmem:[%s7241_s2 + $0x18c] sm:$0xf0] }
  0x30   : > { %1743 = vmatpush.bf16.msra.mxu0 %v424_v31  ;;  %4484 = vmatpush.bf16.msra.mxu1 %v424_v31  ;;  %v3707_v31 = vld [vmem:[%s7241_s2 + $0xa0] sm:$0xf] }
  0x33   : > { %1744 = vmatmul.bf16.vlgmr.msra.gmra.mxu0 %v3628_v35  ;;  %1914 = vmatmul.bf16.vlgmr.msra.gmra.mxu1 %v4172_v36  ;;  %v3708_v35 = vor.u32 %v4339_v32, %v3707_v31  ;;  %v4252_v36 = vor.u32 %v4475_v34, %v4251_v33  ;;  %v4341_v31 = vld [vmem:[%s7241_s2 + $0xc4] sm:$0xf]  ;;  %v3725_v32 = vld [vmem:[%s7241_s2 + $0xd0] sm:$0xf0] }
  0x34   : > { %1945 = vmatpush.bf16.msrb.mxu1 %v439_v53  ;;  %v3728_v34 = vor.u32 %v4341_v31, %v3725_v32 }
  0x36   : > { %583 = vperm.xlu0 %4511, %v465_v11  }
  0x37   : > { %578 = vperm.xlu2 %4513, %v464_v29   ;;  %v3819_v29 = vld [vmem:[%s7241_s2 + $0x180] sm:$0xf] }
  0x38   : > { %1946 = vmatpush.bf16.msrb.mxu1 %v438_v57  ;;  %v3820_v33 = vor.u32 %v4367_v30, %v3819_v29 }
  0x3c   : > { %1947 = vmatpush.bf16.msrb.mxu1 %v437_v60  ;;  %v4355_v60 = vld [vmem:[%s7241_s2 + $0x12c] sm:$0xf0] }
  0x3d   : > { %v3772_v63 = vor.u32 %v4355_v60, %v3771_v59 }
  0x40   : > { %1948 = vmatpush.bf16.msrb.mxu1 %v436_v4 }
  0x43   : > { %1749 = vmatmul.bf16.gmra.mxu0 %v3644_v41  ;;  %1919 = vmatmul.bf16.gmra.mxu1 %v4188_v42  ;;  %v3724_v41 = vor.u32 %v4343_v38, %v3723_v37  ;;  %v3632_v42 = vor.u32 %v4317_v39, %v3629_v40  ;;  %v3835_v39 = vld [vmem:[%s7241_s2 + $0x1a0] sm:$0xf]  ;;  %v4371_v40 = vld [vmem:[%s7241_s2 + $0x1ac] sm:$0xf0] }
  0x44   : > { %1949 = vmatpush.bf16.msrb.mxu1 %v435_v9  ;;  %v3836_v43 = vor.u32 %v4371_v40, %v3835_v39  ;;  %v4387_v39 = vld [vmem:[%s7241_s2 + $0x22c] sm:$0xf0] }
  0x48   : > { %1950 = vmatpush.bf16.msrb.mxu1 %v434_v14 }
  0x4c   : > { %1951 = vmatpush.bf16.msrb.mxu1 %v433_v18  ;;  %v3709_v18 = vld [vmem:[%s7241_s2 + $0xb0] sm:$0xf0] }
  0x4d   : > { %v3712_v21 = vor.u32 %v4337_v17, %v3709_v18 }
  0x50   : > { %1952 = vmatpush.bf16.msrb.mxu1 %v432_v26 }
  0x53   : > { %1754 = vmatmul.bf16.gmra.mxu0 %v3660_v49  ;;  %1924 = vmatmul.bf16.gmra.mxu1 %v4204_v50  ;;  %v3755_v49 = vld [vmem:[%s7241_s2 + $0x100] sm:$0xf]  ;;  %v4351_v50 = vld [vmem:[%s7241_s2 + $0x10c] sm:$0xf0] }
  0x54   : > { %v3756_v53 = vor.u32 %v4351_v50, %v3755_v49  ;;  %v3851_v50 = vld [vmem:[%s7241_s2 + $0x1c0] sm:$0xf] }
  0x63   : > { %1759 = vmatmul.bf16.gmra.mxu0 %v3676_v5  ;;  %1929 = vmatmul.bf16.gmra.mxu1 %v4220_v6  ;;  %v3787_v5 = vld [vmem:[%s7241_s2 + $0x140] sm:$0xf]  ;;  %v4359_v6 = vld [vmem:[%s7241_s2 + $0x14c] sm:$0xf0] }
  0x64   : > { %v3788_v9 = vor.u32 %v4359_v6, %v3787_v5  ;;  %v3867_v5 = vld [vmem:[%s7241_s2 + $0x1e0] sm:$0xf] }
  0x71   : > { %v549_v52 = vpop.permute.xlu2 %548 }
  0x73   : > { %1764 = vmatmul.bf16.gmra.mxu0 %v3692_v27  ;;  %1934 = vmatmul.bf16.gmra.mxu1 %v4236_v28 }
  0x79   : > { %v4909_v62 = vpop.permute.xlu2 %553 }
  0x80   : > { %v569_v19 = vpop.permute.xlu0 %568 }
  0x81   : > { %v609_v7 = vpop.permute.xlu2 %608 }
  0x83   : > { %1769 = vmatmul.bf16.gmra.mxu0 %v3708_v35  ;;  %1939 = vmatmul.bf16.gmra.mxu1 %v4252_v36 }
  0x88   : > { %v574_v25 = vpop.permute.xlu0 %573 }
  0x90   : > { %v539_v49 = vpop.permute.xlu0 %538 }
  0x93   : > { %1774 = vmatmul.bf16.gmra.mxu0 %v3724_v41  ;;  %1953 = vmatmul.bf16.vlgmr.msrb.gmra.mxu1 %v3632_v42  ;;  %v4345_v41 = vld [vmem:[%s7241_s2 + $0xe4] sm:$0xf]  ;;  %v3741_v42 = vld [vmem:[%s7241_s2 + $0xf0] sm:$0xf0] }
  0x94   : > { %v3744_v44 = vor.u32 %v4345_v41, %v3741_v42 }
  0x98   : > { %v614_v17 = vpop.permute.xlu0 %613 }
  0xa3   : > { %1779 = vmatmul.bf16.gmra.mxu0 %v3740_v47  ;;  %1958 = vmatmul.bf16.gmra.mxu1 %v3648_v48 }
  0xb0   : > { %v4790_v55 = vpop.f32.mrf.mxu0  ;;  %v4792_v56 = vpop.f32.mrf.mxu1 }
  0xb1   : > { %7244 = vst [vmem:[#allocation4_spill] sm:$0xff] %v4792_v56 }
  0xb3   : > { %1784 = vmatmul.bf16.gmra.mxu0 %v3756_v53  ;;  %1963 = vmatmul.bf16.gmra.mxu1 %v3664_v54  ;;  %v1746_v53 = vadd.f32 %v4790_v55, %v539_v49  ;;  %v3852_v54 = vor.u32 %v4375_v51, %v3851_v50  ;;  %v4379_v55 = vld [vmem:[%s7241_s2 + $0x1ec] sm:$0xf0]  ;;  %v3915_v51 = vld [vmem:[%s7241_s2 + $0x240] sm:$0xf] }
  0xb4   : > { %v3868_v8 = vor.u32 %v4379_v55, %v3867_v5 }
  0xb8   : > { %v4794_v57 = vpop.f32.mrf.mxu0  ;;  %v4796_v58 = vpop.f32.mrf.mxu1 }
  0xb9   : > { %7245 = vst [vmem:[#allocation5_spill] sm:$0xff] %v4796_v58 }
  0xc0   : > { %v4810_v1 = vpop.f32.mrf.mxu0  ;;  %v4812_v2 = vpop.f32.mrf.mxu1 }
  0xc1   : > { %7246 = vst [vmem:[#allocation6_spill] sm:$0xff] %v4812_v2  ;;  %v1751_v6 = vadd.f32 %v4810_v1, %v549_v52  ;;  %v4383_v1 = vld [vmem:[%s7241_s2 + $0x20c] sm:$0xf0] }
  0xc2   : > { %v4391_v52 = vld [vmem:[%s7241_s2 + $0x24c] sm:$0xf0] }
  0xc3   : > { %1789 = vmatmul.bf16.gmra.mxu0 %v3772_v63  ;;  %1968 = vmatmul.bf16.gmra.mxu1 %v3680_v0 }
  0xc8   : > { %v4814_v3 = vpop.f32.mrf.mxu0  ;;  %v4816_v4 = vpop.f32.mrf.mxu1 }
  0xc9   : > { %7247 = vst [vmem:[#allocation7_spill] sm:$0xff] %v4816_v4  ;;  %v4091_v4 = vld [vmem:[%s7241_s2 + $0x3a0] sm:$0xf] }
  0xd0   : > { %v4830_v11 = vpop.f32.mrf.mxu0  ;;  %v4832_v12 = vpop.f32.mrf.mxu1 }
  0xd1   : > { %7248 = vst [vmem:[#allocation8_spill] sm:$0xff] %v4832_v12 }
  0xd3   : > { %1794 = vmatmul.bf16.gmra.mxu0 %v3788_v9  ;;  %1973 = vmatmul.bf16.gmra.mxu1 %v3696_v10 }
  0xd8   : > { %v4834_v13 = vpop.f32.mrf.mxu0  ;;  %v4836_v14 = vpop.f32.mrf.mxu1 }
  0xd9   : > { %7249 = vst [vmem:[#allocation9_spill] sm:$0xff] %v4836_v14 }
  0xe0   : > { %v1760_v22 = vpop.f32.mrf.mxu0  ;;  %v4850_v23 = vpop.f32.mrf.mxu1 }
  0xe1   : > { %7250 = vst [vmem:[#allocation10_spill] sm:$0xff] %v4850_v23  ;;  %v4852_v24 = vadd.f32 %v1760_v22, %v569_v19  ;;  %v559_v22 = vpop.permute.xlu1 %558  ;;  %v4075_v23 = vld [vmem:[%s7241_s2 + $0x380] sm:$0xf] }
  0xe3   : > { %1799 = vmatmul.bf16.gmra.mxu0 %v3804_v20  ;;  %1978 = vmatmul.bf16.gmra.mxu1 %v3712_v21  ;;  %v3883_v21 = vld [vmem:[%s7241_s2 + $0x200] sm:$0xf] }
  0xe8   : > { %v1762_v26 = vpop.f32.mrf.mxu0  ;;  %v4854_v27 = vpop.f32.mrf.mxu1 }
  0xe9   : > { %7251 = vst [vmem:[#allocation11_spill] sm:$0xff] %v4854_v27  ;;  %v4856_v28 = vadd.f32 %v1762_v26, %v574_v25  ;;  %v1756_v25 = vadd.f32 %v4830_v11, %v559_v22  ;;  %v3884_v26 = vor.u32 %v4383_v1, %v3883_v21  ;;  %v406_v22 = vld [vmem:[%s4603_s23 + $0x170] sm:$0xff] }
  0xf0   : > { %v4870_v35 = vpop.f32.mrf.mxu0  ;;  %v4872_v36 = vpop.f32.mrf.mxu1 }
  0xf1   : > { %7252 = vst [vmem:[#allocation12_spill] sm:$0xff] %v4872_v36  ;;  %v4043_v36 = vld [vmem:[%s7241_s2 + $0x340] sm:$0xf] }
  0xf3   : > { %1804 = vmatmul.bf16.gmra.mxu0 %v3820_v33  ;;  %1983 = vmatmul.bf16.gmra.mxu1 %v3728_v34  ;;  %v3899_v34 = vld [vmem:[%s7241_s2 + $0x220] sm:$0xf] }
  0xf4   : > { %v3900_v11 = vor.u32 %v4387_v39, %v3899_v34 }
  0xf8   : > { %v4874_v37 = vpop.f32.mrf.mxu0  ;;  %v4876_v38 = vpop.f32.mrf.mxu1 }
  0xf9   : > { %7253 = vst [vmem:[#allocation13_spill] sm:$0xff] %v4876_v38  ;;  %v4059_v38 = vld [vmem:[%s7241_s2 + $0x360] sm:$0xf] }
 0x100   : > { %v4890_v45 = vpop.f32.mrf.mxu0  ;;  %v4892_v46 = vpop.f32.mrf.mxu1 }
 0x101   : > { %7254 = vst [vmem:[#allocation14_spill] sm:$0xff] %v4892_v46 }
 0x103   : > { %1809 = vmatmul.bf16.gmra.mxu0 %v3836_v43  ;;  %1988 = vmatmul.bf16.gmra.mxu1 %v3744_v44  ;;  %v4956_v43 = vpop.permute.xlu2 %603 }
 0x108   : > { %v4894_v47 = vpop.f32.mrf.mxu0  ;;  %v4896_v48 = vpop.f32.mrf.mxu1 }
 0x109   : > { %7255 = vst [vmem:[#allocation15_spill] sm:$0xff] %v4896_v48 }
 0x10b   : > { %v579_v50 = vpop.permute.xlu2 %578 }
 0x110   : > { %v4905_v59 = vpop.f32.mrf.mxu0  ;;  %v1954_v60 = vpop.f32.mrf.mxu1 }
 0x111   : > { %v4907_v61 = vadd.f32 %v1954_v60, %v1746_v53  ;;  %v1766_v53 = vadd.f32 %v4870_v35, %v579_v50  ;;  %v4395_v35 = vld [vmem:[%s7241_s2 + $0x26c] sm:$0xf0]  ;;  %v3947_v50 = vld [vmem:[%s7241_s2 + $0x280] sm:$0xf] }
 0x113   : > { %1814 = vmatmul.bf16.gmra.mxu0 %v3852_v54 }
 0x118   : > { %v4911_v63 = vpop.f32.mrf.mxu0  ;;  %v4913_v0 = vpop.f32.mrf.mxu1 }
 0x120   : > { %v1780_v9 = vpop.f32.mrf.mxu0  ;;  %v1959_v10 = vpop.f32.mrf.mxu1 }
 0x121   : > { %v4922_v15 = vadd.f32 %v1780_v9, %v609_v7  ;;  %v4924_v16 = vadd.f32 %v1959_v10, %v1751_v6  ;;  %v4977_v7 = vpop.permute.xlu1 %563  ;;  %v589_v9 = vpop.permute.xlu0 %588 }
 0x122   : > { %v1771_v10 = vadd.f32 %v4890_v45, %v589_v9  ;;  %v404_v45 = vld [vmem:[%s4603_s23 + $0x160] sm:$0xff] }
 0x123   : > { %1819 = vmatmul.bf16.gmra.mxu0 %v3868_v8  ;;  %v3931_v8 = vld [vmem:[%s7241_s2 + $0x260] sm:$0xf] }
 0x128   : > { %v1782_v18 = vpop.f32.mrf.mxu0  ;;  %v4926_v19 = vpop.f32.mrf.mxu1 }
 0x129   : > { %v4928_v20 = vadd.f32 %v1782_v18, %v614_v17  ;;  %v3932_v17 = vor.u32 %v4395_v35, %v3931_v8 }
 0x130   : > { %v4937_v29 = vpop.f32.mrf.mxu0  ;;  %v1964_v30 = vpop.f32.mrf.mxu1 }
 0x131   : > { %v4939_v31 = vadd.f32 %v1964_v30, %v1756_v25  ;;  %v407_v25 = vld [vmem:[%s4603_s23 + $0x178] sm:$0xff] }
 0x132   : > { %v447_v30 = vpack.c.bf16 %v407_v25, %v406_v22  ;;  %v401_v22 = vld [vmem:[%s4603_s23 + $0x148] sm:$0xff] }
 0x133   : > { %1824 = vmatmul.bf16.gmra.mxu0 %v3884_v26  ;;  %v4992_v26 = vpop.permute.xlu1 %543 }
 0x134   : > { %4486 = vmatpush.bf16.msra.mxu3 %v447_v30  ;;  %2154 = vmatpush.bf16.msrb.mxu0 %v447_v30 }
 0x135   : > { %4485 = vmatpush.bf16.msra.mxu2 %v447_v30  ;;  %v398_v30 = vld [vmem:[%s4603_s23 + $0x130] sm:$0xff] }
 0x138   : > { %v4941_v32 = vpop.f32.mrf.mxu0  ;;  %v4943_v33 = vpop.f32.mrf.mxu1 }
 0x140   : > { %v4951_v40 = vpop.f32.mrf.mxu0  ;;  %v1969_v41 = vpop.f32.mrf.mxu1 }
 0x141   : > { %v4954_v42 = vadd.f32 %v1969_v41, %v4852_v24  ;;  %v3916_v24 = vor.u32 %v4391_v52, %v3915_v51  ;;  %v4399_v51 = vld [vmem:[%s7241_s2 + $0x28c] sm:$0xf0] }
 0x142   : > { %v402_v52 = vld [vmem:[%s4603_s23 + $0x150] sm:$0xff]  ;;  %v3948_v35 = vor.u32 %v4399_v51, %v3947_v50  ;;  %v396_v50 = vld [vmem:[%s4603_s23 + $0x120] sm:$0xff]  ;;  %v397_v51 = vld [vmem:[%s4603_s23 + $0x128] sm:$0xff] }
 0x143   : > { %1829 = vmatmul.bf16.gmra.mxu0 %v3900_v11  ;;  %v405_v11 = vld [vmem:[%s4603_s23 + $0x168] sm:$0xff] }
 0x144   : > { %v446_v41 = vpack.c.bf16 %v405_v11, %v404_v45 }
 0x146   : > { %4488 = vmatpush.bf16.msra.mxu3 %v446_v41  ;;  %2155 = vmatpush.bf16.msrb.mxu0 %v446_v41 }
 0x147   : > { %4487 = vmatpush.bf16.msra.mxu2 %v446_v41 }
 0x148   : > { %v4958_v44 = vpop.f32.mrf.mxu0  ;;  %v4960_v49 = vpop.f32.mrf.mxu1 }
 0x149   : > { %7256 = vst [vmem:[#allocation16_spill] sm:$0xff] %v4958_v44 }
 0x150   : > { %v4969_v54 = vpop.f32.mrf.mxu0  ;;  %v1974_v60 = vpop.f32.mrf.mxu1 }
 0x151   : > { %v4971_v5 = vadd.f32 %v1974_v60, %v1766_v53  ;;  %v403_v53 = vld [vmem:[%s4603_s23 + $0x158] sm:$0xff] }
 0x152   : > { %v445_v60 = vpack.c.bf16 %v403_v53, %v402_v52  ;;  %v442_v52 = vpack.c.bf16 %v397_v51, %v396_v50  ;;  %v3963_v53 = vld [vmem:[%s7241_s2 + $0x2a0] sm:$0xf]  ;;  %v4115_v50 = vld [vmem:[%s7241_s2 + $0x3c8] sm:$0xf]  ;;  %v4440_v51 = vld [vmem:[%s7241_s2 + $0x3d4] sm:$0xf0] }
 0x153   : > { %1834 = vmatmul.bf16.gmra.mxu0 %v3916_v24  ;;  %v599_v24 = vpop.permute.xlu1 %598 }
 0x154   : > { %v1776_v8 = vadd.f32 %v4905_v59, %v599_v24  ;;  %4490 = vmatpush.bf16.msra.mxu3 %v445_v60  ;;  %2156 = vmatpush.bf16.msrb.mxu0 %v445_v60  ;;  %v399_v59 = vld [vmem:[%s4603_s23 + $0x138] sm:$0xff]  ;;  %v4403_v24 = vld [vmem:[%s7241_s2 + $0x2ac] sm:$0xf0] }
 0x155   : > { %4489 = vmatpush.bf16.msra.mxu2 %v445_v60  ;;  %v443_v45 = vpack.c.bf16 %v399_v59, %v398_v30  ;;  %v394_v60 = vld [vmem:[%s4603_s23 + $0x110] sm:$0xff]  ;;  %v392_v30 = vld [vmem:[%s4603_s23 + $0x100] sm:$0xff]  ;;  %v393_v59 = vld [vmem:[%s4603_s23 + $0x108] sm:$0xff] }
 0x158   : > { %v4973_v55 = vpop.f32.mrf.mxu0  ;;  %v4975_v6 = vpop.f32.mrf.mxu1 }
 0x160   : > { %v4986_v18 = vpop.f32.mrf.mxu0  ;;  %v1979_v21 = vpop.f32.mrf.mxu1 }
 0x161   : > { %7257 = vst [vmem:[#allocation17_spill] sm:$0xff] %v4986_v18  ;;  %v4988_v1 = vadd.f32 %v1979_v21, %v1771_v10  ;;  %v400_v21 = vld [vmem:[%s4603_s23 + $0x140] sm:$0xff] }
 0x162   : > { %v444_v25 = vpack.c.bf16 %v401_v22, %v400_v21 }
 0x163   : > { %1839 = vmatmul.bf16.gmra.mxu0 %v3932_v17 }
 0x164   : > { %4492 = vmatpush.bf16.msra.mxu3 %v444_v25  ;;  %2157 = vmatpush.bf16.msrb.mxu0 %v444_v25 }
 0x165   : > { %4491 = vmatpush.bf16.msra.mxu2 %v444_v25 }
 0x168   : > { %v4994_v34 = vpop.f32.mrf.mxu0  ;;  %v4996_v39 = vpop.f32.mrf.mxu1  ;;  %4494 = vmatpush.bf16.msra.mxu3 %v443_v45  ;;  %2158 = vmatpush.bf16.msrb.mxu0 %v443_v45 }
 0x169   : > { %4493 = vmatpush.bf16.msra.mxu2 %v443_v45  ;;  %v440_v45 = vpack.c.bf16 %v393_v59, %v392_v30  ;;  %v4349_v30 = vld [vmem:[%s7241_s2 + $0x104] sm:$0xf]  ;;  %v3757_v59 = vld [vmem:[%s7241_s2 + $0x110] sm:$0xf0] }
 0x16c   : > { %4496 = vmatpush.bf16.msra.mxu3 %v442_v52  ;;  %2159 = vmatpush.bf16.msrb.mxu0 %v442_v52 }
 0x16d   : > { %4495 = vmatpush.bf16.msra.mxu2 %v442_v52  ;;  %v4116_v52 = vor.u32 %v4440_v51, %v4115_v50  ;;  %v3995_v51 = vld [vmem:[%s7241_s2 + $0x2e0] sm:$0xf] }
 0x170   : > { %v5009_v9 = vpop.f32.mrf.mxu0  ;;  %v1984_v10 = vpop.f32.mrf.mxu1 }
 0x171   : > { %v5011_v17 = vadd.f32 %v1984_v10, %v1776_v8  ;;  %v395_v8 = vld [vmem:[%s4603_s23 + $0x118] sm:$0xff]  ;;  %v3964_v10 = vor.u32 %v4403_v24, %v3963_v53  ;;  %v3979_v53 = vld [vmem:[%s7241_s2 + $0x2c0] sm:$0xf]  ;;  %v4407_v24 = vld [vmem:[%s7241_s2 + $0x2cc] sm:$0xf0] }
 0x173   : > { %1844 = vmatmul.bf16.gmra.mxu0 %v3948_v35  ;;  %v441_v35 = vpack.c.bf16 %v395_v8, %v394_v60  ;;  %v3980_v60 = vor.u32 %v4407_v24, %v3979_v53 }
 0x175   : > { %4498 = vmatpush.bf16.msra.mxu3 %v441_v35  ;;  %2160 = vmatpush.bf16.msrb.mxu0 %v441_v35 }
 0x176   : > { %4497 = vmatpush.bf16.msra.mxu2 %v441_v35  ;;  %v4131_v35 = vld [vmem:[%s7241_s2 + $0x3e8] sm:$0xf] }
 0x178   : > { %v5017_v11 = vpop.f32.mrf.mxu0  ;;  %v5019_v41 = vpop.f32.mrf.mxu1 }
 0x179   : > { %7258 = vst [vmem:[#allocation18_spill] sm:$0xff] %v5017_v11  ;;  %4500 = vmatpush.bf16.msra.mxu3 %v440_v45  ;;  %2161 = vmatpush.bf16.msrb.mxu0 %v440_v45 }
 0x17a   : > { %4499 = vmatpush.bf16.msra.mxu2 %v440_v45  ;;  %v3760_v45 = vor.u32 %v4349_v30, %v3757_v59  ;;  %v3773_v30 = vld [vmem:[%s7241_s2 + $0x130] sm:$0xf0] }
 0x17c   : > { %2312 = vmatmul.bf16.vlgmr.msra.gmra.mxu3 %v4116_v52  ;;  %1993 = vmatmul.bf16.gmra.mxu1 %v3760_v45  ;;  %v4411_v52 = vld [vmem:[%s7241_s2 + $0x2ec] sm:$0xf0] }
 0x17d   : > { %v3996_v53 = vor.u32 %v4411_v52, %v3995_v51  ;;  %v4011_v51 = vld [vmem:[%s7241_s2 + $0x300] sm:$0xf]  ;;  %v4415_v52 = vld [vmem:[%s7241_s2 + $0x30c] sm:$0xf0] }
 0x180   : > { %v5031_v21 = vpop.f32.mrf.mxu0  ;;  %v1989_v22 = vpop.f32.mrf.mxu1 }
 0x181   : > { %7259 = vst [vmem:[#allocation19_spill] sm:$0xff] %v5031_v21  ;;  %v5034_v25 = vadd.f32 %v1989_v22, %v4922_v15 }
 0x183   : > { %1849 = vmatmul.bf16.gmra.mxu0 %v3964_v10  ;;  %v4444_v10 = vld [vmem:[%s7241_s2 + $0x3f4] sm:$0xf0] }
 0x184   : > { %v4132_v22 = vor.u32 %v4444_v10, %v4131_v35  ;;  %v4448_v35 = vld [vmem:[%s7241_s2 + $0x414] sm:$0xf0] }
 0x188   : > { %v5044_v15 = vpop.f32.mrf.mxu0 }
 0x18c   : > { %2317 = vmatmul.bf16.gmra.mxu3 %v4132_v22  ;;  %v4353_v22 = vld [vmem:[%s7241_s2 + $0x124] sm:$0xf] }
 0x18d   : > { %v3776_v59 = vor.u32 %v4353_v22, %v3773_v30  ;;  %v4357_v30 = vld [vmem:[%s7241_s2 + $0x144] sm:$0xf] }
 0x18f   : > { %1998 = vmatmul.bf16.gmra.mxu1 %v3776_v59  ;;  %v3789_v59 = vld [vmem:[%s7241_s2 + $0x150] sm:$0xf0] }
 0x190   : > { %v5052_v8 = vpop.f32.mrf.mxu0 }
 0x191   : > { %7260 = vst [vmem:[#allocation20_spill] sm:$0xff] %v5052_v8 }
 0x193   : > { %1854 = vmatmul.bf16.gmra.mxu0 %v3980_v60  ;;  %v4147_v60 = vld [vmem:[%s7241_s2 + $0x408] sm:$0xf] }
 0x194   : > { %v4148_v10 = vor.u32 %v4448_v35, %v4147_v60  ;;  %v4163_v35 = vld [vmem:[%s7241_s2 + $0x428] sm:$0xf] }
 0x198   : > { %v5066_v50 = vpop.f32.mrf.mxu0 }
 0x199   : > { %7261 = vst [vmem:[#allocation21_spill] sm:$0xff] %v5066_v50 }
 0x19c   : > { %2322 = vmatmul.bf16.gmra.mxu3 %v4148_v10  ;;  %v4452_v10 = vld [vmem:[%s7241_s2 + $0x434] sm:$0xf0] }
 0x19d   : > { %v4164_v22 = vor.u32 %v4452_v10, %v4163_v35  ;;  %v4419_v35 = vld [vmem:[%s7241_s2 + $0x32c] sm:$0xf0] }
 0x1a0   : > { %v5074_v24 = vpop.f32.mrf.mxu0 }
 0x1a3   : > { %1859 = vmatmul.bf16.gmra.mxu0 %v3996_v53  ;;  %v4012_v53 = vor.u32 %v4415_v52, %v4011_v51  ;;  %v3792_v51 = vor.u32 %v4357_v30, %v3789_v59  ;;  %v4179_v30 = vld [vmem:[%s7241_s2 + $0x448] sm:$0xf] }
 0x1a5   : > { %2003 = vmatmul.bf16.gmra.mxu1 %v3792_v51  ;;  %v4361_v51 = vld [vmem:[%s7241_s2 + $0x164] sm:$0xf] }
 0x1a8   : > { %v5088_v45 = vpop.f32.mrf.mxu0 }
 0x1a9   : > { %7262 = vst [vmem:[#allocation22_spill] sm:$0xff] %v5088_v45  ;;  %v4318_v45 = vld [vmem:[%s7241_s2 + $0xc] sm:$0xf] }
 0x1ac   : > { %2327 = vmatmul.bf16.gmra.mxu3 %v4164_v22  ;;  %v4456_v22 = vld [vmem:[%s7241_s2 + $0x454] sm:$0xf0] }
 0x1ad   : > { %v4180_v59 = vor.u32 %v4456_v22, %v4179_v30  ;;  %v4423_v30 = vld [vmem:[%s7241_s2 + $0x34c] sm:$0xf0] }
 0x1ae   : > { %v4044_v22 = vor.u32 %v4423_v30, %v4043_v36  ;;  %v3821_v36 = vld [vmem:[%s7241_s2 + $0x190] sm:$0xf0] }
 0x1b0   : > { %v5096_v60 = vpop.f32.mrf.mxu0 }
 0x1b1   : > { %7263 = vst [vmem:[#allocation23_spill] sm:$0xff] %v5096_v60 }
 0x1b3   : > { %1864 = vmatmul.bf16.gmra.mxu0 %v4012_v53  ;;  %v4027_v53 = vld [vmem:[%s7241_s2 + $0x320] sm:$0xf] }
 0x1b4   : > { %v4028_v10 = vor.u32 %v4419_v35, %v4027_v53  ;;  %v3805_v53 = vld [vmem:[%s7241_s2 + $0x170] sm:$0xf0] }
 0x1b5   : > { %v3808_v35 = vor.u32 %v4361_v51, %v3805_v53  ;;  %v4195_v51 = vld [vmem:[%s7241_s2 + $0x468] sm:$0xf] }
 0x1b7   : > { %2008 = vmatmul.bf16.gmra.mxu1 %v3808_v35  ;;  %v4365_v35 = vld [vmem:[%s7241_s2 + $0x184] sm:$0xf] }
 0x1b8   : > { %v5110_v52 = vpop.f32.mrf.mxu0  ;;  %v3824_v30 = vor.u32 %v4365_v35, %v3821_v36  ;;  %v4211_v35 = vld [vmem:[%s7241_s2 + $0x488] sm:$0xf] }
 0x1b9   : > { %7264 = vst [vmem:[#allocation24_spill] sm:$0xff] %v5110_v52  ;;  %v3779_v52 = vld [vmem:[%s7241_s2 + $0x128] sm:$0xf] }
 0x1bc   : > { %2332 = vmatmul.bf16.gmra.mxu3 %v4180_v59  ;;  %v4460_v59 = vld [vmem:[%s7241_s2 + $0x474] sm:$0xf0] }
 0x1bd   : > { %v4196_v53 = vor.u32 %v4460_v59, %v4195_v51  ;;  %v4427_v51 = vld [vmem:[%s7241_s2 + $0x36c] sm:$0xf0] }
 0x1be   : > { %v4060_v59 = vor.u32 %v4427_v51, %v4059_v38  ;;  %v3837_v38 = vld [vmem:[%s7241_s2 + $0x1b0] sm:$0xf0] }
 0x1c0   : > { %v5118_v48 = vpop.f32.mrf.mxu0 }
 0x1c1   : > { %7265 = vst [vmem:[#allocation25_spill] sm:$0xff] %v5118_v48  ;;  %v4107_v48 = vld [vmem:[%s7241_s2 + $0x3c0] sm:$0xf] }
 0x1c3   : > { %1869 = vmatmul.bf16.gmra.mxu0 %v4028_v10 }
 0x1c7   : > { %2013 = vmatmul.bf16.gmra.mxu1 %v3824_v30  ;;  %v4369_v30 = vld [vmem:[%s7241_s2 + $0x1a4] sm:$0xf] }
 0x1c8   : > { %v5132_v10 = vpop.f32.mrf.mxu0  ;;  %v3840_v51 = vor.u32 %v4369_v30, %v3837_v38  ;;  %v4227_v30 = vld [vmem:[%s7241_s2 + $0x4a8] sm:$0xf] }
 0x1c9   : > { %7266 = vst [vmem:[#allocation26_spill] sm:$0xff] %v5132_v10 }
 0x1cc   : > { %2337 = vmatmul.bf16.gmra.mxu3 %v4196_v53  ;;  %v4464_v53 = vld [vmem:[%s7241_s2 + $0x494] sm:$0xf0] }
 0x1cd   : > { %v4212_v36 = vor.u32 %v4464_v53, %v4211_v35  ;;  %v4431_v35 = vld [vmem:[%s7241_s2 + $0x38c] sm:$0xf0] }
 0x1ce   : > { %v4076_v53 = vor.u32 %v4431_v35, %v4075_v23  ;;  %v3853_v23 = vld [vmem:[%s7241_s2 + $0x1d0] sm:$0xf0] }
 0x1d0   : > { %v5140_v14 = vpop.f32.mrf.mxu0 }
 0x1d1   : > { %7267 = vst [vmem:[#allocation27_spill] sm:$0xff] %v5140_v14 }
 0x1d3   : > { %1874 = vmatmul.bf16.gmra.mxu0 %v4044_v22 }
 0x1d7   : > { %2018 = vmatmul.bf16.gmra.mxu1 %v3840_v51  ;;  %v4373_v51 = vld [vmem:[%s7241_s2 + $0x1c4] sm:$0xf] }
 0x1d8   : > { %v5154_v22 = vpop.f32.mrf.mxu0  ;;  %v3856_v35 = vor.u32 %v4373_v51, %v3853_v23  ;;  %v4472_v51 = vld [vmem:[%s7241_s2 + $0x4d4] sm:$0xf0] }
 0x1d9   : > { %7268 = vst [vmem:[#allocation28_spill] sm:$0xff] %v5154_v22 }
 0x1dc   : > { %2342 = vmatmul.bf16.gmra.mxu3 %v4212_v36  ;;  %v4468_v36 = vld [vmem:[%s7241_s2 + $0x4b4] sm:$0xf0] }
 0x1dd   : > { %v4228_v38 = vor.u32 %v4468_v36, %v4227_v30  ;;  %v4435_v30 = vld [vmem:[%s7241_s2 + $0x3ac] sm:$0xf0] }
 0x1de   : > { %v4092_v36 = vor.u32 %v4435_v30, %v4091_v4  ;;  %v3869_v4 = vld [vmem:[%s7241_s2 + $0x1f0] sm:$0xf0] }
 0x1df   : > { %v422_v30 = vld [vmem:[%s4603_s23 + $0x1f0] sm:$0xff] }
 0x1e0   : > { %v5162_v2 = vpop.f32.mrf.mxu0 }
 0x1e1   : > { %7269 = vst [vmem:[#allocation29_spill] sm:$0xff] %v5162_v2  ;;  %v4123_v2 = vld [vmem:[%s7241_s2 + $0x3e0] sm:$0xf] }
 0x1e3   : > { %1879 = vmatmul.bf16.gmra.mxu0 %v4060_v59 }
 0x1e7   : > { %2023 = vmatmul.bf16.gmra.mxu1 %v3856_v35  ;;  %v4377_v35 = vld [vmem:[%s7241_s2 + $0x1e4] sm:$0xf] }
 0x1e8   : > { %v5176_v59 = vpop.f32.mrf.mxu0  ;;  %v3872_v56 = vor.u32 %v4377_v35, %v3869_v4  ;;  %v419_v35 = vld [vmem:[%s4603_s23 + $0x1d8] sm:$0xff] }
 0x1e9   : > { %7270 = vst [vmem:[#allocation30_spill] sm:$0xff] %v5176_v59 }
 0x1ec   : > { %2347 = vmatmul.bf16.gmra.mxu3 %v4228_v38  ;;  %v4243_v38 = vld [vmem:[%s7241_s2 + $0x4c8] sm:$0xf] }
 0x1ed   : > { %v4244_v23 = vor.u32 %v4472_v51, %v4243_v38  ;;  %v420_v38 = vld [vmem:[%s4603_s23 + $0x1e0] sm:$0xff]  ;;  %v421_v51 = vld [vmem:[%s4603_s23 + $0x1e8] sm:$0xff] }
 0x1f0   : > { %v5184_v46 = vpop.f32.mrf.mxu0 }
 0x1f1   : > { %7271 = vst [vmem:[#allocation31_spill] sm:$0xff] %v5184_v46  ;;  %v454_v46 = vpack.c.bf16 %v421_v51, %v420_v38  ;;  %v417_v38 = vld [vmem:[%s4603_s23 + $0x1c8] sm:$0xff] }
 0x1f3   : > { %1884 = vmatmul.bf16.gmra.mxu0 %v4076_v53 }
 0x1f7   : > { %2028 = vmatmul.bf16.gmra.mxu1 %v3872_v56  ;;  %v4439_v56 = vld [vmem:[%s7241_s2 + $0x3cc] sm:$0xf0] }
 0x1f8   : > { %v5198_v53 = vpop.f32.mrf.mxu0  ;;  %v4108_v4 = vor.u32 %v4439_v56, %v4107_v48  ;;  %v4476_v48 = vld [vmem:[%s7241_s2 + $0x4f4] sm:$0xf0] }
 0x1f9   : > { %7272 = vst [vmem:[#allocation32_spill] sm:$0xff] %v5198_v53  ;;  %v5228_v53 = vpop.f32.mrf.mxu1 }
 0x1fc   : > { %2352 = vmatmul.bf16.gmra.mxu3 %v4244_v23  ;;  %v418_v23 = vld [vmem:[%s4603_s23 + $0x1d0] sm:$0xff] }
 0x1ff   : > { %v5226_v22 = vpop.f32.mrf.mxu3 }
 0x200   : > { %v5206_v27 = vpop.f32.mrf.mxu0  ;;  %7275 = vst [vmem:[#allocation35_spill] sm:$0xff] %v5226_v22 }
 0x201   : > { %7273 = vst [vmem:[#allocation33_spill] sm:$0xff] %v5206_v27 }
 0x203   : > { %1889 = vmatmul.bf16.gmra.mxu0 %v4092_v36  ;;  %v423_v36 = vld [vmem:[%s4603_s23 + $0x1f8] sm:$0xff] }
 0x204   : > { %v455_v12 = vpack.c.bf16 %v423_v36, %v422_v30  ;;  %v416_v36 = vld [vmem:[%s4603_s23 + $0x1c0] sm:$0xff] }
 0x205   : > { %v452_v22 = vpack.c.bf16 %v417_v38, %v416_v36  ;;  %v415_v36 = vld [vmem:[%s4603_s23 + $0x1b8] sm:$0xff] }
 0x206   : > { %2363 = vmatpush.bf16.msrb.mxu3 %v455_v12  ;;  %v453_v12 = vpack.c.bf16 %v419_v35, %v418_v23  ;;  %v5250_v23 = vpop.f32.mrf.mxu1  ;;  %v4381_v35 = vld [vmem:[%s7241_s2 + $0x204] sm:$0xf] }
 0x207   : > { %v5242_v51 = vpop.f32.mrf.mxu3 }
 0x208   : > { %v5222_v58 = vpop.f32.mrf.mxu0  ;;  %7277 = vst [vmem:[#allocation37_spill] sm:$0xff] %v5242_v51 }
 0x209   : > { %7274 = vst [vmem:[#allocation34_spill] sm:$0xff] %v5222_v58 }
 0x20a   : > { %2364 = vmatpush.bf16.msrb.mxu3 %v454_v46  ;;  %v4259_v46 = vld [vmem:[%s7241_s2 + $0x4e8] sm:$0xf] }
 0x20b   : > { %v4260_v56 = vor.u32 %v4476_v48, %v4259_v46  ;;  %v412_v46 = vld [vmem:[%s4603_s23 + $0x1a0] sm:$0xff]  ;;  %v413_v48 = vld [vmem:[%s4603_s23 + $0x1a8] sm:$0xff] }
 0x20c   : > { %v450_v58 = vpack.c.bf16 %v413_v48, %v412_v46  ;;  %v408_v46 = vld [vmem:[%s4603_s23 + $0x180] sm:$0xff]  ;;  %v409_v48 = vld [vmem:[%s4603_s23 + $0x188] sm:$0xff] }
 0x20d   : > { %2357 = vmatmul.bf16.gmra.mxu3 %v4260_v56 }
 0x20e   : > { %2365 = vmatpush.bf16.msrb.mxu3 %v453_v12  ;;  %v3885_v12 = vld [vmem:[%s7241_s2 + $0x210] sm:$0xf0]  ;;  %v5272_v56 = vpop.f32.mrf.mxu1 }
 0x20f   : > { %v3888_v38 = vor.u32 %v4381_v35, %v3885_v12  ;;  %v4443_v35 = vld [vmem:[%s7241_s2 + $0x3ec] sm:$0xf0] }
 0x210   : > { %v5238_v30 = vpop.f32.mrf.mxu0  ;;  %v410_v12 = vld [vmem:[%s4603_s23 + $0x190] sm:$0xff] }
 0x211   : > { %7276 = vst [vmem:[#allocation36_spill] sm:$0xff] %v5238_v30  ;;  %2033 = vmatmul.bf16.gmra.mxu1 %v3888_v38  ;;  %v5264_v30 = vpop.f32.mrf.mxu3 }
 0x212   : > { %2366 = vmatpush.bf16.msrb.mxu3 %v452_v22  ;;  %7279 = vst [vmem:[#allocation39_spill] sm:$0xff] %v5264_v30 }
 0x213   : > { %1894 = vmatmul.bf16.gmra.mxu0 %v4108_v4  ;;  %v414_v4 = vld [vmem:[%s4603_s23 + $0x1b0] sm:$0xff] }
 0x214   : > { %v451_v51 = vpack.c.bf16 %v415_v36, %v414_v4  ;;  %v411_v4 = vld [vmem:[%s4603_s23 + $0x198] sm:$0xff]  ;;  %v4124_v36 = vor.u32 %v4443_v35, %v4123_v2  ;;  %v4385_v35 = vld [vmem:[%s7241_s2 + $0x224] sm:$0xf] }
 0x216   : > { %2367 = vmatpush.bf16.msrb.mxu3 %v451_v51  ;;  %v449_v51 = vpack.c.bf16 %v411_v4, %v410_v12  ;;  %v5288_v2 = vpop.f32.mrf.mxu1  ;;  %v3901_v4 = vld [vmem:[%s7241_s2 + $0x230] sm:$0xf0] }
 0x218   : > { %v5260_v22 = vpop.f32.mrf.mxu0 }
 0x219   : > { %7278 = vst [vmem:[#allocation38_spill] sm:$0xff] %v5260_v22  ;;  %v5280_v30 = vpop.f32.mrf.mxu3  ;;  %v448_v22 = vpack.c.bf16 %v409_v48, %v408_v46 }
 0x21a   : > { %2368 = vmatpush.bf16.msrb.mxu3 %v450_v58  ;;  %7281 = vst [vmem:[#allocation41_spill] sm:$0xff] %v5280_v30  ;;  %v3637_v58 = vld [vmem:[%s7241_s2 + $0x18] sm:$0xf0] }
 0x21b   : > { %v3640_v12 = vor.u32 %v4318_v45, %v3637_v58  ;;  %v4139_v45 = vld [vmem:[%s7241_s2 + $0x400] sm:$0xf] }
 0x21e   : > { %2369 = vmatpush.bf16.msrb.mxu3 %v449_v51  ;;  %v3904_v51 = vor.u32 %v4385_v35, %v3901_v4  ;;  %v5306_v48 = vpop.f32.mrf.mxu1  ;;  %v3653_v4 = vld [vmem:[%s7241_s2 + $0x38] sm:$0xf0] }
 0x21f   : > { %7284 = vst [vmem:[#allocation44_spill] sm:$0xff] %v5306_v48 }
 0x220   : > { %v5276_v38 = vpop.f32.mrf.mxu0 }
 0x221   : > { %7280 = vst [vmem:[#allocation40_spill] sm:$0xff] %v5276_v38  ;;  %2038 = vmatmul.bf16.gmra.mxu1 %v3904_v51  ;;  %v5298_v46 = vpop.f32.mrf.mxu3 }
 0x222   : > { %2370 = vmatpush.bf16.msrb.mxu3 %v448_v22  ;;  %7283 = vst [vmem:[#allocation43_spill] sm:$0xff] %v5298_v46  ;;  %v4447_v22 = vld [vmem:[%s7241_s2 + $0x40c] sm:$0xf0] }
 0x223   : > { %1899 = vmatmul.bf16.gmra.mxu0 %v4124_v36  ;;  %v4140_v58 = vor.u32 %v4447_v22, %v4139_v45  ;;  %v4389_v45 = vld [vmem:[%s7241_s2 + $0x244] sm:$0xf]  ;;  %v3917_v22 = vld [vmem:[%s7241_s2 + $0x250] sm:$0xf0] }
 0x225   : > { %2371 = vmatmul.bf16.vlgmr.msrb.gmra.mxu3 %v3640_v12  ;;  %v4322_v12 = vld [vmem:[%s7241_s2 + $0x2c] sm:$0xf] }
 0x226   : > { %v3656_v51 = vor.u32 %v4322_v12, %v3653_v4  ;;  %v5318_v46 = vpop.f32.mrf.mxu1  ;;  %v4155_v12 = vld [vmem:[%s7241_s2 + $0x420] sm:$0xf]  ;;  %v4451_v4 = vld [vmem:[%s7241_s2 + $0x42c] sm:$0xf0] }
 0x228   : > { %v5296_v36 = vpop.f32.mrf.mxu0 }
 0x229   : > { %7282 = vst [vmem:[#allocation42_spill] sm:$0xff] %v5296_v36  ;;  %v5310_v35 = vpop.f32.mrf.mxu3 }
 0x22a   : > { %7286 = vst [vmem:[#allocation46_spill] sm:$0xff] %v5310_v35 }
 0x22e   : > { %v5336_v36 = vpop.f32.mrf.mxu1 }
 0x230   : > { %v5308_v30 = vpop.f32.mrf.mxu0 }
 0x231   : > { %7285 = vst [vmem:[#allocation45_spill] sm:$0xff] %v5308_v30  ;;  %v5328_v38 = vpop.f32.mrf.mxu3  ;;  %v4156_v30 = vor.u32 %v4451_v4, %v4155_v12  ;;  %v4393_v12 = vld [vmem:[%s7241_s2 + $0x264] sm:$0xf]  ;;  %v3933_v4 = vld [vmem:[%s7241_s2 + $0x270] sm:$0xf0] }
 0x232   : > { %7288 = vst [vmem:[#allocation48_spill] sm:$0xff] %v5328_v38 }
 0x233   : > { %1904 = vmatmul.bf16.gmra.mxu0 %v4140_v58  ;;  %v3920_v58 = vor.u32 %v4389_v45, %v3917_v22  ;;  %v3669_v22 = vld [vmem:[%s7241_s2 + $0x58] sm:$0xf0] }
 0x235   : > { %2376 = vmatmul.bf16.gmra.mxu3 %v3656_v51  ;;  %2043 = vmatmul.bf16.gmra.mxu1 %v3920_v58  ;;  %v4326_v51 = vld [vmem:[%s7241_s2 + $0x4c] sm:$0xf] }
 0x236   : > { %v3672_v58 = vor.u32 %v4326_v51, %v3669_v22  ;;  %v5348_v38 = vpop.f32.mrf.mxu1  ;;  %v3635_v51 = vld [vmem:[%s7241_s2 + $0x8] sm:$0xf]  ;;  %v4320_v22 = vld [vmem:[%s7241_s2 + $0x14] sm:$0xf0] }
 0x237   : > { %7291 = vst [vmem:[#allocation51_spill] sm:$0xff] %v5348_v38  ;;  %v3636_v10 = vor.u32 %v4320_v22, %v3635_v51  ;;  %v4397_v51 = vld [vmem:[%s7241_s2 + $0x284] sm:$0xf]  ;;  %v3949_v22 = vld [vmem:[%s7241_s2 + $0x290] sm:$0xf0] }
 0x238   : > { %v5326_v35 = vpop.f32.mrf.mxu0 }
 0x239   : > { %7287 = vst [vmem:[#allocation47_spill] sm:$0xff] %v5326_v35  ;;  %v5340_v45 = vpop.f32.mrf.mxu3 }
 0x23a   : > { %7290 = vst [vmem:[#allocation50_spill] sm:$0xff] %v5340_v45 }
 0x240   : > { %v5338_v27 = vpop.f32.mrf.mxu0 }
 0x241   : > { %7289 = vst [vmem:[#allocation49_spill] sm:$0xff] %v5338_v27  ;;  %v5358_v35 = vpop.f32.mrf.mxu3  ;;  %v5366_v27 = vpop.f32.mrf.mxu1 }
 0x242   : > { %7293 = vst [vmem:[#allocation53_spill] sm:$0xff] %v5358_v35 }
 0x243   : > { %1909 = vmatmul.bf16.gmra.mxu0 %v4156_v30  ;;  %v3936_v30 = vor.u32 %v4393_v12, %v3933_v4  ;;  %v3685_v4 = vld [vmem:[%s7241_s2 + $0x78] sm:$0xf0] }
 0x245   : > { %2381 = vmatmul.bf16.gmra.mxu3 %v3672_v58  ;;  %2048 = vmatmul.bf16.gmra.mxu1 %v3936_v30  ;;  %v4330_v58 = vld [vmem:[%s7241_s2 + $0x6c] sm:$0xf] }
 0x246   : > { %v3688_v30 = vor.u32 %v4330_v58, %v3685_v4  ;;  %v3651_v58 = vld [vmem:[%s7241_s2 + $0x28] sm:$0xf]  ;;  %v4324_v4 = vld [vmem:[%s7241_s2 + $0x34] sm:$0xf0] }
 0x247   : > { %v3652_v59 = vor.u32 %v4324_v4, %v3651_v58  ;;  %v4401_v58 = vld [vmem:[%s7241_s2 + $0x2a4] sm:$0xf]  ;;  %v3965_v4 = vld [vmem:[%s7241_s2 + $0x2b0] sm:$0xf0] }
 0x248   : > { %v5356_v45 = vpop.f32.mrf.mxu0 }
 0x249   : > { %7292 = vst [vmem:[#allocation52_spill] sm:$0xff] %v5356_v45  ;;  %v5370_v12 = vpop.f32.mrf.mxu3  ;;  %v5378_v35 = vpop.f32.mrf.mxu1 }
 0x24a   : > { %7295 = vst [vmem:[#allocation55_spill] sm:$0xff] %v5370_v12 }
 0x250   : > { %v5368_v8 = vpop.f32.mrf.mxu0 }
 0x251   : > { %7294 = vst [vmem:[#allocation54_spill] sm:$0xff] %v5368_v8  ;;  %v5388_v8 = vpop.f32.mrf.mxu3  ;;  %v5396_v45 = vpop.f32.mrf.mxu1 }
 0x252   : > { %7297 = vst [vmem:[#allocation57_spill] sm:$0xff] %v5388_v8 }
 0x253   : > { %2162 = vmatmul.bf16.vlgmr.msrb.gmra.mxu0 %v3636_v10  ;;  %v3952_v10 = vor.u32 %v4397_v51, %v3949_v22  ;;  %7298 = vst [vmem:[#allocation58_spill] sm:$0xff] %v5396_v45  ;;  %v3701_v22 = vld [vmem:[%s7241_s2 + $0x98] sm:$0xf0] }
 0x255   : > { %2386 = vmatmul.bf16.gmra.mxu3 %v3688_v30  ;;  %2053 = vmatmul.bf16.gmra.mxu1 %v3952_v10  ;;  %v4334_v30 = vld [vmem:[%s7241_s2 + $0x8c] sm:$0xf] }
 0x256   : > { %v3704_v10 = vor.u32 %v4334_v30, %v3701_v22  ;;  %v3667_v30 = vld [vmem:[%s7241_s2 + $0x48] sm:$0xf]  ;;  %v4328_v22 = vld [vmem:[%s7241_s2 + $0x54] sm:$0xf0] }
 0x257   : > { %v3668_v45 = vor.u32 %v4328_v22, %v3667_v30  ;;  %v4405_v30 = vld [vmem:[%s7241_s2 + $0x2c4] sm:$0xf]  ;;  %v3981_v22 = vld [vmem:[%s7241_s2 + $0x2d0] sm:$0xf0] }
 0x258   : > { %v5386_v12 = vpop.f32.mrf.mxu0 }
 0x259   : > { %7296 = vst [vmem:[#allocation56_spill] sm:$0xff] %v5386_v12  ;;  %v5400_v51 = vpop.f32.mrf.mxu3  ;;  %v5408_v8 = vpop.f32.mrf.mxu1 }
 0x25a   : > { %7300 = vst [vmem:[#allocation60_spill] sm:$0xff] %v5400_v51 }
 0x25b   : > { %7301 = vst [vmem:[#allocation61_spill] sm:$0xff] %v5408_v8 }
 0x260   : > { %v5398_v60 = vpop.f32.mrf.mxu0 }
 0x261   : > { %7299 = vst [vmem:[#allocation59_spill] sm:$0xff] %v5398_v60  ;;  %v5418_v12 = vpop.f32.mrf.mxu3  ;;  %v5426_v60 = vpop.f32.mrf.mxu1 }
 0x262   : > { %7303 = vst [vmem:[#allocation63_spill] sm:$0xff] %v5418_v12 }
 0x263   : > { %2167 = vmatmul.bf16.gmra.mxu0 %v3652_v59  ;;  %v3968_v59 = vor.u32 %v4401_v58, %v3965_v4  ;;  %v3717_v4 = vld [vmem:[%s7241_s2 + $0xb8] sm:$0xf0] }
 0x265   : > { %2391 = vmatmul.bf16.gmra.mxu3 %v3704_v10  ;;  %2058 = vmatmul.bf16.gmra.mxu1 %v3968_v59  ;;  %v4338_v10 = vld [vmem:[%s7241_s2 + $0xac] sm:$0xf] }
 0x266   : > { %v3720_v59 = vor.u32 %v4338_v10, %v3717_v4  ;;  %v3683_v10 = vld [vmem:[%s7241_s2 + $0x68] sm:$0xf]  ;;  %v4332_v4 = vld [vmem:[%s7241_s2 + $0x74] sm:$0xf0] }
 0x268   : > { %v5416_v51 = vpop.f32.mrf.mxu0 }
 0x269   : > { %7302 = vst [vmem:[#allocation62_spill] sm:$0xff] %v5416_v51  ;;  %v5430_v58 = vpop.f32.mrf.mxu3  ;;  %v5438_v12 = vpop.f32.mrf.mxu1 }
 0x26a   : > { %7305 = vst [vmem:[#allocation65_spill] sm:$0xff] %v5430_v58 }
 0x26b   : > { %7306 = vst [vmem:[#allocation66_spill] sm:$0xff] %v5438_v12  ;;  %v3684_v12 = vor.u32 %v4332_v4, %v3683_v10  ;;  %v4409_v10 = vld [vmem:[%s7241_s2 + $0x2e4] sm:$0xf]  ;;  %v3997_v4 = vld [vmem:[%s7241_s2 + $0x2f0] sm:$0xf0] }
 0x270   : > { %v5428_v11 = vpop.f32.mrf.mxu0 }
 0x271   : > { %7304 = vst [vmem:[#allocation64_spill] sm:$0xff] %v5428_v11  ;;  %v5448_v51 = vpop.f32.mrf.mxu3  ;;  %v5456_v11 = vpop.f32.mrf.mxu1 }
 0x272   : > { %7308 = vst [vmem:[#allocation68_spill] sm:$0xff] %v5448_v51 }
 0x273   : > { %2172 = vmatmul.bf16.gmra.mxu0 %v3668_v45  ;;  %v3984_v45 = vor.u32 %v4405_v30, %v3981_v22  ;;  %7309 = vst [vmem:[#allocation69_spill] sm:$0xff] %v5456_v11  ;;  %v3733_v22 = vld [vmem:[%s7241_s2 + $0xd8] sm:$0xf0] }
 0x275   : > { %2396 = vmatmul.bf16.gmra.mxu3 %v3720_v59  ;;  %2063 = vmatmul.bf16.gmra.mxu1 %v3984_v45  ;;  %v4342_v59 = vld [vmem:[%s7241_s2 + $0xcc] sm:$0xf] }
 0x276   : > { %v3736_v45 = vor.u32 %v4342_v59, %v3733_v22  ;;  %v4336_v59 = vld [vmem:[%s7241_s2 + $0x94] sm:$0xf0] }
 0x278   : > { %v5446_v58 = vpop.f32.mrf.mxu0 }
 0x279   : > { %7307 = vst [vmem:[#allocation67_spill] sm:$0xff] %v5446_v58  ;;  %v5460_v30 = vpop.f32.mrf.mxu3  ;;  %v5468_v51 = vpop.f32.mrf.mxu1 }
 0x27a   : > { %7311 = vst [vmem:[#allocation71_spill] sm:$0xff] %v5460_v30 }
 0x27b   : > { %7312 = vst [vmem:[#allocation72_spill] sm:$0xff] %v5468_v51 }
 0x280   : > { %v5458_v14 = vpop.f32.mrf.mxu0 }
 0x281   : > { %7310 = vst [vmem:[#allocation70_spill] sm:$0xff] %v5458_v14  ;;  %v3699_v14 = vld [vmem:[%s7241_s2 + $0x88] sm:$0xf]  ;;  %v5484_v22 = vpop.f32.mrf.mxu3  ;;  %v5486_v58 = vpop.f32.mrf.mxu1 }
 0x282   : > { %7314 = vst [vmem:[#allocation74_spill] sm:$0xff] %v5484_v22  ;;  %v3700_v11 = vor.u32 %v4336_v59, %v3699_v14  ;;  %v4413_v22 = vld [vmem:[%s7241_s2 + $0x304] sm:$0xf]  ;;  %v4013_v14 = vld [vmem:[%s7241_s2 + $0x310] sm:$0xf0] }
 0x283   : > { %2177 = vmatmul.bf16.gmra.mxu0 %v3684_v12  ;;  %v4000_v12 = vor.u32 %v4409_v10, %v3997_v4  ;;  %7315 = vst [vmem:[#allocation75_spill] sm:$0xff] %v5486_v58  ;;  %v3749_v10 = vld [vmem:[%s7241_s2 + $0xf8] sm:$0xf0] }
 0x285   : > { %2401 = vmatmul.bf16.gmra.mxu3 %v3736_v45  ;;  %2068 = vmatmul.bf16.gmra.mxu1 %v4000_v12  ;;  %v4346_v45 = vld [vmem:[%s7241_s2 + $0xec] sm:$0xf] }
 0x286   : > { %v3752_v4 = vor.u32 %v4346_v45, %v3749_v10  ;;  %v3715_v45 = vld [vmem:[%s7241_s2 + $0xa8] sm:$0xf]  ;;  %v4340_v10 = vld [vmem:[%s7241_s2 + $0xb4] sm:$0xf0] }
 0x287   : > { %v3716_v58 = vor.u32 %v4340_v10, %v3715_v45  ;;  %v4344_v10 = vld [vmem:[%s7241_s2 + $0xd4] sm:$0xf0] }
 0x288   : > { %v5476_v30 = vpop.f32.mrf.mxu0 }
 0x289   : > { %7313 = vst [vmem:[#allocation73_spill] sm:$0xff] %v5476_v30  ;;  %v5504_v59 = vpop.f32.mrf.mxu3 }
 0x28a   : > { %7318 = vst [vmem:[#allocation78_spill] sm:$0xff] %v5504_v59 }
 0x28e   : > { %v5496_v12 = vpop.f32.mrf.mxu1 }
 0x28f   : > { %7317 = vst [vmem:[#allocation77_spill] sm:$0xff] %v5496_v12 }
 0x290   : > { %v5488_v50 = vpop.f32.mrf.mxu0 }
 0x291   : > { %7316 = vst [vmem:[#allocation76_spill] sm:$0xff] %v5488_v50 }
 0x293   : > { %2182 = vmatmul.bf16.gmra.mxu0 %v3700_v11  ;;  %v4016_v11 = vor.u32 %v4413_v22, %v4013_v14  ;;  %v5518_v22 = vpop.f32.mrf.mxu3  ;;  %v4417_v14 = vld [vmem:[%s7241_s2 + $0x324] sm:$0xf] }
 0x294   : > { %7322 = vst [vmem:[#allocation82_spill] sm:$0xff] %v5518_v22 }
 0x295   : > { %2406 = vmatmul.bf16.gmra.mxu3 %v3752_v4  ;;  %2073 = vmatmul.bf16.gmra.mxu1 %v4016_v11  ;;  %v4029_v11 = vld [vmem:[%s7241_s2 + $0x330] sm:$0xf0] }
 0x296   : > { %v5514_v50 = vpop.f32.mrf.mxu1  ;;  %v4032_v59 = vor.u32 %v4417_v14, %v4029_v11  ;;  %v4421_v11 = vld [vmem:[%s7241_s2 + $0x344] sm:$0xf] }
 0x297   : > { %7320 = vst [vmem:[#allocation80_spill] sm:$0xff] %v5514_v50 }
 0x298   : > { %v5506_v30 = vpop.f32.mrf.mxu0 }
 0x299   : > { %7319 = vst [vmem:[#allocation79_spill] sm:$0xff] %v5506_v30 }
 0x29b   : > { %v5530_v45 = vpop.f32.mrf.mxu3 }
 0x29c   : > { %7325 = vst [vmem:[#allocation85_spill] sm:$0xff] %v5530_v45  ;;  %v4045_v45 = vld [vmem:[%s7241_s2 + $0x350] sm:$0xf0] }
 0x29e   : > { %v5520_v4 = vpop.f32.mrf.mxu1 }
 0x29f   : > { %7323 = vst [vmem:[#allocation83_spill] sm:$0xff] %v5520_v4 }
 0x2a0   : > { %v5516_v12 = vpop.f32.mrf.mxu0 }
 0x2a1   : > { %7321 = vst [vmem:[#allocation81_spill] sm:$0xff] %v5516_v12 }
 0x2a3   : > { %2187 = vmatmul.bf16.gmra.mxu0 %v3716_v58  ;;  %v3731_v58 = vld [vmem:[%s7241_s2 + $0xc8] sm:$0xf] }
 0x2a4   : > { %v3732_v12 = vor.u32 %v4344_v10, %v3731_v58  ;;  %v3747_v58 = vld [vmem:[%s7241_s2 + $0xe8] sm:$0xf] }
 0x2a5   : > { %2078 = vmatmul.bf16.gmra.mxu1 %v4032_v59 }
 0x2a6   : > { %v5538_v22 = vpop.f32.mrf.mxu1 }
 0x2a7   : > { %7326 = vst [vmem:[#allocation86_spill] sm:$0xff] %v5538_v22 }
 0x2a8   : > { %v5528_v30 = vpop.f32.mrf.mxu0  ;;  %v2372_v14 = vpop.f32.mrf.mxu3 }
 0x2a9   : > { %7324 = vst [vmem:[#allocation84_spill] sm:$0xff] %v5528_v30  ;;  %v4048_v30 = vor.u32 %v4421_v11, %v4045_v45  ;;  %v4061_v45 = vld [vmem:[%s7241_s2 + $0x370] sm:$0xf0] }
 0x2b0   : > { %v5540_v4 = vpop.f32.mrf.mxu0 }
 0x2b1   : > { %7327 = vst [vmem:[#allocation87_spill] sm:$0xff] %v5540_v4  ;;  %v2374_v4 = vpop.f32.mrf.mxu3 }
 0x2b2   : > { %v5542_v59 = vpop.f32.mrf.mxu1 }
 0x2b3   : > { %2192 = vmatmul.bf16.gmra.mxu0 %v3732_v12  ;;  %7328 = vst [vmem:[#allocation88_spill] sm:$0xff] %v5542_v59  ;;  %v4348_v12 = vld [vmem:[%s7241_s2 + $0xf4] sm:$0xf0] }
 0x2b4   : > { %v3748_v22 = vor.u32 %v4348_v12, %v3747_v58  ;;  %v4352_v58 = vld [vmem:[%s7241_s2 + $0x114] sm:$0xf0] }
 0x2b5   : > { %2083 = vmatmul.bf16.gmra.mxu1 %v4048_v30  ;;  %v4425_v30 = vld [vmem:[%s7241_s2 + $0x364] sm:$0xf] }
 0x2b6   : > { %v4064_v11 = vor.u32 %v4425_v30, %v4061_v45 }
 0x2b8   : > { %v5550_v38 = vpop.f32.mrf.mxu0 }
 0x2b9   : > { %7329 = vst [vmem:[#allocation89_spill] sm:$0xff] %v5550_v38 }
 0x2ba   : > { %v5558_v10 = vpop.f32.mrf.mxu1 }
 0x2bb   : > { %7330 = vst [vmem:[#allocation90_spill] sm:$0xff] %v5558_v10  ;;  %v2377_v10 = vpop.f32.mrf.mxu3 }
 0x2c0   : > { %v5560_v59 = vpop.f32.mrf.mxu0 }
 0x2c1   : > { %7331 = vst [vmem:[#allocation91_spill] sm:$0xff] %v5560_v59 }
 0x2c2   : > { %v5562_v50 = vpop.f32.mrf.mxu1 }
 0x2c3   : > { %2197 = vmatmul.bf16.gmra.mxu0 %v3748_v22  ;;  %7332 = vst [vmem:[#allocation92_spill] sm:$0xff] %v5562_v50  ;;  %v3763_v22 = vld [vmem:[%s7241_s2 + $0x108] sm:$0xf]  ;;  %v2379_v30 = vpop.f32.mrf.mxu3 }
 0x2c4   : > { %v3764_v12 = vor.u32 %v4352_v58, %v3763_v22  ;;  %v1748_v22 = vadd.f32 %v4794_v57, %v4992_v26  ;;  %v4356_v57 = vld [vmem:[%s7241_s2 + $0x134] sm:$0xf0] }
 0x2c5   : > { %2088 = vmatmul.bf16.gmra.mxu1 %v4064_v11 }
 0x2c8   : > { %v5570_v38 = vpop.f32.mrf.mxu0 }
 0x2c9   : > { %7333 = vst [vmem:[#allocation93_spill] sm:$0xff] %v5570_v38  ;;  %v4429_v38 = vld [vmem:[%s7241_s2 + $0x384] sm:$0xf] }
 0x2ca   : > { %v5572_v18 = vpop.f32.mrf.mxu1 }
 0x2cb   : > { %7334 = vst [vmem:[#allocation94_spill] sm:$0xff] %v5572_v18  ;;  %v4077_v18 = vld [vmem:[%s7241_s2 + $0x390] sm:$0xf0] }
 0x2d0   : > { %v2163_v59 = vpop.f32.mrf.mxu0 }
 0x2d1   : > { %v2164_v50 = vadd.f32 %v2163_v59, %v4907_v61  ;;  %v4080_v61 = vor.u32 %v4429_v38, %v4077_v18  ;;  %v1957_v59 = vadd.f32 %v4913_v0, %v1748_v22  ;;  %v3780_v18 = vor.u32 %v4356_v57, %v3779_v52  ;;  %v4093_v22 = vld [vmem:[%s7241_s2 + $0x3b0] sm:$0xf0]  ;;  %v3795_v57 = vld [vmem:[%s7241_s2 + $0x148] sm:$0xf] }
 0x2d2   : > { %v5581_v11 = vpop.f32.mrf.mxu1 }
 0x2d3   : > { %v2373_v45 = vadd.f32 %v2372_v14, %v2164_v50  ;;  %2202 = vmatmul.bf16.gmra.mxu0 %v3764_v12  ;;  %7335 = vst [vmem:[#allocation95_spill] sm:$0xff] %v5581_v11  ;;  %v2382_v12 = vpop.f32.mrf.mxu3 }
 0x2d5   : > { %2573 = vst.msk [vmem:[#allocation2] sm:$0xff] %vm2572_vm0, %v2373_v45  ;;  %2093 = vmatmul.bf16.gmra.mxu1 %v4080_v61  ;;  %v4433_v45 = vld [vmem:[%s7241_s2 + $0x3a4] sm:$0xf]  ;;  %v1753_v61 = vadd.f32 %v4814_v3, %v4909_v62  ;;  %v4360_v3 = vld [vmem:[%s7241_s2 + $0x154] sm:$0xf0] }
 0x2d6   : > { %v4096_v52 = vor.u32 %v4433_v45, %v4093_v22  ;;  %v3796_v62 = vor.u32 %v4360_v3, %v3795_v57  ;;  %v4109_v45 = vld [vmem:[%s7241_s2 + $0x3d0] sm:$0xf0]  ;;  %v1758_v22 = vadd.f32 %v4834_v13, %v4977_v7  ;;  %v4364_v13 = vld [vmem:[%s7241_s2 + $0x174] sm:$0xf0] }
 0x2d8   : > { %v2165_v50 = vpop.f32.mrf.mxu0 }
 0x2d9   : > { %v2166_v14 = vadd.f32 %v2165_v50, %v1957_v59 }
 0x2da   : > { %v5593_v11 = vpop.f32.mrf.mxu1 }
 0x2db   : > { %v2375_v58 = vadd.f32 %v2374_v4, %v2166_v14  ;;  %7336 = vst [vmem:[#allocation96_spill] sm:$0xff] %v5593_v11  ;;  %v2384_v59 = vpop.f32.mrf.mxu3 }
 0x2dd   : > { %2574 = vst.msk [vmem:[#allocation2 + $0x8] sm:$0xff] %vm2572_vm0, %v2375_v58 }
 0x2e0   : > { %v2168_v26 = vpop.f32.mrf.mxu0 }
 0x2e1   : > { %v2169_v0 = vadd.f32 %v2168_v26, %v4924_v16  ;;  %v1962_v16 = vadd.f32 %v4926_v19, %v1753_v61 }
 0x2e2   : > { %v5603_v4 = vpop.f32.mrf.mxu1 }
 0x2e3   : > { %v2378_v38 = vadd.f32 %v2377_v10, %v2169_v0  ;;  %2207 = vmatmul.bf16.gmra.mxu0 %v3780_v18  ;;  %7337 = vst [vmem:[#allocation97_spill] sm:$0xff] %v5603_v4  ;;  %v2387_v26 = vpop.f32.mrf.mxu3  ;;  %v4418_v4 = vld [vmem:[%s7241_s2 + $0x32c] sm:$0xf] }
 0x2e5   : > { %2575 = vst.msk [vmem:[#allocation2 + $0x10] sm:$0xff] %vm2572_vm0, %v2378_v38  ;;  %2098 = vmatmul.bf16.gmra.mxu1 %v4096_v52  ;;  %v4437_v38 = vld [vmem:[%s7241_s2 + $0x3c4] sm:$0xf] }
 0x2e6   : > { %v4112_v61 = vor.u32 %v4437_v38, %v4109_v45  ;;  %v1972_v38 = vadd.f32 %v4960_v49, %v4856_v28  ;;  %v4445_v28 = vld [vmem:[%s7241_s2 + $0x404] sm:$0xf] }
 0x2e8   : > { %v2170_v10 = vpop.f32.mrf.mxu0 }
 0x2e9   : > { %v2171_v50 = vadd.f32 %v2170_v10, %v1962_v16 }
 0x2ea   : > { %v5615_v58 = vpop.f32.mrf.mxu1 }
 0x2eb   : > { %v2380_v14 = vadd.f32 %v2379_v30, %v2171_v50  ;;  %7338 = vst [vmem:[#allocation98_spill] sm:$0xff] %v5615_v58  ;;  %v2389_v16 = vpop.f32.mrf.mxu3 }
 0x2ed   : > { %2576 = vst.msk [vmem:[#allocation2 + $0x18] sm:$0xff] %vm2572_vm0, %v2380_v14  ;;  %v3811_v14 = vld [vmem:[%s7241_s2 + $0x168] sm:$0xf] }
 0x2ee   : > { %v3812_v7 = vor.u32 %v4364_v13, %v3811_v14 }
 0x2f0   : > { %v2173_v18 = vpop.f32.mrf.mxu0 }
 0x2f1   : > { %v2174_v19 = vadd.f32 %v2173_v18, %v4939_v31  ;;  %v1967_v31 = vadd.f32 %v4943_v33, %v1758_v22  ;;  %v4441_v18 = vld [vmem:[%s7241_s2 + $0x3e4] sm:$0xf] }
 0x2f2   : > { %v5625_v30 = vpop.f32.mrf.mxu1 }
 0x2f3   : > { %v2383_v0 = vadd.f32 %v2382_v12, %v2174_v19  ;;  %2212 = vmatmul.bf16.gmra.mxu0 %v3796_v62  ;;  %7339 = vst [vmem:[#allocation99_spill] sm:$0xff] %v5625_v30  ;;  %v2392_v3 = vpop.f32.mrf.mxu3  ;;  %v4125_v19 = vld [vmem:[%s7241_s2 + $0x3f0] sm:$0xf0] }
 0x2f5   : > { %2577 = vst.msk [vmem:[#allocation2 + $0x20] sm:$0xff] %vm2572_vm0, %v2383_v0  ;;  %2103 = vmatmul.bf16.gmra.mxu1 %v4112_v61  ;;  %v4128_v0 = vor.u32 %v4441_v18, %v4125_v19 }
 0x2f8   : > { %v2175_v12 = vpop.f32.mrf.mxu0 }
 0x2f9   : > { %v2176_v52 = vadd.f32 %v2175_v12, %v1967_v31 }
 0x2fa   : > { %v5637_v50 = vpop.f32.mrf.mxu1 }
 0x2fb   : > { %v2385_v10 = vadd.f32 %v2384_v59, %v2176_v52  ;;  %7340 = vst [vmem:[#allocation100_spill] sm:$0xff] %v5637_v50  ;;  %v2394_v22 = vpop.f32.mrf.mxu3  ;;  %v584_v52 = vpop.permute.xlu0 %583  ;;  %v3907_v50 = vld [vmem:[%s7241_s2 + $0x228] sm:$0xf] }
 0x2fc   : > { %v1768_v49 = vadd.f32 %v4874_v37, %v584_v52 }
 0x2fd   : > { %2578 = vst.msk [vmem:[#allocation2 + $0x28] sm:$0xff] %vm2572_vm0, %v2385_v10 }
 0x300   : > { %v2178_v57 = vpop.f32.mrf.mxu0 }
 0x301   : > { %v2179_v33 = vadd.f32 %v2178_v57, %v4954_v42  ;;  %v4141_v57 = vld [vmem:[%s7241_s2 + $0x410] sm:$0xf0] }
 0x302   : > { %v5647_v59 = vpop.f32.mrf.mxu1 }
 0x303   : > { %v2388_v62 = vadd.f32 %v2387_v26, %v2179_v33  ;;  %2217 = vmatmul.bf16.gmra.mxu0 %v3812_v7  ;;  %7341 = vst [vmem:[#allocation101_spill] sm:$0xff] %v5647_v59  ;;  %v4144_v33 = vor.u32 %v4445_v28, %v4141_v57  ;;  %v4157_v57 = vld [vmem:[%s7241_s2 + $0x430] sm:$0xf0] }
 0x304   : > { %v2658_v19 = vld [vmem:[#allocation2 + $0x28] sm:$0xff] }
 0x305   : > { %2579 = vst.msk [vmem:[#allocation2 + $0x30] sm:$0xff] %vm2572_vm0, %v2388_v62  ;;  %2108 = vmatmul.bf16.gmra.mxu1 %v4128_v0 }
 0x308   : > { %v2180_v42 = vpop.f32.mrf.mxu0 }
 0x309   : > { %v2181_v26 = vadd.f32 %v2180_v42, %v1972_v38  ;;  %v2657_v38 = vld [vmem:[#allocation2 + $0x20] sm:$0xff] }
 0x30a   : > { %v5658_v61 = vpop.f32.mrf.mxu1  ;;  %v2663_v42 = vpack.c.bf16 %v2658_v19, %v2657_v38  ;;  %v2654_v19 = vld [vmem:[#allocation2 + $0x8] sm:$0xff] }
 0x30b   : > { %v2390_v45 = vadd.f32 %v2389_v16, %v2181_v26  ;;  %7342 = vst [vmem:[#allocation102_spill] sm:$0xff] %v5658_v61 }
 0x30c   : > { %v2659_v14 = vld [vmem:[#allocation2 + $0x30] sm:$0xff] }
 0x30d   : > { %2580 = vst.msk [vmem:[#allocation2 + $0x38] sm:$0xff] %vm2572_vm0, %v2390_v45  ;;  %v2735_v45 = vsel %vm2572_vm0, %v2663_v42, 0 }
 0x310   : > { %v2183_v31 = vpop.f32.mrf.mxu0 }
 0x311   : > { %v2184_v12 = vadd.f32 %v2183_v31, %v4971_v5  ;;  %v2397_v5 = vpop.f32.mrf.mxu3 }
 0x312   : > { %v5662_v7 = vpop.f32.mrf.mxu1 }
 0x313   : > { %v2393_v10 = vadd.f32 %v2392_v3, %v2184_v12  ;;  %7343 = vst [vmem:[#allocation103_spill] sm:$0xff] %v5662_v7  ;;  %v1977_v3 = vadd.f32 %v4975_v6, %v1768_v49  ;;  %v2656_v6 = vld [vmem:[#allocation2 + $0x18] sm:$0xff] }
 0x314   : > { %v2660_v13 = vld [vmem:[#allocation2 + $0x38] sm:$0xff] }
 0x315   : > { %2581 = vst.msk [vmem:[#allocation2 + $0x40] sm:$0xff] %vm2572_vm0, %v2393_v10  ;;  %v2664_v16 = vpack.c.bf16 %v2660_v13, %v2659_v14  ;;  %2113 = vmatmul.bf16.gmra.mxu1 %v4144_v33  ;;  %v2677_v10 = vlaneseq  ;;  %v594_v14 = vpop.permute.xlu1 %593  ;;  %v2655_v13 = vld [vmem:[#allocation2 + $0x10] sm:$0xff] }
 0x316   : > { %v2662_v49 = vpack.c.bf16 %v2656_v6, %v2655_v13  ;;  %v1773_v33 = vadd.f32 %v4894_v47, %v594_v14  ;;  %v2653_v47 = vld [vmem:[#allocation2] sm:$0xff]  ;;  %v4555_v14 = vmov 0.0  }
 0x317   : > { %v2738_v62 = vsel %vm2572_vm0, %v2664_v16, 0 }
 0x318   : > { %v2185_v18 = vpop.f32.mrf.mxu0  ;;  %2744 = vmatpush.bf16.xpose.msra.mxu0 %v2738_v62  ;;  %v2732_v62 = vsel %vm2572_vm0, %v2662_v49, 0 }
 0x319   : > { %v2186_v0 = vadd.f32 %v2185_v18, %v1977_v3  ;;  %v2399_v12 = vpop.f32.mrf.mxu3 }
 0x31a   : > { %v5674_v26 = vpop.f32.mrf.mxu1 }
 0x31b   : > { %v2395_v37 = vadd.f32 %v2394_v22, %v2186_v0  ;;  %7344 = vst [vmem:[#allocation104_spill] sm:$0xff] %v5674_v26  ;;  %v4449_v22 = vld [vmem:[%s7241_s2 + $0x424] sm:$0xf] }
 0x31c   : > { %v4160_v3 = vor.u32 %v4449_v22, %v4157_v57 }
 0x31d   : > { %2582 = vst.msk [vmem:[#allocation2 + $0x48] sm:$0xff] %vm2572_vm0, %v2395_v37  ;;  %v5694_v37 = vand.u32 127, %v2677_v10 }
 0x320   : > { %v2188_v31 = vpop.f32.mrf.mxu0  ;;  %2745 = vmatpush.bf16.xpose.msra.mxu0 %v2735_v45 }
 0x321   : > { %v2189_v52 = vadd.f32 %v2188_v31, %v4988_v1  ;;  %v5689_v1 = vshrl.u32 %v2677_v10, 7  ;;  %v2402_v42 = vpop.f32.mrf.mxu3  ;;  %v2661_v31 = vpack.c.bf16 %v2654_v19, %v2653_v47 }
 0x322   : > { %v5679_v16 = vpop.f32.mrf.mxu1 }
 0x323   : > { %v2398_v28 = vadd.f32 %v2397_v5, %v2189_v52  ;;  %7345 = vst [vmem:[#allocation105_spill] sm:$0xff] %v5679_v16  ;;  %v1982_v5 = vadd.f32 %v4996_v39, %v1773_v33  ;;  %v2679_v38 = vadd.s32 8, %v5689_v1  ;;  %vm2688_vm1 = vcmp.eq.s32.totalorder %v5689_v1, %v5694_v37  ;;  %v4453_v33 = vld [vmem:[%s7241_s2 + $0x444] sm:$0xf]  ;;  %v3875_v16 = vld [vmem:[%s7241_s2 + $0x1e8] sm:$0xf] }
 0x324   : > { %v2729_v39 = vsel %vm2572_vm0, %v2661_v31, 0  ;;  %v4265_v10 = vsel %vm2688_vm1, 1.0, %v4555_v14 }
 0x325   : > { %2583 = vst.msk [vmem:[#allocation2 + $0x50] sm:$0xff] %vm2572_vm0, %v2398_v28  ;;  %2118 = vmatmul.bf16.gmra.mxu1 %v4160_v3  ;;  %vm2689_vm2 = vcmp.eq.s32.totalorder %v2679_v38, %v5694_v37  ;;  %v4173_v3 = vld [vmem:[%s7241_s2 + $0x450] sm:$0xf0]  ;;  %v2681_v38 = vadd.s32 24, %v5689_v1 }
 0x326   : > { %v4266_v13 = vsel %vm2689_vm2, 1.0, %v4555_v14 }
 0x327   : > { %v2712_v49 = vpack.c.bf16 %v4266_v13, %v4265_v10  ;;  %vm2691_vm4 = vcmp.eq.s32.totalorder %v2681_v38, %v5694_v37  ;;  %v4457_v13 = vld [vmem:[%s7241_s2 + $0x464] sm:$0xf] }
 0x328   : > { %v2190_v18 = vpop.f32.mrf.mxu0  ;;  %2746 = vmatpush.bf16.xpose.msra.mxu0 %v2732_v62  ;;  %v4176_v62 = vor.u32 %v4453_v33, %v4173_v3  ;;  %v2682_v3 = vadd.s32 32, %v5689_v1 }
 0x329   : > { %v2191_v0 = vadd.f32 %v2190_v18, %v1982_v5  ;;  %v2404_v22 = vpop.f32.mrf.mxu3  ;;  %v1778_v5 = vadd.f32 %v4911_v63, %v4956_v43 }
 0x32a   : > { %v5696_v6 = vpop.f32.mrf.mxu1  ;;  %vm2692_vm5 = vcmp.eq.s32.totalorder %v2682_v3, %v5694_v37 }
 0x32b   : > { %v2400_v45 = vadd.f32 %v2399_v12, %v2191_v0  ;;  %7346 = vst [vmem:[#allocation106_spill] sm:$0xff] %v5696_v6  ;;  %v2680_v0 = vadd.s32 16, %v5689_v1 }
 0x32d   : > { %2584 = vst.msk [vmem:[#allocation2 + $0x58] sm:$0xff] %vm2572_vm0, %v2400_v45  ;;  %vm2690_vm3 = vcmp.eq.s32.totalorder %v2680_v0, %v5694_v37  ;;  %v4268_v45 = vsel %vm2691_vm4, 1.0, %v4555_v14 }
 0x32e   : > { %v4267_v47 = vsel %vm2690_vm3, 1.0, %v4555_v14 }
 0x330   : > { %v2193_v52 = vpop.f32.mrf.mxu0  ;;  %2747 = vmatpush.bf16.xpose.msra.mxu0 %v2729_v39 }
 0x331   : > { %v2194_v12 = vadd.f32 %v2193_v52, %v5011_v17  ;;  %v1987_v17 = vadd.f32 %v5019_v41, %v1778_v5  ;;  %v2407_v43 = vpop.f32.mrf.mxu3  ;;  %v2713_v52 = vpack.c.bf16 %v4268_v45, %v4267_v47  ;;  %v2683_v5 = vadd.s32 40, %v5689_v1 }
 0x332   : > { %v5706_v57 = vpop.f32.mrf.mxu1 }
 0x333   : > { %v2403_v28 = vadd.f32 %v2402_v42, %v2194_v12  ;;  %7347 = vst [vmem:[#allocation107_spill] sm:$0xff] %v5706_v57  ;;  %v4189_v12 = vld [vmem:[%s7241_s2 + $0x470] sm:$0xf0]  ;;  %vm2693_vm6 = vcmp.eq.s32.totalorder %v2683_v5, %v5694_v37 }
 0x335   : > { %2585 = vst.msk [vmem:[#allocation2 + $0x60] sm:$0xff] %vm2572_vm0, %v2403_v28  ;;  %2123 = vmatmul.bf16.gmra.mxu1 %v4176_v62  ;;  %v1992_v28 = vadd.f32 %v5228_v53, %v4928_v20  ;;  %v4269_v20 = vsel %vm2692_vm5, 1.0, %v4555_v14  ;;  %v4270_v53 = vsel %vm2693_vm6, 1.0, %v4555_v14 }
 0x336   : > { %v2714_v0 = vpack.c.bf16 %v4270_v53, %v4269_v20  ;;  %v4221_v20 = vld [vmem:[%s7241_s2 + $0x4b0] sm:$0xf0] }
 0x337   : > { %4273 = vmatmul.msk.bf16.vlgmr.msra.gmra.mxu0 %vm2572_vm0, %v2712_v49 }
 0x338   : > { %v2195_v18 = vpop.f32.mrf.mxu0 }
 0x339   : > { %v2196_v19 = vadd.f32 %v2195_v18, %v1987_v17  ;;  %v2409_v49 = vpop.f32.mrf.mxu3  ;;  %v4461_v18 = vld [vmem:[%s7241_s2 + $0x484] sm:$0xf] }
 0x33a   : > { %v5724_v63 = vpop.f32.mrf.mxu1 }
 0x33b   : > { %v2405_v42 = vadd.f32 %v2404_v22, %v2196_v19  ;;  %7348 = vst [vmem:[#allocation108_spill] sm:$0xff] %v5724_v63  ;;  %v4205_v19 = vld [vmem:[%s7241_s2 + $0x490] sm:$0xf0] }
 0x33c   : > { %v4208_v47 = vor.u32 %v4461_v18, %v4205_v19 }
 0x33d   : > { %2586 = vst.msk [vmem:[#allocation2 + $0x68] sm:$0xff] %vm2572_vm0, %v2405_v42 }
 0x340   : > { %v2198_v41 = vpop.f32.mrf.mxu0 }
 0x341   : > { %v2199_v31 = vadd.f32 %v2198_v41, %v5034_v25  ;;  %v4192_v25 = vor.u32 %v4457_v13, %v4189_v12  ;;  %v2685_v13 = vadd.s32 56, %v5689_v1  ;;  %v2668_v12 = vld [vmem:[#allocation2 + $0x58] sm:$0xff] }
 0x342   : > { %v5730_v10 = vpop.f32.mrf.mxu1 }
 0x343   : > { %v2408_v39 = vadd.f32 %v2407_v43, %v2199_v31  ;;  %7349 = vst [vmem:[#allocation109_spill] sm:$0xff] %v5730_v10  ;;  %v2669_v31 = vld [vmem:[#allocation2 + $0x60] sm:$0xff]  ;;  %vm2695_vm8 = vcmp.eq.s32.totalorder %v2685_v13, %v5694_v37 }
 0x344   : > { %v2670_v45 = vld [vmem:[#allocation2 + $0x68] sm:$0xff]  ;;  %v4272_v5 = vsel %vm2695_vm8, 1.0, %v4555_v14 }
 0x345   : > { %2587 = vst.msk [vmem:[#allocation2 + $0x70] sm:$0xff] %vm2572_vm0, %v2408_v39  ;;  %2128 = vmatmul.bf16.gmra.mxu1 %v4192_v25  ;;  %v2675_v39 = vpack.c.bf16 %v2670_v45, %v2669_v31  ;;  %v4237_v45 = vld [vmem:[%s7241_s2 + $0x4d0] sm:$0xf0] }
 0x347   : > { %4274 = vmatmul.msk.bf16.gmra.mxu0 %vm2572_vm0, %v2713_v52  ;;  %v2684_v52 = vadd.s32 48, %v5689_v1  ;;  %v4465_v1 = vld [vmem:[%s7241_s2 + $0x4a4] sm:$0xf] }
 0x348   : > { %v2200_v22 = vpop.f32.mrf.mxu0  ;;  %v4224_v18 = vor.u32 %v4465_v1, %v4221_v20  ;;  %v4354_v20 = vld [vmem:[%s7241_s2 + $0x12c] sm:$0xf] }
 0x349   : > { %v2201_v33 = vadd.f32 %v2200_v22, %v1992_v28  ;;  %v2667_v28 = vld [vmem:[#allocation2 + $0x50] sm:$0xff]  ;;  %vm2694_vm7 = vcmp.eq.s32.totalorder %v2684_v52, %v5694_v37  ;;  %v2666_v22 = vld [vmem:[#allocation2 + $0x48] sm:$0xff] }
 0x34a   : > { %v5746_v17 = vpop.f32.mrf.mxu1  ;;  %v2674_v25 = vpack.c.bf16 %v2668_v12, %v2667_v28  ;;  %v4271_v3 = vsel %vm2694_vm7, 1.0, %v4555_v14  ;;  %v4473_v12 = vld [vmem:[%s7241_s2 + $0x4e4] sm:$0xf]  ;;  %v4253_v28 = vld [vmem:[%s7241_s2 + $0x4f0] sm:$0xf0] }
 0x34b   : > { %v2410_v62 = vadd.f32 %v2409_v49, %v2201_v33  ;;  %7350 = vst [vmem:[#allocation110_spill] sm:$0xff] %v5746_v17  ;;  %v2665_v33 = vld [vmem:[#allocation2 + $0x40] sm:$0xff]  ;;  %v2715_v37 = vpack.c.bf16 %v4272_v5, %v4271_v3 }
 0x34c   : > { %v2671_v38 = vld [vmem:[#allocation2 + $0x70] sm:$0xff] }
 0x34d   : > { %2588 = vst.msk [vmem:[#allocation2 + $0x78] sm:$0xff] %vm2572_vm0, %v2410_v62  ;;  %v2673_v62 = vpack.c.bf16 %v2666_v22, %v2665_v33  ;;  %v4256_v22 = vor.u32 %v4473_v12, %v4253_v28 }
 0x350   : > { %v5775_v19 = vpop.f32.mrf.mxu0 }
 0x352   : > { %v5756_v41 = vpop.f32.mrf.mxu1 }
 0x353   : > { %7351 = vst [vmem:[#allocation111_spill] sm:$0xff] %v5756_v41 }
 0x354   : > { %v2672_v42 = vld [vmem:[#allocation2 + $0x78] sm:$0xff] }
 0x355   : > { %v2676_v43 = vpack.c.bf16 %v2672_v42, %v2671_v38  ;;  %2133 = vmatmul.bf16.gmra.mxu1 %v4208_v47  ;;  %v3765_v38 = vld [vmem:[%s7241_s2 + $0x118] sm:$0xf0]  ;;  %v4469_v47 = vld [vmem:[%s7241_s2 + $0x4c4] sm:$0xf] }
 0x356   : > { %v4240_v31 = vor.u32 %v4469_v47, %v4237_v45  ;;  %v4358_v47 = vld [vmem:[%s7241_s2 + $0x14c] sm:$0xf]  ;;  %v3797_v45 = vld [vmem:[%s7241_s2 + $0x158] sm:$0xf0] }
 0x357   : > { %4275 = vmatmul.msk.bf16.gmra.mxu0 %vm2572_vm0, %v2714_v0  ;;  %2789 = vmatpush.bf16.msra.mxu1 %v2676_v43  ;;  %v4350_v0 = vld [vmem:[%s7241_s2 + $0x10c] sm:$0xf] }
 0x358   : > { %v3768_v42 = vor.u32 %v4350_v0, %v3765_v38  ;;  %v5786_v43 = vpop.f32.mrf.mxu0 }
 0x35a   : > { %v5763_v49 = vpop.f32.mrf.mxu1  ;;  %2411 = vmatmul.bf16.gmra.mxu3 %v3768_v42 }
 0x35b   : > { %2790 = vmatpush.bf16.msra.mxu1 %v2675_v39  ;;  %7352 = vst [vmem:[#allocation112_spill] sm:$0xff] %v5763_v49 }
 0x35f   : > { %2791 = vmatpush.bf16.msra.mxu1 %v2674_v25 }
 0x360   : > { %v5796_v52 = vpop.f32.mrf.mxu0 }
 0x362   : > { %v5773_v53 = vpop.f32.mrf.mxu1 }
 0x363   : > { %2792 = vmatpush.bf16.msra.mxu1 %v2673_v62  ;;  %7353 = vst [vmem:[#allocation113_spill] sm:$0xff] %v5773_v53 }
 0x365   : > { %2138 = vmatmul.bf16.gmra.mxu1 %v4224_v18 }
 0x367   : > { %4276 = vmatmul.msk.bf16.gmra.mxu0 %vm2572_vm0, %v2715_v37  ;;  %v3781_v37 = vld [vmem:[%s7241_s2 + $0x138] sm:$0xf0] }
 0x368   : > { %v5806_v25 = vpop.f32.mrf.mxu0  ;;  %v3784_v18 = vor.u32 %v4354_v20, %v3781_v37 }
 0x369   : > { %7357 = vst [vmem:[#allocation117_spill] sm:$0xff] %v5806_v25 }
 0x36a   : > { %v5778_v14 = vpop.f32.mrf.mxu1  ;;  %2416 = vmatmul.bf16.gmra.mxu3 %v3784_v18  ;;  %v4362_v18 = vld [vmem:[%s7241_s2 + $0x16c] sm:$0xf] }
 0x36b   : > { %7354 = vst [vmem:[#allocation114_spill] sm:$0xff] %v5778_v14 }
 0x370   : > { %v5810_v3 = vpop.f32.mrf.mxu0 }
 0x372   : > { %v5794_v39 = vpop.f32.mrf.mxu1 }
 0x373   : > { %7355 = vst [vmem:[#allocation115_spill] sm:$0xff] %v5794_v39 }
 0x375   : > { %2143 = vmatmul.bf16.gmra.mxu1 %v4240_v31  ;;  %v3800_v31 = vor.u32 %v4358_v47, %v3797_v45 }
 0x378   : > { %v5814_v62 = vpop.f32.mrf.mxu0 }
 0x37a   : > { %v5798_v13 = vpop.f32.mrf.mxu1  ;;  %2421 = vmatmul.bf16.gmra.mxu3 %v3800_v31 }
 0x37b   : > { %7356 = vst [vmem:[#allocation116_spill] sm:$0xff] %v5798_v13 }
 0x380   : > { %v5824_v0 = vpop.f32.mrf.mxu0 }
 0x381   : > { %7361 = vst [vmem:[#allocation121_spill] sm:$0xff] %v5824_v0 }
 0x382   : > { %v5808_v33 = vpop.f32.mrf.mxu1 }
 0x383   : > { %7358 = vst [vmem:[#allocation118_spill] sm:$0xff] %v5808_v33 }
 0x385   : > { %2148 = vmatmul.bf16.gmra.mxu1 %v4256_v22 }
 0x388   : > { %v5828_v42 = vpop.f32.mrf.mxu0 }
 0x38a   : > { %v5812_v5 = vpop.f32.mrf.mxu1 }
 0x38b   : > { %7359 = vst [vmem:[#allocation119_spill] sm:$0xff] %v5812_v5  ;;  %v3843_v5 = vld [vmem:[%s7241_s2 + $0x1a8] sm:$0xf] }
 0x392   : > { %v5816_v1 = vpop.f32.mrf.mxu1 }
 0x393   : > { %7360 = vst [vmem:[#allocation120_spill] sm:$0xff] %v5816_v1  ;;  %v3813_v1 = vld [vmem:[%s7241_s2 + $0x178] sm:$0xf0] }
 0x394   : > { %v3816_v13 = vor.u32 %v4362_v18, %v3813_v1  ;;  %v4370_v18 = vld [vmem:[%s7241_s2 + $0x1ac] sm:$0xf] }
 0x396   : > { %2426 = vmatmul.bf16.gmra.mxu3 %v3816_v13 }
 0x39a   : > { %v5826_v38 = vpop.f32.mrf.mxu1 }
 0x39b   : > { %7362 = vst [vmem:[#allocation122_spill] sm:$0xff] %v5826_v38 }
 0x3a2   : > { %v5836_v12 = vpop.f32.mrf.mxu1 }
 0x3a3   : > { %7363 = vst [vmem:[#allocation123_spill] sm:$0xff] %v5836_v12 }
 0x3aa   : > { %v5838_v20 = vpop.f32.mrf.mxu1 }
 0x3ab   : > { %7364 = vst [vmem:[#allocation124_spill] sm:$0xff] %v5838_v20 }
 0x3b2   : > { %v5847_v45 = vpop.f32.mrf.mxu1 }
 0x3b3   : > { %7365 = vst [vmem:[#allocation125_spill] sm:$0xff] %v5847_v45 }
 0x3b4   : > { %v2749_v28 = vpop.f32.mrf.mxu0 }
 0x3bc   : > { %v2751_v22 = vpop.f32.mrf.mxu0 }
 0x3bd   : > { %v2769_v37 = vpack.c.bf16 %v2751_v22, %v2749_v28  ;;  %v4366_v28 = vld [vmem:[%s7241_s2 + $0x18c] sm:$0xf]  ;;  %v3829_v22 = vld [vmem:[%s7241_s2 + $0x198] sm:$0xf0] }
 0x3be   : > { %v3832_v20 = vor.u32 %v4366_v28, %v3829_v22  ;;  %v3861_v22 = vld [vmem:[%s7241_s2 + $0x1d8] sm:$0xf0] }
 0x3bf   : > { %4277 = vmatmul.msk.bf16.vlgmr.msra.gmra.mxu1 %vm2572_vm0, %v2769_v37  ;;  %v5856_v37 = vpop.f32.mrf.mxu1 }
 0x3c0   : > { %7366 = vst [vmem:[#allocation126_spill] sm:$0xff] %v5856_v37  ;;  %2431 = vmatmul.bf16.gmra.mxu3 %v3832_v20  ;;  %v4374_v20 = vld [vmem:[%s7241_s2 + $0x1cc] sm:$0xf] }
 0x3c4   : > { %v2754_v47 = vpop.f32.mrf.mxu0 }
 0x3c7   : > { %v5858_v1 = vpop.f32.mrf.mxu1 }
 0x3c8   : > { %7367 = vst [vmem:[#allocation127_spill] sm:$0xff] %v5858_v1 }
 0x3cc   : > { %v2756_v31 = vpop.f32.mrf.mxu0 }
 0x3cd   : > { %v2770_v38 = vpack.c.bf16 %v2756_v31, %v2754_v47 }
 0x3cf   : > { %4278 = vmatmul.msk.bf16.gmra.mxu1 %vm2572_vm0, %v2770_v38  ;;  %v3845_v38 = vld [vmem:[%s7241_s2 + $0x1b8] sm:$0xf0]  ;;  %v5867_v28 = vpop.f32.mrf.mxu1 }
 0x3d0   : > { %v3848_v45 = vor.u32 %v4370_v18, %v3845_v38  ;;  %7368 = vst [vmem:[#allocation128_spill] sm:$0xff] %v5867_v28  ;;  %v4378_v18 = vld [vmem:[%s7241_s2 + $0x1ec] sm:$0xf]  ;;  %v3877_v38 = vld [vmem:[%s7241_s2 + $0x1f8] sm:$0xf0] }
 0x3d2   : > { %2436 = vmatmul.bf16.gmra.mxu3 %v3848_v45 }
 0x3d4   : > { %v2759_v13 = vpop.f32.mrf.mxu0 }
 0x3d7   : > { %v5875_v33 = vpop.f32.mrf.mxu1 }
 0x3d8   : > { %7369 = vst [vmem:[#allocation129_spill] sm:$0xff] %v5875_v33  ;;  %v4368_v33 = vld [vmem:[%s7241_s2 + $0x194] sm:$0xf0] }
 0x3dc   : > { %v2761_v47 = vpop.f32.mrf.mxu0 }
 0x3dd   : > { %v2771_v31 = vpack.c.bf16 %v2761_v47, %v2759_v13  ;;  %v3864_v13 = vor.u32 %v4374_v20, %v3861_v22  ;;  %v3880_v47 = vor.u32 %v4378_v18, %v3877_v38  ;;  %v5896_v22 = vpop.f32.mrf.mxu3  ;;  %v4386_v38 = vld [vmem:[%s7241_s2 + $0x22c] sm:$0xf] }
 0x3df   : > { %4279 = vmatmul.msk.bf16.gmra.mxu1 %vm2572_vm0, %v2771_v31  ;;  %v5878_v45 = vpop.f32.mrf.mxu1 }
 0x3e0   : > { %7370 = vst [vmem:[#allocation130_spill] sm:$0xff] %v5878_v45 }
 0x3e2   : > { %2441 = vmatmul.bf16.gmra.mxu3 %v3864_v13 }
 0x3e4   : > { %v2764_v53 = vpop.f32.mrf.mxu0 }
 0x3e5   : > { %v5900_v18 = vpop.f32.mrf.mxu3 }
 0x3e7   : > { %v5886_v31 = vpop.f32.mrf.mxu1 }
 0x3e8   : > { %7371 = vst [vmem:[#allocation131_spill] sm:$0xff] %v5886_v31 }
 0x3ec   : > { %v2766_v1 = vpop.f32.mrf.mxu0 }
 0x3ed   : > { %v2772_v37 = vpack.c.bf16 %v2766_v1, %v2764_v53  ;;  %v4382_v53 = vld [vmem:[%s7241_s2 + $0x20c] sm:$0xf] }
 0x3ef   : > { %4280 = vmatmul.msk.bf16.gmra.mxu1 %vm2572_vm0, %v2772_v37  ;;  %v3893_v37 = vld [vmem:[%s7241_s2 + $0x218] sm:$0xf0]  ;;  %v5894_v1 = vpop.f32.mrf.mxu1 }
 0x3f0   : > { %7372 = vst [vmem:[#allocation132_spill] sm:$0xff] %v5894_v1  ;;  %v3896_v20 = vor.u32 %v4382_v53, %v3893_v37  ;;  %v5910_v53 = vpop.f32.mrf.mxu3 }
 0x3f2   : > { %2446 = vmatmul.bf16.gmra.mxu3 %v3880_v47  ;;  %v3909_v47 = vld [vmem:[%s7241_s2 + $0x238] sm:$0xf0] }
 0x3f3   : > { %v3912_v45 = vor.u32 %v4386_v38, %v3909_v47 }
 0x3f7   : > { %v5898_v13 = vpop.f32.mrf.mxu1 }
 0x3f8   : > { %7373 = vst [vmem:[#allocation133_spill] sm:$0xff] %v5898_v13  ;;  %v3925_v13 = vld [vmem:[%s7241_s2 + $0x258] sm:$0xf0]  ;;  %v5920_v28 = vpop.f32.mrf.mxu3 }
 0x3f9   : > { %7376 = vst [vmem:[#allocation136_spill] sm:$0xff] %v5920_v28 }
 0x3ff   : > { %v5908_v31 = vpop.f32.mrf.mxu1 }
 0x400   : > { %7374 = vst [vmem:[#allocation134_spill] sm:$0xff] %v5908_v31  ;;  %v5924_v47 = vpop.f32.mrf.mxu3 }
 0x402   : > { %2451 = vmatmul.bf16.gmra.mxu3 %v3896_v20  ;;  %v4390_v20 = vld [vmem:[%s7241_s2 + $0x24c] sm:$0xf] }
 0x403   : > { %v3928_v1 = vor.u32 %v4390_v20, %v3925_v13  ;;  %v3941_v20 = vld [vmem:[%s7241_s2 + $0x278] sm:$0xf0] }
 0x407   : > { %v5912_v37 = vpop.f32.mrf.mxu1 }
 0x408   : > { %7375 = vst [vmem:[#allocation135_spill] sm:$0xff] %v5912_v37  ;;  %v5928_v31 = vpop.f32.mrf.mxu3  ;;  %v3827_v37 = vld [vmem:[%s7241_s2 + $0x188] sm:$0xf] }
 0x409   : > { %v3828_v13 = vor.u32 %v4368_v33, %v3827_v37  ;;  %v4372_v33 = vld [vmem:[%s7241_s2 + $0x1b4] sm:$0xf0]  ;;  %v4398_v37 = vld [vmem:[%s7241_s2 + $0x28c] sm:$0xf] }
 0x40b   : > { %2222 = vmatmul.bf16.vlgmr.msra.gmra.mxu2 %v3828_v13 }
 0x40f   : > { %v5922_v38 = vpop.f32.mrf.mxu1 }
 0x410   : > { %7377 = vst [vmem:[#allocation137_spill] sm:$0xff] %v5922_v38 }
 0x412   : > { %2456 = vmatmul.bf16.gmra.mxu3 %v3912_v45 }
 0x419   : > { %v5944_v12 = vpop.f32.mrf.mxu3 }
 0x41a   : > { %7378 = vst [vmem:[#allocation138_spill] sm:$0xff] %v5944_v12 }
 0x421   : > { %v5948_v57 = vpop.f32.mrf.mxu3 }
 0x422   : > { %2461 = vmatmul.bf16.gmra.mxu3 %v3928_v1  ;;  %v4394_v1 = vld [vmem:[%s7241_s2 + $0x26c] sm:$0xf]  ;;  %7379 = vst [vmem:[#allocation139_spill] sm:$0xff] %v5948_v57 }
 0x423   : > { %v3944_v38 = vor.u32 %v4394_v1, %v3941_v20  ;;  %v3957_v1 = vld [vmem:[%s7241_s2 + $0x298] sm:$0xf0] }
 0x424   : > { %v3960_v13 = vor.u32 %v4398_v37, %v3957_v1  ;;  %v4402_v37 = vld [vmem:[%s7241_s2 + $0x2ac] sm:$0xf]  ;;  %v3973_v1 = vld [vmem:[%s7241_s2 + $0x2b8] sm:$0xf0] }
 0x432   : > { %2466 = vmatmul.bf16.gmra.mxu3 %v3944_v38  ;;  %v3844_v38 = vor.u32 %v4372_v33, %v3843_v5  ;;  %v3859_v5 = vld [vmem:[%s7241_s2 + $0x1c8] sm:$0xf]  ;;  %v4376_v33 = vld [vmem:[%s7241_s2 + $0x1d4] sm:$0xf0] }
 0x434   : > { %2227 = vmatmul.bf16.gmra.mxu2 %v3844_v38  ;;  %v3860_v38 = vor.u32 %v4376_v33, %v3859_v5  ;;  %v4380_v5 = vld [vmem:[%s7241_s2 + $0x1f4] sm:$0xf0]  ;;  %v4406_v33 = vld [vmem:[%s7241_s2 + $0x2cc] sm:$0xf] }
 0x43c   : > { %v5926_v45 = vpop.f32.mrf.mxu1 }
 0x43d   : > { %v2814_v59 = vsel %vm2572_vm0, %v5926_v45, -inf }
 0x442   : > { %2471 = vmatmul.bf16.gmra.mxu3 %v3960_v13 }
 0x443   : > { %v5964_v41 = vpop.f32.mrf.mxu3 }
 0x444   : > { %v5942_v17 = vpop.f32.mrf.mxu1  ;;  %2232 = vmatmul.bf16.gmra.mxu2 %v3860_v38 }
 0x44b   : > { %v5970_v63 = vpop.f32.mrf.mxu3 }
 0x44c   : > { %v5946_v14 = vpop.f32.mrf.mxu1  ;;  %7380 = vst [vmem:[#allocation140_spill] sm:$0xff] %v5970_v63 }
 0x44d   : > { %v2820_v61 = vsel %vm2572_vm0, %v5946_v14, -inf }
 0x454   : > { %v5962_v20 = vpop.f32.mrf.mxu1 }
 0x455   : > { %v5988_v49 = vpop.f32.mrf.mxu3  ;;  %v2823_v7 = vsel %vm2572_vm0, %v5962_v20, -inf }
 0x456   : > { %7381 = vst [vmem:[#allocation141_spill] sm:$0xff] %v5988_v49 }
 0x45c   : > { %v5966_v26 = vpop.f32.mrf.mxu1 }
 0x45d   : > { %v2826_v39 = vsel %vm2572_vm0, %v5966_v26, -inf }
 0x45e   : > { %2827 = vmax.xlane.f32.xlu0 %v2826_v39  ;;  %v3976_v39 = vor.u32 %v4402_v37, %v3973_v1  ;;  %v3989_v37 = vld [vmem:[%s7241_s2 + $0x2d8] sm:$0xf0]  ;;  %v3876_v1 = vor.u32 %v4380_v5, %v3875_v16  ;;  %v3891_v16 = vld [vmem:[%s7241_s2 + $0x208] sm:$0xf]  ;;  %v4410_v5 = vld [vmem:[%s7241_s2 + $0x2ec] sm:$0xf] }
 0x45f   : > { %v3992_v58 = vor.u32 %v4406_v33, %v3989_v37  ;;  %v4005_v33 = vld [vmem:[%s7241_s2 + $0x2f8] sm:$0xf0] }
 0x460   : > { %2476 = vmatmul.bf16.gmra.mxu3 %v3976_v39  ;;  %v6006_v39 = vpop.f32.mrf.mxu3  ;;  %2237 = vmatmul.bf16.gmra.mxu2 %v3876_v1  ;;  %v4008_v1 = vor.u32 %v4410_v5, %v4005_v33  ;;  %v4021_v5 = vld [vmem:[%s7241_s2 + $0x318] sm:$0xf0] }
 0x464   : > { %v5984_v13 = vpop.f32.mrf.mxu1 }
 0x466   : > { %2815 = vmax.xlane.f32.xlu0 %v2814_v59 }
 0x468   : > { %v6014_v30 = vpop.f32.mrf.mxu3 }
 0x469   : > { %7382 = vst [vmem:[#allocation142_spill] sm:$0xff] %v6014_v30  ;;  %v4396_v30 = vld [vmem:[%s7241_s2 + $0x274] sm:$0xf0] }
 0x46c   : > { %v6002_v38 = vpop.f32.mrf.mxu1 }
 0x46d   : > { %v2832_v59 = vsel %vm2572_vm0, %v6002_v38, -inf }
 0x46e   : > { %2833 = vmax.xlane.f32.xlu1 %v2832_v59 }
 0x470   : > { %2481 = vmatmul.bf16.gmra.mxu3 %v3992_v58  ;;  %v4384_v58 = vld [vmem:[%s7241_s2 + $0x214] sm:$0xf0]  ;;  %v6032_v59 = vpop.f32.mrf.mxu3 }
 0x471   : > { %v3892_v37 = vor.u32 %v4384_v58, %v3891_v16  ;;  %7383 = vst [vmem:[#allocation143_spill] sm:$0xff] %v6032_v59  ;;  %v4388_v16 = vld [vmem:[%s7241_s2 + $0x234] sm:$0xf0]  ;;  %v4414_v58 = vld [vmem:[%s7241_s2 + $0x30c] sm:$0xf] }
 0x472   : > { %v3908_v33 = vor.u32 %v4388_v16, %v3907_v50  ;;  %v4037_v50 = vld [vmem:[%s7241_s2 + $0x338] sm:$0xf0] }
 0x473   : > { %2242 = vmatmul.bf16.gmra.mxu2 %v3892_v37  ;;  %v3923_v37 = vld [vmem:[%s7241_s2 + $0x248] sm:$0xf] }
 0x474   : > { %v6008_v10 = vpop.f32.mrf.mxu1 }
 0x475   : > { %v2835_v6 = vsel %vm2572_vm0, %v6008_v10, -inf }
 0x476   : > { %2821 = vmax.xlane.f32.xlu1 %v2820_v61  ;;  %2836 = vmax.xlane.f32.xlu2 %v2835_v6  ;;  %v2829_v61 = vsel %vm2572_vm0, %v5984_v13, -inf  ;;  %v2817_v6 = vsel %vm2572_vm0, %v5942_v17, -inf }
 0x478   : > { %v6036_v11 = vpop.f32.mrf.mxu3 }
 0x479   : > { %7384 = vst [vmem:[#allocation144_spill] sm:$0xff] %v6036_v11 }
 0x47e   : > { %2830 = vmax.xlane.f32.xlu2 %v2829_v61  ;;  %2818 = vmax.xlane.f32.xlu1 %v2817_v6  ;;  %v4024_v61 = vor.u32 %v4414_v58, %v4021_v5  ;;  %v4040_v5 = vor.u32 %v4418_v4, %v4037_v50  ;;  %v4053_v4 = vld [vmem:[%s7241_s2 + $0x358] sm:$0xf0] }
 0x480   : > { %2486 = vmatmul.bf16.gmra.mxu3 %v4008_v1  ;;  %v4392_v1 = vld [vmem:[%s7241_s2 + $0x254] sm:$0xf0] }
 0x481   : > { %v3924_v16 = vor.u32 %v4392_v1, %v3923_v37  ;;  %v4422_v37 = vld [vmem:[%s7241_s2 + $0x34c] sm:$0xf] }
 0x482   : > { %v4056_v1 = vor.u32 %v4422_v37, %v4053_v4 }
 0x483   : > { %2247 = vmatmul.bf16.gmra.mxu2 %v3908_v33 }
 0x486   : > { %2824 = vmax.xlane.f32.xlu2 %v2823_v7  ;;  %v6050_v7 = vpop.f32.mrf.mxu3 }
 0x487   : > { %7385 = vst [vmem:[#allocation145_spill] sm:$0xff] %v6050_v7  ;;  %v3939_v7 = vld [vmem:[%s7241_s2 + $0x268] sm:$0xf] }
 0x48e   : > { %v6052_v6 = vpop.f32.mrf.mxu3  ;;  %v6100_v4 = vpop.f32.mrf.mxu2 }
 0x48f   : > { %7386 = vst [vmem:[#allocation146_spill] sm:$0xff] %v6052_v6  ;;  %v3940_v6 = vor.u32 %v4396_v30, %v3939_v7  ;;  %v4400_v30 = vld [vmem:[%s7241_s2 + $0x294] sm:$0xf0] }
 0x490   : > { %2491 = vmatmul.bf16.gmra.mxu3 %v4024_v61 }
 0x493   : > { %2252 = vmatmul.bf16.gmra.mxu2 %v3924_v16 }
 0x496   : > { %v6066_v58 = vpop.f32.mrf.mxu3 }
 0x497   : > { %7387 = vst [vmem:[#allocation147_spill] sm:$0xff] %v6066_v58 }
 0x49e   : > { %v6068_v33 = vpop.f32.mrf.mxu3 }
 0x49f   : > { %7388 = vst [vmem:[#allocation148_spill] sm:$0xff] %v6068_v33  ;;  %v4426_v33 = vld [vmem:[%s7241_s2 + $0x36c] sm:$0xf] }
 0x4a0   : > { %2496 = vmatmul.bf16.gmra.mxu3 %v4040_v5  ;;  %v3955_v5 = vld [vmem:[%s7241_s2 + $0x288] sm:$0xf] }
 0x4a1   : > { %v3956_v7 = vor.u32 %v4400_v30, %v3955_v5  ;;  %v3971_v5 = vld [vmem:[%s7241_s2 + $0x2a8] sm:$0xf]  ;;  %v4404_v30 = vld [vmem:[%s7241_s2 + $0x2b4] sm:$0xf0] }
 0x4a3   : > { %2257 = vmatmul.bf16.gmra.mxu2 %v3940_v6  ;;  %v4069_v6 = vld [vmem:[%s7241_s2 + $0x378] sm:$0xf0] }
 0x4a4   : > { %v4072_v37 = vor.u32 %v4426_v33, %v4069_v6  ;;  %v3972_v33 = vor.u32 %v4404_v30, %v3971_v5  ;;  %v4085_v6 = vld [vmem:[%s7241_s2 + $0x398] sm:$0xf0]  ;;  %v3987_v30 = vld [vmem:[%s7241_s2 + $0x2c8] sm:$0xf] }
 0x4a6   : > { %v6070_v61 = vpop.f32.mrf.mxu3 }
 0x4a7   : > { %7389 = vst [vmem:[#allocation149_spill] sm:$0xff] %v6070_v61 }
 0x4ae   : > { %v6084_v50 = vpop.f32.mrf.mxu3 }
 0x4af   : > { %7390 = vst [vmem:[#allocation150_spill] sm:$0xff] %v6084_v50 }
 0x4b0   : > { %2501 = vmatmul.bf16.gmra.mxu3 %v4056_v1 }
 0x4b3   : > { %2262 = vmatmul.bf16.gmra.mxu2 %v3956_v7  ;;  %v4430_v7 = vld [vmem:[%s7241_s2 + $0x38c] sm:$0xf] }
 0x4b6   : > { %v6086_v16 = vpop.f32.mrf.mxu3 }
 0x4b7   : > { %7391 = vst [vmem:[#allocation151_spill] sm:$0xff] %v6086_v16  ;;  %v6104_v16 = vpop.f32.mrf.mxu2 }
 0x4b8   : > { %7393 = vst [vmem:[#allocation153_spill] sm:$0xff] %v6104_v16 }
 0x4be   : > { %v6102_v1 = vpop.f32.mrf.mxu3 }
 0x4bf   : > { %7392 = vst [vmem:[#allocation152_spill] sm:$0xff] %v6102_v1  ;;  %v6122_v1 = vpop.f32.mrf.mxu2 }
 0x4c0   : > { %2506 = vmatmul.bf16.gmra.mxu3 %v4072_v37  ;;  %v4088_v37 = vor.u32 %v4430_v7, %v4085_v6  ;;  %7395 = vst [vmem:[#allocation155_spill] sm:$0xff] %v6122_v1  ;;  %v4434_v7 = vld [vmem:[%s7241_s2 + $0x3ac] sm:$0xf] }
 0x4c3   : > { %2267 = vmatmul.bf16.gmra.mxu2 %v3972_v33  ;;  %v4408_v33 = vld [vmem:[%s7241_s2 + $0x2d4] sm:$0xf0] }
 0x4c6   : > { %v6106_v61 = vpop.f32.mrf.mxu3 }
 0x4c7   : > { %7394 = vst [vmem:[#allocation154_spill] sm:$0xff] %v6106_v61  ;;  %v6127_v5 = vpop.f32.mrf.mxu2 }
 0x4ce   : > { %v6124_v61 = vpop.f32.mrf.mxu3 }
 0x4cf   : > { %7396 = vst [vmem:[#allocation156_spill] sm:$0xff] %v6124_v61  ;;  %v6147_v12 = vpop.f32.mrf.mxu2 }
 0x4d0   : > { %2511 = vmatmul.bf16.gmra.mxu3 %v4088_v37  ;;  %v3988_v37 = vor.u32 %v4408_v33, %v3987_v30  ;;  %7398 = vst [vmem:[#allocation158_spill] sm:$0xff] %v6147_v12 }
 0x4d1   : > { %v6114_v63 = vpop.xlane.xlu0 %2827 }
 0x4d3   : > { %2272 = vmatmul.bf16.gmra.mxu2 %v3988_v37 }
 0x4d6   : > { %v6138_v6 = vpop.f32.mrf.mxu3 }
 0x4d7   : > { %7397 = vst [vmem:[#allocation157_spill] sm:$0xff] %v6138_v6 }
 0x4d9   : > { %v2816_v50 = vpop.xlane.xlu0 %2815 }
 0x4da   : > { %v2838_v16 = vsub.f32 %v5926_v45, %v2816_v50  ;;  %v4101_v45 = vld [vmem:[%s7241_s2 + $0x3b8] sm:$0xf0] }
 0x4db   : > { %v4104_v50 = vor.u32 %v4434_v7, %v4101_v45  ;;  %v6153_v7 = vpop.f32.mrf.mxu2  ;;  %v4412_v45 = vld [vmem:[%s7241_s2 + $0x2f4] sm:$0xf0] }
 0x4dc   : > { %v2846_v59 = vmul.f32 1.442695, %v2838_v16  ;;  %7400 = vst [vmem:[#allocation160_spill] sm:$0xff] %v6153_v7 }
 0x4de   : > { %4514 = vpow2.f32 %v2846_v59 }
 0x4e0   : > { %2516 = vmatmul.bf16.gmra.mxu3 %v4104_v50 }
 0x4e1   : > { %v2834_v59 = vpop.xlane.xlu1 %2833 }
 0x4e3   : > { %v6149_v58 = vpop.f32.mrf.mxu3 }
 0x4e4   : > { %v6143_v16 = vpop.eup %4514  ;;  %7399 = vst [vmem:[#allocation159_spill] sm:$0xff] %v6149_v58  ;;  %v2844_v58 = vsub.f32 %v6002_v38, %v2834_v59 }
 0x4e5   : > { %v2862_v61 = vsel %vm2572_vm0, %v6143_v16, 0.0 }
 0x4e6   : > { %2863 = vadd.xlane.f32.xlu2 %v2862_v61  ;;  %v4003_v61 = vld [vmem:[%s7241_s2 + $0x2e8] sm:$0xf] }
 0x4e7   : > { %v4004_v50 = vor.u32 %v4412_v45, %v4003_v61  ;;  %v6176_v61 = vpop.f32.mrf.mxu2  ;;  %v2858_v45 = vmul.f32 1.442695, %v2844_v58 }
 0x4e8   : > { %7402 = vst [vmem:[#allocation162_spill] sm:$0xff] %v6176_v61 }
 0x4e9   : > { %v2822_v6 = vpop.xlane.xlu1 %2821  ;;  %v2837_v30 = vpop.xlane.xlu2 %2836  ;;  %2277 = vmatmul.bf16.gmra.mxu2 %v4004_v50 }
 0x4ea   : > { %v2840_v33 = vsub.f32 %v5946_v14, %v2822_v6  ;;  %v2845_v49 = vsub.f32 %v6008_v10, %v2837_v30  ;;  %v4438_v14 = vld [vmem:[%s7241_s2 + $0x3cc] sm:$0xf]  ;;  %v4117_v10 = vld [vmem:[%s7241_s2 + $0x3d8] sm:$0xf0] }
 0x4eb   : > { %v6155_v37 = vpop.f32.mrf.mxu3 }
 0x4ec   : > { %v2850_v0 = vmul.f32 1.442695, %v2840_v33  ;;  %7401 = vst [vmem:[#allocation161_spill] sm:$0xff] %v6155_v37  ;;  %v2860_v6 = vmul.f32 1.442695, %v2845_v49  ;;  %v4120_v33 = vor.u32 %v4438_v14, %v4117_v10 }
 0x4ed   : > { %v4416_v10 = vld [vmem:[%s7241_s2 + $0x314] sm:$0xf0] }
 0x4ee   : > { %4516 = vpow2.f32 %v2850_v0 }
 0x4ef   : > { %4518 = vpow2.f32 %v2860_v6 }
 0x4f0   : > { %2521 = vmatmul.bf16.gmra.mxu3 %v4120_v33 }
 0x4f1   : > { %v2831_v0 = vpop.xlane.xlu2 %2830  ;;  %v2819_v30 = vpop.xlane.xlu1 %2818 }
 0x4f2   : > { %v2843_v37 = vsub.f32 %v5984_v13, %v2831_v0  ;;  %v2839_v1 = vsub.f32 %v5942_v17, %v2819_v30 }
 0x4f3   : > { %v6178_v14 = vpop.f32.mrf.mxu3 }
 0x4f4   : > { %v6171_v12 = vpop.eup %4516  ;;  %v2856_v7 = vmul.f32 1.442695, %v2843_v37  ;;  %7403 = vst [vmem:[#allocation163_spill] sm:$0xff] %v6178_v14  ;;  %v2848_v13 = vmul.f32 1.442695, %v2839_v1  ;;  %v6191_v1 = vpop.f32.mrf.mxu2 }
 0x4f5   : > { %v2868_v49 = vsel %vm2572_vm0, %v6171_v12, 0.0  ;;  %v6180_v59 = vpop.eup %4518  ;;  %7404 = vst [vmem:[#allocation164_spill] sm:$0xff] %v6191_v1  ;;  %v4165_v14 = vld [vmem:[%s7241_s2 + $0x438] sm:$0xf0]  ;;  %v484_v1 = vld [vmem:[%s7242_s3 + $0xe0] sm:$0xff] }
 0x4f6   : > { %4520 = vpow2.f32 %v2856_v7  ;;  %2869 = vadd.xlane.f32.xlu0 %v2868_v49  ;;  %v2842_v7 = vsub.f32 %v5966_v26, %v6114_v63  ;;  %v2883_v50 = vsel %vm2572_vm0, %v6180_v59, 0.0  ;;  %v4442_v49 = vld [vmem:[%s7241_s2 + $0x3ec] sm:$0xf] }
 0x4f7   : > { %4522 = vpow2.f32 %v2858_v45  ;;  %v4133_v45 = vld [vmem:[%s7241_s2 + $0x3f8] sm:$0xf0] }
 0x4f8   : > { %4524 = vpow2.f32 %v2848_v13  ;;  %v2854_v30 = vmul.f32 1.442695, %v2842_v7  ;;  %v4136_v13 = vor.u32 %v4442_v49, %v4133_v45  ;;  %v4035_v49 = vld [vmem:[%s7241_s2 + $0x328] sm:$0xf]  ;;  %v4420_v45 = vld [vmem:[%s7241_s2 + $0x334] sm:$0xf0] }
 0x4f9   : > { %v2825_v38 = vpop.xlane.xlu2 %2824 }
 0x4fa   : > { %v2841_v6 = vsub.f32 %v5962_v20, %v2825_v38  ;;  %v4019_v20 = vld [vmem:[%s7241_s2 + $0x308] sm:$0xf] }
 0x4fb   : > { %v6199_v26 = vpop.f32.mrf.mxu3  ;;  %v4020_v63 = vor.u32 %v4416_v10, %v4019_v20 }
 0x4fc   : > { %v6183_v37 = vpop.eup %4520  ;;  %v2852_v17 = vmul.f32 1.442695, %v2841_v6  ;;  %7405 = vst [vmem:[#allocation165_spill] sm:$0xff] %v6199_v26  ;;  %v472_v26 = vld [vmem:[%s7242_s3 + $0x80] sm:$0xff] }
 0x4fd   : > { %v2877_v58 = vsel %vm2572_vm0, %v6183_v37, 0.0  ;;  %v6201_v0 = vpop.eup %4522  ;;  %2282 = vmatmul.bf16.gmra.mxu2 %v4020_v63 }
 0x4fe   : > { %4526 = vpow2.f32 %v2852_v17  ;;  %2884 = vadd.xlane.f32.xlu0 %v2883_v50  ;;  %2878 = vadd.xlane.f32.xlu2 %v2877_v58  ;;  %v6203_v33 = vpop.eup %4524  ;;  %v2880_v17 = vsel %vm2572_vm0, %v6201_v0, 0.0  ;;  %v6219_v50 = vpop.f32.mrf.mxu2 }
 0x4ff   : > { %4528 = vpow2.f32 %v2854_v30  ;;  %v2865_v6 = vsel %vm2572_vm0, %v6203_v33, 0.0  ;;  %7406 = vst [vmem:[#allocation166_spill] sm:$0xff] %v6219_v50 }
 0x500   : > { %2526 = vmatmul.bf16.gmra.mxu3 %v4136_v13  ;;  %v4036_v13 = vor.u32 %v4420_v45, %v4035_v49  ;;  %v473_v49 = vld [vmem:[%s7242_s3 + $0x88] sm:$0xff] }
 0x503   : > { %v6221_v58 = vpop.f32.mrf.mxu3 }
 0x504   : > { %v6211_v38 = vpop.eup %4526  ;;  %7407 = vst [vmem:[#allocation167_spill] sm:$0xff] %v6221_v58  ;;  %v474_v58 = vld [vmem:[%s7242_s3 + $0x90] sm:$0xff] }
 0x505   : > { %v2871_v7 = vsel %vm2572_vm0, %v6211_v38, 0.0  ;;  %v6223_v20 = vpop.eup %4528 }
 0x506   : > { %2866 = vadd.xlane.f32.xlu0 %v2865_v6  ;;  %2881 = vadd.xlane.f32.xlu2 %v2880_v17  ;;  %v2874_v10 = vsel %vm2572_vm0, %v6223_v20, 0.0  ;;  %v6227_v63 = vpop.f32.mrf.mxu2  ;;  %v4446_v6 = vld [vmem:[%s7241_s2 + $0x40c] sm:$0xf]  ;;  %v4149_v17 = vld [vmem:[%s7241_s2 + $0x418] sm:$0xf0] }
 0x507   : > { %2872 = vadd.xlane.f32.xlu1 %v2871_v7  ;;  %7408 = vst [vmem:[#allocation168_spill] sm:$0xff] %v6227_v63  ;;  %v4152_v7 = vor.u32 %v4446_v6, %v4149_v17  ;;  %v4051_v17 = vld [vmem:[%s7241_s2 + $0x348] sm:$0xf] }
 0x50b   : > { %v6229_v30 = vpop.f32.mrf.mxu3 }
 0x50c   : > { %7409 = vst [vmem:[#allocation169_spill] sm:$0xff] %v6229_v30 }
 0x50d   : > { %2287 = vmatmul.bf16.gmra.mxu2 %v4036_v13  ;;  %v476_v13 = vld [vmem:[%s7242_s3 + $0xa0] sm:$0xff] }
 0x50f   : > { %2875 = vadd.xlane.f32.xlu1 %v2874_v10  ;;  %v6243_v10 = vpop.f32.mrf.mxu2 }
 0x510   : > { %2531 = vmatmul.bf16.gmra.mxu3 %v4152_v7  ;;  %7410 = vst [vmem:[#allocation170_spill] sm:$0xff] %v6243_v10  ;;  %v478_v10 = vld [vmem:[%s7242_s3 + $0xb0] sm:$0xff] }
 0x513   : > { %v6248_v30 = vpop.f32.mrf.mxu3 }
 0x514   : > { %7411 = vst [vmem:[#allocation171_spill] sm:$0xff] %v6248_v30 }
 0x517   : > { %v6253_v45 = vpop.f32.mrf.mxu2 }
 0x518   : > { %7412 = vst [vmem:[#allocation172_spill] sm:$0xff] %v6253_v45 }
 0x51a   : > { %628 = vperm.xlu0 %4511, %v474_v58   ;;  %v4424_v58 = vld [vmem:[%s7241_s2 + $0x354] sm:$0xf0] }
 0x51b   : > { %v6258_v6 = vpop.f32.mrf.mxu3  ;;  %v4052_v7 = vor.u32 %v4424_v58, %v4051_v17  ;;  %v479_v17 = vld [vmem:[%s7242_s3 + $0xb8] sm:$0xff] }
 0x51c   : > { %7413 = vst [vmem:[#allocation173_spill] sm:$0xff] %v6258_v6  ;;  %v477_v6 = vld [vmem:[%s7242_s3 + $0xa8] sm:$0xff] }
 0x51d   : > { %2292 = vmatmul.bf16.gmra.mxu2 %v4052_v7  ;;  %v475_v7 = vld [vmem:[%s7242_s3 + $0x98] sm:$0xff] }
 0x51e   : > { %623 = vperm.xlu2 %4513, %v473_v49   ;;  %v4450_v49 = vld [vmem:[%s7241_s2 + $0x42c] sm:$0xf] }
 0x51f   : > { %v4168_v30 = vor.u32 %v4450_v49, %v4165_v14  ;;  %v480_v14 = vld [vmem:[%s7242_s3 + $0xc0] sm:$0xff] }
 0x521   : > { %2536 = vmatmul.bf16.gmra.mxu3 %v4168_v30 }
 0x522   : > { %638 = vperm.xlu0 %4511, %v476_v13   ;;  %v6278_v13 = vpop.f32.mrf.mxu2 }
 0x523   : > { %7414 = vst [vmem:[#allocation174_spill] sm:$0xff] %v6278_v13  ;;  %v6283_v58 = vpop.f32.mrf.mxu3 }
 0x524   : > { %7415 = vst [vmem:[#allocation175_spill] sm:$0xff] %v6283_v58 }
 0x526   : > { %643 = vperm.xlu2 %4513, %v477_v6   ;;  %v482_v6 = vld [vmem:[%s7242_s3 + $0xd0] sm:$0xff] }
 0x528   : > { %618 = vperm.xlu1 %4512, %v472_v26   ;;  %v4067_v26 = vld [vmem:[%s7241_s2 + $0x368] sm:$0xf] }
 0x52a   : > { %653 = vperm.xlu0 %4511, %v479_v17   ;;  %v6291_v30 = vpop.f32.mrf.mxu2  ;;  %v4428_v17 = vld [vmem:[%s7241_s2 + $0x374] sm:$0xf0] }
 0x52b   : > { %7416 = vst [vmem:[#allocation176_spill] sm:$0xff] %v6291_v30  ;;  %v6296_v49 = vpop.f32.mrf.mxu3  ;;  %v4068_v58 = vor.u32 %v4428_v17, %v4067_v26  ;;  %v4181_v30 = vld [vmem:[%s7241_s2 + $0x458] sm:$0xf0]  ;;  %v485_v26 = vld [vmem:[%s7242_s3 + $0xe8] sm:$0xff] }
 0x52c   : > { %7417 = vst [vmem:[#allocation177_spill] sm:$0xff] %v6296_v49 }
 0x52d   : > { %2297 = vmatmul.bf16.gmra.mxu2 %v4068_v58  ;;  %v486_v58 = vld [vmem:[%s7242_s3 + $0xf0] sm:$0xff] }
 0x52e   : > { %658 = vperm.xlu2 %4513, %v480_v14   ;;  %v4454_v14 = vld [vmem:[%s7241_s2 + $0x44c] sm:$0xf] }
 0x52f   : > { %v4184_v49 = vor.u32 %v4454_v14, %v4181_v30  ;;  %v481_v30 = vld [vmem:[%s7242_s3 + $0xc8] sm:$0xff]  ;;  %v488_v14 = vld [vmem:[%s7242_s3 + $0x100] sm:$0xff] }
 0x530   : > { %633 = vperm.xlu1 %4512, %v475_v7   ;;  %v483_v7 = vld [vmem:[%s7242_s3 + $0xd8] sm:$0xff] }
 0x531   : > { %2541 = vmatmul.bf16.gmra.mxu3 %v4184_v49 }
 0x532   : > { %668 = vperm.xlu0 %4511, %v482_v6   ;;  %v6316_v6 = vpop.f32.mrf.mxu2 }
 0x533   : > { %7418 = vst [vmem:[#allocation178_spill] sm:$0xff] %v6316_v6  ;;  %v6321_v17 = vpop.f32.mrf.mxu3 }
 0x534   : > { %7419 = vst [vmem:[#allocation179_spill] sm:$0xff] %v6321_v17 }
 0x536   : > { %673 = vperm.xlu2 %4513, %v483_v7   ;;  %v4083_v7 = vld [vmem:[%s7241_s2 + $0x388] sm:$0xf] }
 0x538   : > { %648 = vperm.xlu1 %4512, %v478_v10  }
 0x53a   : > { %683 = vperm.xlu0 %4511, %v485_v26   ;;  %v6329_v49 = vpop.f32.mrf.mxu2  ;;  %v4432_v26 = vld [vmem:[%s7241_s2 + $0x394] sm:$0xf0] }
 0x53b   : > { %7420 = vst [vmem:[#allocation180_spill] sm:$0xff] %v6329_v49  ;;  %v6334_v10 = vpop.f32.mrf.mxu3  ;;  %v4084_v17 = vor.u32 %v4432_v26, %v4083_v7  ;;  %v491_v7 = vld [vmem:[%s7242_s3 + $0x118] sm:$0xff] }
 0x53c   : > { %7421 = vst [vmem:[#allocation181_spill] sm:$0xff] %v6334_v10  ;;  %v489_v10 = vld [vmem:[%s7242_s3 + $0x108] sm:$0xff]  ;;  %v4245_v49 = vld [vmem:[%s7241_s2 + $0x4d8] sm:$0xf0] }
 0x53d   : > { %2302 = vmatmul.bf16.gmra.mxu2 %v4084_v17  ;;  %v492_v17 = vld [vmem:[%s7242_s3 + $0x120] sm:$0xff] }
 0x53e   : > { %688 = vperm.xlu2 %4513, %v486_v58   ;;  %v4458_v58 = vld [vmem:[%s7241_s2 + $0x46c] sm:$0xf] }
 0x540   : > { %663 = vperm.xlu1 %4512, %v481_v30   ;;  %v4197_v30 = vld [vmem:[%s7241_s2 + $0x478] sm:$0xf0] }
 0x541   : > { %v4200_v6 = vor.u32 %v4458_v58, %v4197_v30  ;;  %v487_v58 = vld [vmem:[%s7242_s3 + $0xf8] sm:$0xff]  ;;  %v4462_v30 = vld [vmem:[%s7241_s2 + $0x48c] sm:$0xf] }
 0x542   : > { %698 = vperm.xlu0 %4511, %v488_v14   ;;  %v6354_v14 = vpop.f32.mrf.mxu2 }
 0x543   : > { %2546 = vmatmul.bf16.gmra.mxu3 %v4200_v6  ;;  %7422 = vst [vmem:[#allocation182_spill] sm:$0xff] %v6354_v14  ;;  %v6359_v26 = vpop.f32.mrf.mxu3  ;;  %v490_v14 = vld [vmem:[%s7242_s3 + $0x110] sm:$0xff] }
 0x544   : > { %7423 = vst [vmem:[#allocation183_spill] sm:$0xff] %v6359_v26 }
 0x546   : > { %703 = vperm.xlu2 %4513, %v489_v10   ;;  %v494_v10 = vld [vmem:[%s7242_s3 + $0x130] sm:$0xff] }
 0x548   : > { %678 = vperm.xlu1 %4512, %v484_v1  }
 0x54a   : > { %713 = vperm.xlu0 %4511, %v491_v7   ;;  %v6367_v6 = vpop.f32.mrf.mxu2  ;;  %v4213_v7 = vld [vmem:[%s7241_s2 + $0x498] sm:$0xf0] }
 0x54b   : > { %7424 = vst [vmem:[#allocation184_spill] sm:$0xff] %v6367_v6  ;;  %v6372_v1 = vpop.f32.mrf.mxu3  ;;  %v4216_v26 = vor.u32 %v4462_v30, %v4213_v7  ;;  %v497_v30 = vld [vmem:[%s7242_s3 + $0x148] sm:$0xff] }
 0x54c   : > { %7425 = vst [vmem:[#allocation185_spill] sm:$0xff] %v6372_v1 }
 0x54e   : > { %718 = vperm.xlu2 %4513, %v492_v17   ;;  %v495_v17 = vld [vmem:[%s7242_s3 + $0x138] sm:$0xff] }
 0x550   : > { %693 = vperm.xlu1 %4512, %v487_v58   ;;  %v4099_v58 = vld [vmem:[%s7241_s2 + $0x3a8] sm:$0xf] }
 0x552   : > { %728 = vperm.xlu0 %4511, %v494_v10   ;;  %v4436_v10 = vld [vmem:[%s7241_s2 + $0x3b4] sm:$0xf0]  ;;  %v6392_v6 = vpop.f32.mrf.mxu2 }
 0x553   : > { %v4100_v1 = vor.u32 %v4436_v10, %v4099_v58  ;;  %2551 = vmatmul.bf16.gmra.mxu3 %v4216_v26  ;;  %7426 = vst [vmem:[#allocation186_spill] sm:$0xff] %v6392_v6  ;;  %v6397_v7 = vpop.f32.mrf.mxu3  ;;  %v498_v58 = vld [vmem:[%s7242_s3 + $0x150] sm:$0xff]  ;;  %v493_v26 = vld [vmem:[%s7242_s3 + $0x128] sm:$0xff] }
 0x554   : > { %7427 = vst [vmem:[#allocation187_spill] sm:$0xff] %v6397_v7  ;;  %v501_v10 = vld [vmem:[%s7242_s3 + $0x168] sm:$0xff] }
 0x555   : > { %2307 = vmatmul.bf16.gmra.mxu2 %v4100_v1  ;;  %v500_v1 = vld [vmem:[%s7242_s3 + $0x160] sm:$0xff] }
 0x556   : > { %733 = vperm.xlu2 %4513, %v495_v17  }
 0x558   : > { %708 = vperm.xlu1 %4512, %v490_v14  }
 0x55a   : > { %743 = vperm.xlu0 %4511, %v497_v30   ;;  %v6408_v17 = vpop.f32.mrf.mxu2  ;;  %v4466_v30 = vld [vmem:[%s7241_s2 + $0x4ac] sm:$0xf] }
 0x55b   : > { %7428 = vst [vmem:[#allocation188_spill] sm:$0xff] %v6408_v17  ;;  %v6410_v14 = vpop.f32.mrf.mxu3 }
 0x55c   : > { %7429 = vst [vmem:[#allocation189_spill] sm:$0xff] %v6410_v14  ;;  %v6427_v14 = vpop.xlane.xlu2 %2863 }
 0x55e   : > { %748 = vperm.xlu2 %4513, %v498_v58   ;;  %v4229_v58 = vld [vmem:[%s7241_s2 + $0x4b8] sm:$0xf0] }
 0x55f   : > { %v4232_v7 = vor.u32 %v4466_v30, %v4229_v58  ;;  %v504_v30 = vld [vmem:[%s7242_s3 + $0x180] sm:$0xff] }
 0x560   : > { %723 = vperm.xlu1 %4512, %v493_v26   ;;  %v496_v26 = vld [vmem:[%s7242_s3 + $0x140] sm:$0xff] }
 0x562   : > { %758 = vperm.xlu0 %4511, %v500_v1   ;;  %v503_v1 = vld [vmem:[%s7242_s3 + $0x178] sm:$0xff]  ;;  %v6429_v17 = vpop.f32.mrf.mxu2 }
 0x563   : > { %2556 = vmatmul.bf16.gmra.mxu3 %v4232_v7  ;;  %7430 = vst [vmem:[#allocation190_spill] sm:$0xff] %v6429_v17  ;;  %v6433_v45 = vpop.f32.mrf.mxu3  ;;  %v499_v7 = vld [vmem:[%s7242_s3 + $0x158] sm:$0xff] }
 0x564   : > { %7431 = vst [vmem:[#allocation191_spill] sm:$0xff] %v6433_v45 }
 0x566   : > { %763 = vperm.xlu2 %4513, %v501_v10   ;;  %v506_v10 = vld [vmem:[%s7242_s3 + $0x190] sm:$0xff] }
 0x568   : > { %738 = vperm.xlu1 %4512, %v496_v26  }
 0x569   : > { %v6431_v6 = vpop.xlane.xlu0 %2869 }
 0x56a   : > { %773 = vperm.xlu0 %4511, %v503_v1   ;;  %v507_v1 = vld [vmem:[%s7242_s3 + $0x198] sm:$0xff]  ;;  %v6449_v45 = vpop.f32.mrf.mxu2 }
 0x56b   : > { %v6444_v17 = vpop.f32.mrf.mxu3  ;;  %7433 = vst [vmem:[#allocation193_spill] sm:$0xff] %v6449_v45 }
 0x56c   : > { %7432 = vst [vmem:[#allocation192_spill] sm:$0xff] %v6444_v17  ;;  %v509_v17 = vld [vmem:[%s7242_s3 + $0x1a8] sm:$0xff] }
 0x56e   : > { %778 = vperm.xlu2 %4513, %v504_v30   ;;  %v4470_v30 = vld [vmem:[%s7241_s2 + $0x4cc] sm:$0xf] }
 0x570   : > { %753 = vperm.xlu1 %4512, %v499_v7   ;;  %v4248_v7 = vor.u32 %v4470_v30, %v4245_v49  ;;  %v510_v49 = vld [vmem:[%s7242_s3 + $0x1b0] sm:$0xff] }
 0x571   : > { %v2885_v58 = vpop.xlane.xlu0 %2884  ;;  %v2879_v26 = vpop.xlane.xlu2 %2878 }
 0x572   : > { %788 = vperm.xlu0 %4511, %v506_v10   ;;  %4530 = vrcp.f32 %v2885_v58  ;;  %v502_v10 = vld [vmem:[%s7242_s3 + $0x170] sm:$0xff] }
 0x573   : > { %2561 = vmatmul.bf16.gmra.mxu3 %v4248_v7  ;;  %v6463_v63 = vpop.f32.mrf.mxu3  ;;  %4532 = vrcp.f32 %v2879_v26  ;;  %v6471_v7 = vpop.f32.mrf.mxu2 }
 0x574   : > { %7434 = vst [vmem:[#allocation194_spill] sm:$0xff] %v6463_v63 }
 0x575   : > { %7435 = vst [vmem:[#allocation195_spill] sm:$0xff] %v6471_v7 }
 0x576   : > { %793 = vperm.xlu2 %4513, %v507_v1   ;;  %v505_v1 = vld [vmem:[%s7242_s3 + $0x188] sm:$0xff] }
 0x578   : > { %768 = vperm.xlu1 %4512, %v502_v10   ;;  %v4531_v50 = vpop.eup %4530 }
 0x579   : > { %v2882_v45 = vpop.xlane.xlu2 %2881  ;;  %v2901_v30 = vmul.f32 %v4531_v50, %v2885_v58  ;;  %v4533_v10 = vpop.eup %4532 }
 0x57a   : > { %v2873_v13 = vpop.xlane.xlu1 %2872  ;;  %803 = vperm.xlu0 %4511, %v509_v17   ;;  %4534 = vrcp.f32 %v2882_v45  ;;  %v512_v17 = vld [vmem:[%s7242_s3 + $0x1c0] sm:$0xff]  ;;  %v2899_v61 = vmul.f32 %v4533_v10, %v2879_v26  ;;  %v2867_v21 = vpop.xlane.xlu0 %2866  ;;  %v515_v26 = vld [vmem:[%s7242_s3 + $0x1d8] sm:$0xff] }
 0x57b   : > { %4536 = vrcp.f32 %v2873_v13  ;;  %v2909_v63 = vsub.f32 2.0, %v2901_v30  ;;  %v6478_v25 = vpop.f32.mrf.mxu3  ;;  %v4474_v30 = vld [vmem:[%s7241_s2 + $0x4ec] sm:$0xf]  ;;  %v6497_v57 = vpop.f32.mrf.mxu2 }
 0x57c   : > { %4538 = vrcp.f32 %v6431_v6  ;;  %7436 = vst [vmem:[#allocation196_spill] sm:$0xff] %v6478_v25  ;;  %v508_v25 = vld [vmem:[%s7242_s3 + $0x1a0] sm:$0xff] }
 0x57e   : > { %808 = vperm.xlu2 %4513, %v510_v49   ;;  %v513_v49 = vld [vmem:[%s7242_s3 + $0x1c8] sm:$0xff] }
 0x580   : > { %783 = vperm.xlu1 %4512, %v505_v1   ;;  %v4535_v11 = vpop.eup %4534  ;;  %v4261_v1 = vld [vmem:[%s7241_s2 + $0x4f8] sm:$0xf0] }
 0x581   : > { %v624_v28 = vpop.permute.xlu2 %623  ;;  %v2900_v7 = vmul.f32 %v4535_v11, %v2882_v45  ;;  %v4537_v48 = vpop.eup %4536 }
 0x582   : > { %v2876_v58 = vpop.xlane.xlu1 %2875  ;;  %v1788_v8 = vadd.f32 %v4941_v32, %v624_v28  ;;  %818 = vperm.xlu0 %4511, %v512_v17   ;;  %v4264_v28 = vor.u32 %v4474_v30, %v4261_v1  ;;  %v2917_v17 = vmul.f32 %v4531_v50, %v2909_v63 }
 0x583   : > { %4540 = vrcp.f32 %v2876_v58  ;;  %v2908_v45 = vsub.f32 2.0, %v2900_v7  ;;  %v2897_v7 = vmul.f32 %v4537_v48, %v2873_v13 }
 0x584   : > { %v1997_v32 = vadd.f32 %v5272_v56, %v1788_v8  ;;  %2566 = vmatmul.bf16.gmra.mxu3 %v4264_v28  ;;  %v4539_v8 = vpop.eup %4538  ;;  %v2907_v56 = vsub.f32 2.0, %v2899_v61  ;;  %4542 = vrcp.f32 %v2867_v21  ;;  %v6505_v61 = vpop.f32.mrf.mxu3  ;;  %v511_v28 = vld [vmem:[%s7242_s3 + $0x1b8] sm:$0xff] }
 0x585   : > { %v2916_v44 = vmul.f32 %v4535_v11, %v2908_v45  ;;  %4544 = vrcp.f32 %v6427_v14 }
 0x586   : > { %v2206_v51 = vadd.f32 %v5786_v43, %v1997_v32  ;;  %823 = vperm.xlu2 %4513, %v513_v49   ;;  %v2925_v49 = vmul.f32 %v6180_v59, %v2917_v17 }
 0x587   : > { %v2924_v43 = vmul.f32 %v6201_v0, %v2916_v44  ;;  %v2915_v44 = vmul.f32 %v4533_v10, %v2907_v56 }
 0x588   : > { %v2415_v50 = vadd.f32 %v5900_v18, %v2206_v51  ;;  %798 = vperm.xlu1 %4512, %v508_v25   ;;  %v2896_v51 = vmul.f32 %v4539_v8, %v6431_v6  ;;  %v516_v18 = vld [vmem:[%s7242_s3 + $0x1e0] sm:$0xff] }
 0x589   : > { %v4541_v63 = vpop.eup %4540  ;;  %v644_v30 = vpop.permute.xlu2 %643  ;;  %v2929_v25 = vpack.c.bf16 %v2925_v49, %v2924_v43 }
 0x58a   : > { %v2898_v11 = vmul.f32 %v4541_v63, %v2876_v58  ;;  %2590 = vst.msk [vmem:[#allocation2 + $0x88] sm:$0xff] %vm2572_vm0, %v2415_v50  ;;  %v1798_v1 = vadd.f32 %v4973_v55, %v644_v30  ;;  %833 = vperm.xlu0 %4511, %v515_v26   ;;  %v2905_v58 = vsub.f32 2.0, %v2897_v7  ;;  %v4543_v6 = vpop.eup %4542  ;;  %v2904_v10 = vsub.f32 2.0, %v2896_v51  ;;  %v6526_v49 = vpop.f32.mrf.mxu2 }
 0x58b   : > { %v3132_v55 = vsel %vm2572_vm0, %v2929_v25, 0  ;;  %v2923_v7 = vmul.f32 %v6183_v37, %v2915_v44  ;;  %v521_v44 = vld [vmem:[%s7242_s3 + $0x208] sm:$0xff] }
 0x58c   : > { %v2906_v0 = vsub.f32 2.0, %v2898_v11  ;;  %v2007_v59 = vadd.f32 %v5336_v36, %v1798_v1  ;;  %v629_v13 = vpop.permute.xlu0 %628  ;;  %3138 = vmatpush.bf16.xpose.msrb.mxu2 %v3132_v55  ;;  %v518_v36 = vld [vmem:[%s7242_s3 + $0x1f0] sm:$0xff]  ;;  %v2913_v30 = vmul.f32 %v4537_v48, %v2905_v58  ;;  %v6530_v1 = vpop.f32.mrf.mxu3 }
 0x58d   : > { %v1791_v32 = vadd.f32 %v4951_v40, %v629_v13  ;;  %v4545_v40 = vpop.eup %4544 }
 0x58e   : > { %v2914_v17 = vmul.f32 %v4541_v63, %v2906_v0  ;;  %v2216_v45 = vadd.f32 %v5814_v62, %v2007_v59  ;;  %838 = vperm.xlu2 %4513, %v516_v18   ;;  %v2895_v63 = vmul.f32 %v4543_v6, %v2867_v21  ;;  %v519_v21 = vld [vmem:[%s7242_s3 + $0x1f8] sm:$0xff] }
 0x58f   : > { %v2000_v26 = vadd.f32 %v5288_v2, %v1791_v32 }
 0x590   : > { %v2425_v56 = vadd.f32 %v5928_v31, %v2216_v45  ;;  %813 = vperm.xlu1 %4512, %v511_v28   ;;  %v2922_v50 = vmul.f32 %v6223_v20, %v2914_v17  ;;  %v2894_v31 = vmul.f32 %v4545_v40, %v6427_v14  ;;  %v2912_v20 = vmul.f32 %v4539_v8, %v2904_v10  ;;  %v514_v14 = vld [vmem:[%s7242_s3 + $0x1d0] sm:$0xff] }
 0x591   : > { %v2209_v62 = vadd.f32 %v5796_v52, %v2000_v26  ;;  %v659_v43 = vpop.permute.xlu2 %658  ;;  %v2903_v25 = vsub.f32 2.0, %v2895_v63 }
 0x592   : > { %2594 = vst.msk [vmem:[#allocation2 + $0xa8] sm:$0xff] %vm2572_vm0, %v2425_v56  ;;  %v1806_v2 = vadd.f32 %v5009_v9, %v659_v43  ;;  %848 = vperm.xlu0 %4511, %v518_v36   ;;  %v2928_v11 = vpack.c.bf16 %v2923_v7, %v2922_v50  ;;  %v2902_v18 = vsub.f32 2.0, %v2894_v31  ;;  %v2920_v0 = vmul.f32 %v6171_v12, %v2912_v20  ;;  %v7437_v7 = vld [vmem:[#allocation139_spill] sm:$0xff] }
 0x593   : > { %v2418_v37 = vadd.f32 %v5910_v53, %v2209_v62  ;;  %v2921_v53 = vmul.f32 %v6211_v38, %v2913_v30  ;;  %v2911_v59 = vmul.f32 %v4543_v6, %v2903_v25 }
 0x594   : > { %v2015_v48 = vadd.f32 %v5378_v35, %v1806_v2  ;;  %v639_v52 = vpop.permute.xlu0 %638  ;;  %v3129_v51 = vsel %vm2572_vm0, %v2928_v11, 0  ;;  %v2910_v55 = vmul.f32 %v4545_v40, %v2902_v18  ;;  %v7440_v2 = vld [vmem:[#allocation44_spill] sm:$0xff]  ;;  %v7441_v11 = vld [vmem:[#allocation19_spill] sm:$0xff] }
 0x595   : > { %2591 = vst.msk [vmem:[#allocation2 + $0x90] sm:$0xff] %vm2572_vm0, %v2418_v37  ;;  %v1796_v9 = vadd.f32 %v4969_v54, %v639_v52  ;;  %3139 = vmatpush.bf16.xpose.msrb.mxu2 %v3129_v51  ;;  %v2927_v58 = vpack.c.bf16 %v2921_v53, %v2920_v0  ;;  %v520_v37 = vld [vmem:[%s7242_s3 + $0x200] sm:$0xff]  ;;  %v7443_v51 = vld [vmem:[#allocation117_spill] sm:$0xff]  ;;  %v527_v53 = vld [vmem:[%s7242_s3 + $0x238] sm:$0xff] }
 0x596   : > { %v2224_v8 = vadd.f32 %v6100_v4, %v2015_v48  ;;  %853 = vperm.xlu2 %4513, %v519_v21   ;;  %v7442_v48 = vld [vmem:[#allocation162_spill] sm:$0xff]  ;;  %v7447_v0 = vld [vmem:[#allocation155_spill] sm:$0xff] }
 0x597   : > { %v2005_v35 = vadd.f32 %v5318_v46, %v1796_v9  ;;  %v6555_v46 = vpop.f32.mrf.mxu3  ;;  %v3126_v10 = vsel %vm2572_vm0, %v2927_v58, 0  ;;  %v7444_v9 = vld [vmem:[#allocation61_spill] sm:$0xff] }
 0x598   : > { %v2433_v54 = vadd.f32 %v5964_v41, %v2224_v8  ;;  %828 = vperm.xlu1 %4512, %v514_v14   ;;  %v522_v41 = vld [vmem:[%s7242_s3 + $0x210] sm:$0xff]  ;;  %v7445_v8 = vld [vmem:[#allocation144_spill] sm:$0xff] }
 0x599   : > { %v2214_v13 = vadd.f32 %v5810_v3, %v2005_v35  ;;  %v674_v38 = vpop.permute.xlu2 %673  ;;  %v6562_v3 = vpop.f32.mrf.mxu2  ;;  %v7446_v35 = vld [vmem:[#allocation136_spill] sm:$0xff] }
 0x59a   : > { %2597 = vst.msk [vmem:[#allocation2 + $0xc0] sm:$0xff] %vm2572_vm0, %v2433_v54  ;;  %v619_v4 = vpop.permute.xlu1 %618  ;;  %v1813_v32 = vadd.f32 %v5044_v15, %v674_v38  ;;  %863 = vperm.xlu0 %4511, %v521_v44   ;;  %v7448_v38 = vld [vmem:[#allocation24_spill] sm:$0xff] }
 0x59b   : > { %v2423_v28 = vadd.f32 %v5924_v47, %v2214_v13  ;;  %v1786_v12 = vadd.f32 %v4937_v29, %v619_v4  ;;  %v517_v29 = vld [vmem:[%s7242_s3 + $0x1e8] sm:$0xff]  ;;  %v2919_v47 = vmul.f32 %v6203_v33, %v2911_v59 }
 0x59c   : > { %v2022_v6 = vadd.f32 %v5426_v60, %v1813_v32  ;;  %v654_v17 = vpop.permute.xlu0 %653  ;;  %v2931_v32 = vld [vmem:[#allocation2 + $0x88] sm:$0xff] }
 0x59d   : > { %2593 = vst.msk [vmem:[#allocation2 + $0xa0] sm:$0xff] %vm2572_vm0, %v2423_v28  ;;  %v1995_v15 = vadd.f32 %v5250_v23, %v1786_v12  ;;  %v1803_v45 = vadd.f32 %v4994_v34, %v654_v17  ;;  %3140 = vmatpush.bf16.xpose.msrb.mxu2 %v3126_v10  ;;  %v524_v34 = vld [vmem:[%s7242_s3 + $0x220] sm:$0xff]  ;;  %v2918_v23 = vmul.f32 %v6143_v16, %v2910_v55  ;;  %v7449_v55 = vld [vmem:[#allocation141_spill] sm:$0xff] }
 0x59e   : > { %v2231_v26 = vadd.f32 %v6127_v5, %v2022_v6  ;;  %868 = vperm.xlu2 %4513, %v522_v41   ;;  %v7438_v16 = vld [vmem:[#allocation16_spill] sm:$0xff]  ;;  %v7450_v12 = vld [vmem:[#allocation17_spill] sm:$0xff] }
 0x59f   : > { %v2204_v60 = vadd.f32 %v5775_v19, %v1995_v15  ;;  %v2012_v36 = vadd.f32 %v5366_v27, %v1803_v45  ;;  %v2926_v50 = vpack.c.bf16 %v2919_v47, %v2918_v23  ;;  %v528_v17 = vld [vmem:[%s7242_s3 + $0x240] sm:$0xff] }
 0x5a0   : > { %v2440_v40 = vadd.f32 %v6006_v39, %v2231_v26  ;;  %843 = vperm.xlu1 %4512, %v517_v29   ;;  %v6591_v39 = vpop.f32.mrf.mxu3  ;;  %v7451_v15 = vld [vmem:[#allocation80_spill] sm:$0xff]  ;;  %v7452_v29 = vld [vmem:[#allocation51_spill] sm:$0xff]  ;;  %v7453_v26 = vld [vmem:[#allocation21_spill] sm:$0xff] }
 0x5a1   : > { %v2413_v56 = vadd.f32 %v5896_v22, %v2204_v60  ;;  %v2221_v33 = vadd.f32 %v5828_v42, %v2012_v36  ;;  %v689_v5 = vpop.permute.xlu2 %688  ;;  %v525_v22 = vld [vmem:[%s7242_s3 + $0x228] sm:$0xff]  ;;  %v7439_v42 = vld [vmem:[#allocation72_spill] sm:$0xff]  ;;  %v3123_v20 = vsel %vm2572_vm0, %v2926_v50, 0  ;;  %v6601_v21 = vpop.f32.mrf.mxu2  ;;  %v523_v36 = vld [vmem:[%s7242_s3 + $0x218] sm:$0xff] }
 0x5a2   : > { %2600 = vst.msk [vmem:[#allocation2 + $0xd8] sm:$0xff] %vm2572_vm0, %v2440_v40  ;;  %v634_v19 = vpop.permute.xlu1 %633  ;;  %v1821_v27 = vadd.f32 %v5074_v24, %v689_v5  ;;  %878 = vperm.xlu0 %4511, %v524_v34   ;;  %v7454_v23 = vld [vmem:[#allocation168_spill] sm:$0xff]  ;;  %v7456_v5 = vld [vmem:[#allocation69_spill] sm:$0xff] }
 0x5a3   : > { %2589 = vst.msk [vmem:[#allocation2 + $0x80] sm:$0xff] %vm2572_vm0, %v2413_v56  ;;  %v2430_v63 = vadd.f32 %v7437_v7, %v2221_v33  ;;  %v1793_v30 = vadd.f32 %v7438_v16, %v634_v19  ;;  %v7455_v56 = vld [vmem:[#allocation121_spill] sm:$0xff]  ;;  %v530_v19 = vld [vmem:[%s7242_s3 + $0x250] sm:$0xff]  ;;  %v7457_v7 = vld [vmem:[#allocation147_spill] sm:$0xff] }
 0x5a4   : > { %v2030_v62 = vadd.f32 %v7439_v42, %v1821_v27  ;;  %v669_v43 = vpop.permute.xlu0 %668  ;;  %v7458_v16 = vld [vmem:[#allocation138_spill] sm:$0xff] }
 0x5a5   : > { %2596 = vst.msk [vmem:[#allocation2 + $0xb8] sm:$0xff] %vm2572_vm0, %v2430_v63  ;;  %v2002_v24 = vadd.f32 %v7440_v2, %v1793_v30  ;;  %v1811_v31 = vadd.f32 %v7441_v11, %v669_v43  ;;  %3141 = vmatpush.bf16.xpose.msrb.mxu2 %v3123_v20  ;;  %v7460_v2 = vld [vmem:[#allocation27_spill] sm:$0xff]  ;;  %v7462_v20 = vld [vmem:[#allocation18_spill] sm:$0xff] }
 0x5a6   : > { %v2239_v52 = vadd.f32 %v7442_v48, %v2030_v62  ;;  %883 = vperm.xlu2 %4513, %v525_v22   ;;  %v7459_v22 = vld [vmem:[#allocation160_spill] sm:$0xff]  ;;  %v7461_v11 = vld [vmem:[#allocation143_spill] sm:$0xff] }
 0x5a7   : > { %v2211_v25 = vadd.f32 %v7443_v51, %v2002_v24  ;;  %v2020_v14 = vadd.f32 %v7444_v9, %v1811_v31  ;;  %v531_v48 = vld [vmem:[%s7242_s3 + $0x258] sm:$0xff]  ;;  %v7464_v9 = vld [vmem:[#allocation58_spill] sm:$0xff] }
 0x5a8   : > { %v2448_v18 = vadd.f32 %v7445_v8, %v2239_v52  ;;  %858 = vperm.xlu1 %4512, %v520_v37   ;;  %v6628_v34 = vpop.f32.mrf.mxu3  ;;  %v7463_v52 = vld [vmem:[#allocation88_spill] sm:$0xff] }
 0x5a9   : > { %v2420_v44 = vadd.f32 %v7446_v35, %v2211_v25  ;;  %v2229_v54 = vadd.f32 %v7447_v0, %v2020_v14  ;;  %v704_v59 = vpop.permute.xlu2 %703  ;;  %v6636_v27 = vpop.f32.mrf.mxu2  ;;  %v7466_v35 = vld [vmem:[#allocation174_spill] sm:$0xff]  ;;  %v7467_v0 = vld [vmem:[#allocation153_spill] sm:$0xff] }
 0x5aa   : > { %2603 = vst.msk [vmem:[#allocation2 + $0xf0] sm:$0xff] %vm2572_vm0, %v2448_v18  ;;  %v649_v13 = vpop.permute.xlu1 %648  ;;  %v1828_v58 = vadd.f32 %v7448_v38, %v704_v59  ;;  %893 = vperm.xlu0 %4511, %v527_v53   ;;  %v2930_v4 = vld [vmem:[#allocation2 + $0x80] sm:$0xff]  ;;  %v7465_v53 = vld [vmem:[#allocation23_spill] sm:$0xff]  ;;  %v526_v18 = vld [vmem:[%s7242_s3 + $0x230] sm:$0xff] }
 0x5ab   : > { %2592 = vst.msk [vmem:[#allocation2 + $0x98] sm:$0xff] %vm2572_vm0, %v2420_v44  ;;  %v2438_v28 = vadd.f32 %v7449_v55, %v2229_v54  ;;  %v1801_v41 = vadd.f32 %v7450_v12, %v649_v13  ;;  %v2994_v6 = vpack.c.bf16 %v2931_v32, %v2930_v4  ;;  %v7468_v59 = vld [vmem:[#allocation77_spill] sm:$0xff]  ;;  %v7469_v4 = vld [vmem:[#allocation150_spill] sm:$0xff] }
 0x5ac   : > { %v2037_v45 = vadd.f32 %v7451_v15, %v1828_v58  ;;  %v684_v10 = vpop.permute.xlu0 %683  ;;  %v533_v38 = vld [vmem:[%s7242_s3 + $0x268] sm:$0xff] }
 0x5ad   : > { %2599 = vst.msk [vmem:[#allocation2 + $0xd0] sm:$0xff] %vm2572_vm0, %v2438_v28  ;;  %v2010_v47 = vadd.f32 %v7452_v29, %v1801_v41  ;;  %v1818_v60 = vadd.f32 %v7453_v26, %v684_v10  ;;  %4281 = vmatmul.msk.bf16.vlgmr.msrb.gmra.mxu2 %vm2572_vm0, %v2994_v6  ;;  %v7470_v28 = vld [vmem:[#allocation140_spill] sm:$0xff]  ;;  %v7471_v41 = vld [vmem:[#allocation166_spill] sm:$0xff] }
 0x5ae   : > { %v2246_v40 = vadd.f32 %v7454_v23, %v2037_v45  ;;  %898 = vperm.xlu2 %4513, %v528_v17   ;;  %v7472_v10 = vld [vmem:[#allocation30_spill] sm:$0xff] }
 0x5af   : > { %v2219_v33 = vadd.f32 %v7455_v56, %v2010_v47  ;;  %v2027_v50 = vadd.f32 %v7456_v5, %v1818_v60  ;;  %v2932_v47 = vld [vmem:[#allocation2 + $0x90] sm:$0xff] }
 0x5b0   : > { %v2455_v63 = vadd.f32 %v7457_v7, %v2246_v40  ;;  %873 = vperm.xlu1 %4512, %v523_v36   ;;  %v6662_v58 = vpop.f32.mrf.mxu3  ;;  %v7473_v26 = vld [vmem:[#allocation146_spill] sm:$0xff]  ;;  %v7474_v36 = vld [vmem:[#allocation20_spill] sm:$0xff] }
 0x5b1   : > { %v2428_v30 = vadd.f32 %v7458_v16, %v2219_v33  ;;  %v2236_v42 = vadd.f32 %v7459_v22, %v2027_v50  ;;  %v719_v62 = vpop.permute.xlu2 %718  ;;  %v6667_v15 = vpop.f32.mrf.mxu2  ;;  %v534_v56 = vld [vmem:[%s7242_s3 + $0x270] sm:$0xff]  ;;  %v7478_v22 = vld [vmem:[#allocation180_spill] sm:$0xff] }
 0x5b2   : > { %2606 = vst.msk [vmem:[#allocation2 + $0x108] sm:$0xff] %vm2572_vm0, %v2455_v63  ;;  %v664_v43 = vpop.permute.xlu1 %663  ;;  %v1836_v24 = vadd.f32 %v7460_v2, %v719_v62  ;;  %908 = vperm.xlu0 %4511, %v530_v19   ;;  %v2933_v55 = vld [vmem:[#allocation2 + $0x98] sm:$0xff]  ;;  %v7475_v33 = vld [vmem:[#allocation94_spill] sm:$0xff] }
 0x5b3   : > { %2595 = vst.msk [vmem:[#allocation2 + $0xb0] sm:$0xff] %vm2572_vm0, %v2428_v30  ;;  %v2445_v31 = vadd.f32 %v7461_v11, %v2236_v42  ;;  %v1808_v37 = vadd.f32 %v7462_v20, %v664_v43  ;;  %v2995_v40 = vpack.c.bf16 %v2933_v55, %v2932_v47  ;;  %v7476_v19 = vld [vmem:[#allocation66_spill] sm:$0xff]  ;;  %v529_v30 = vld [vmem:[%s7242_s3 + $0x248] sm:$0xff] }
 0x5b4   : > { %v2045_v51 = vadd.f32 %v7463_v52, %v1836_v24  ;;  %v699_v25 = vpop.permute.xlu0 %698  ;;  %v7477_v63 = vld [vmem:[#allocation26_spill] sm:$0xff] }
 0x5b5   : > { %2602 = vst.msk [vmem:[#allocation2 + $0xe8] sm:$0xff] %vm2572_vm0, %v2445_v31  ;;  %v2017_v14 = vadd.f32 %v7464_v9, %v1808_v37  ;;  %v1826_v8 = vadd.f32 %v7465_v53, %v699_v25  ;;  %v7479_v62 = vld [vmem:[#allocation158_spill] sm:$0xff] }
 0x5b6   : > { %v2254_v44 = vadd.f32 %v7466_v35, %v2045_v51  ;;  %913 = vperm.xlu2 %4513, %v531_v48   ;;  %v7480_v2 = vld [vmem:[#allocation86_spill] sm:$0xff]  ;;  %v7483_v48 = vld [vmem:[#allocation172_spill] sm:$0xff] }
 0x5b7   : > { %v2226_v54 = vadd.f32 %v7467_v0, %v2017_v14  ;;  %v2035_v13 = vadd.f32 %v7468_v59, %v1826_v8  ;;  %v7481_v11 = vld [vmem:[#allocation154_spill] sm:$0xff]  ;;  %v7484_v14 = vld [vmem:[#allocation33_spill] sm:$0xff] }
 0x5b8   : > { %v2463_v32 = vadd.f32 %v7469_v4, %v2254_v44  ;;  %888 = vperm.xlu1 %4512, %v526_v18   ;;  %v7482_v20 = vld [vmem:[#allocation142_spill] sm:$0xff]  ;;  %v6691_v25 = vpop.f32.mrf.mxu3  ;;  %v7485_v8 = vld [vmem:[#allocation149_spill] sm:$0xff] }
 0x5b9   : > { %v2435_v12 = vadd.f32 %v7470_v28, %v2226_v54  ;;  %v2244_v6 = vadd.f32 %v7471_v41, %v2035_v13  ;;  %v734_v17 = vpop.permute.xlu2 %733  ;;  %v7486_v35 = vld [vmem:[#allocation22_spill] sm:$0xff]  ;;  %v6698_v0 = vpop.f32.mrf.mxu2  ;;  %v7487_v54 = vld [vmem:[#allocation97_spill] sm:$0xff]  ;;  %v532_v28 = vld [vmem:[%s7242_s3 + $0x260] sm:$0xff] }
 0x5ba   : > { %2609 = vst.msk [vmem:[#allocation2 + $0x120] sm:$0xff] %vm2572_vm0, %v2463_v32  ;;  %v679_v45 = vpop.permute.xlu1 %678  ;;  %v1843_v29 = vadd.f32 %v7472_v10, %v734_v17  ;;  %923 = vperm.xlu0 %4511, %v533_v38   ;;  %v7488_v38 = vld [vmem:[#allocation75_spill] sm:$0xff]  ;;  %v7489_v32 = vld [vmem:[#allocation29_spill] sm:$0xff] }
 0x5bb   : > { %2598 = vst.msk [vmem:[#allocation2 + $0xc8] sm:$0xff] %vm2572_vm0, %v2435_v12  ;;  %v2453_v60 = vadd.f32 %v7473_v26, %v2244_v6  ;;  %v1816_v23 = vadd.f32 %v7474_v36, %v679_v45  ;;  %v7490_v12 = vld [vmem:[#allocation186_spill] sm:$0xff]  ;;  %v7491_v6 = vld [vmem:[#allocation164_spill] sm:$0xff] }
 0x5bc   : > { %v2052_v5 = vadd.f32 %v7475_v33, %v1843_v29  ;;  %v714_v50 = vpop.permute.xlu0 %713  ;;  %v7492_v45 = vld [vmem:[#allocation92_spill] sm:$0xff]  ;;  %v7493_v29 = vld [vmem:[#allocation159_spill] sm:$0xff] }
 0x5bd   : > { %2605 = vst.msk [vmem:[#allocation2 + $0x100] sm:$0xff] %vm2572_vm0, %v2453_v60  ;;  %v2025_v7 = vadd.f32 %v7476_v19, %v1816_v23  ;;  %v1833_v16 = vadd.f32 %v7477_v63, %v714_v50  ;;  %4282 = vmatmul.msk.bf16.gmra.mxu2 %vm2572_vm0, %v2995_v40  ;;  %v2934_v26 = vld [vmem:[#allocation2 + $0xa0] sm:$0xff]  ;;  %v7494_v60 = vld [vmem:[#allocation145_spill] sm:$0xff]  ;;  %v7495_v23 = vld [vmem:[#allocation178_spill] sm:$0xff] }
 0x5be   : > { %v2261_v42 = vadd.f32 %v7478_v22, %v2052_v5  ;;  %928 = vperm.xlu2 %4513, %v534_v56   ;;  %v7496_v5 = vld [vmem:[#allocation38_spill] sm:$0xff]  ;;  %v2935_v19 = vld [vmem:[#allocation2 + $0xa8] sm:$0xff] }
 0x5bf   : > { %v2234_v43 = vadd.f32 %v7479_v62, %v2025_v7  ;;  %v2042_v24 = vadd.f32 %v7480_v2, %v1833_v16  ;;  %v7497_v7 = vld [vmem:[#allocation152_spill] sm:$0xff]  ;;  %v7498_v16 = vld [vmem:[#allocation25_spill] sm:$0xff]  ;;  %v2996_v22 = vpack.c.bf16 %v2935_v19, %v2934_v26  ;;  %v7516_v19 = vld [vmem:[#allocation171_spill] sm:$0xff] }
 0x5c0   : > { %v2470_v31 = vadd.f32 %v7481_v11, %v2261_v42  ;;  %903 = vperm.xlu1 %4512, %v529_v30   ;;  %v6718_v42 = vpop.f32.mrf.mxu3  ;;  %v7499_v62 = vld [vmem:[#allocation100_spill] sm:$0xff] }
 0x5c1   : > { %v2443_v37 = vadd.f32 %v7482_v20, %v2234_v43  ;;  %v2251_v52 = vadd.f32 %v7483_v48, %v2042_v24  ;;  %v749_v51 = vpop.permute.xlu2 %748  ;;  %v7500_v24 = vld [vmem:[#allocation83_spill] sm:$0xff]  ;;  %v6728_v48 = vpop.f32.mrf.mxu2  ;;  %v7513_v26 = vld [vmem:[#allocation36_spill] sm:$0xff] }
 0x5c2   : > { %2612 = vst.msk [vmem:[#allocation2 + $0x138] sm:$0xff] %vm2572_vm0, %v2470_v31  ;;  %v694_v9 = vpop.permute.xlu1 %693  ;;  %v1851_v53 = vadd.f32 %v7484_v14, %v749_v51  ;;  %v7501_v31 = vld [vmem:[#allocation32_spill] sm:$0xff] }
 0x5c3   : > { %2601 = vst.msk [vmem:[#allocation2 + $0xe0] sm:$0xff] %vm2572_vm0, %v2443_v37  ;;  %v2460_v18 = vadd.f32 %v7485_v8, %v2251_v52  ;;  %v1823_v44 = vadd.f32 %v7486_v35, %v694_v9  ;;  %v535_v37 = vld [vmem:[%s7242_s3 + $0x278] sm:$0xff]  ;;  %v7502_v52 = vld [vmem:[#allocation193_spill] sm:$0xff]  ;;  %v7503_v9 = vld [vmem:[#allocation170_spill] sm:$0xff] }
 0x5c4   : > { %v2060_v59 = vadd.f32 %v7487_v54, %v1851_v53  ;;  %v729_v13 = vpop.permute.xlu0 %728  ;;  %v7504_v53 = vld [vmem:[#allocation96_spill] sm:$0xff] }
 0x5c5   : > { %2608 = vst.msk [vmem:[#allocation2 + $0x118] sm:$0xff] %vm2572_vm0, %v2460_v18  ;;  %v2032_v4 = vadd.f32 %v7488_v38, %v1823_v44  ;;  %v1841_v55 = vadd.f32 %v7489_v32, %v729_v13  ;;  %v7505_v18 = vld [vmem:[#allocation165_spill] sm:$0xff]  ;;  %v7506_v44 = vld [vmem:[#allocation148_spill] sm:$0xff] }
 0x5c6   : > { %v2269_v41 = vadd.f32 %v7490_v12, %v2060_v59  ;;  %v7507_v59 = vld [vmem:[#allocation184_spill] sm:$0xff]  ;;  %v7508_v32 = vld [vmem:[#allocation45_spill] sm:$0xff] }
 0x5c7   : > { %v2241_v17 = vadd.f32 %v7491_v6, %v2032_v4  ;;  %v2050_v10 = vadd.f32 %v7492_v45, %v1841_v55 }
 0x5c8   : > { %v2478_v47 = vadd.f32 %v7493_v29, %v2269_v41  ;;  %918 = vperm.xlu1 %4512, %v532_v28   ;;  %v7509_v28 = vld [vmem:[#allocation157_spill] sm:$0xff]  ;;  %v7510_v41 = vld [vmem:[#allocation28_spill] sm:$0xff]  ;;  %v7512_v29 = vld [vmem:[#allocation90_spill] sm:$0xff] }
 0x5c9   : > { %v2450_v36 = vadd.f32 %v7494_v60, %v2241_v17  ;;  %v2259_v40 = vadd.f32 %v7495_v23, %v2050_v10  ;;  %v764_v56 = vpop.permute.xlu2 %763  ;;  %v7511_v17 = vld [vmem:[#allocation103_spill] sm:$0xff] }
 0x5ca   : > { %2615 = vst.msk [vmem:[#allocation2 + $0x150] sm:$0xff] %vm2572_vm0, %v2478_v47  ;;  %v709_v33 = vpop.permute.xlu1 %708  ;;  %v1858_v50 = vadd.f32 %v7496_v5, %v764_v56 }
 0x5cb   : > { %2604 = vst.msk [vmem:[#allocation2 + $0xf8] sm:$0xff] %vm2572_vm0, %v2450_v36  ;;  %v2468_v63 = vadd.f32 %v7497_v7, %v2259_v40  ;;  %v1831_v30 = vadd.f32 %v7498_v16, %v709_v33  ;;  %v6745_v36 = vpop.f32.mrf.mxu3  ;;  %v7514_v40 = vld [vmem:[#allocation176_spill] sm:$0xff]  ;;  %v7515_v33 = vld [vmem:[#allocation99_spill] sm:$0xff] }
 0x5cc   : > { %v2067_v43 = vadd.f32 %v7499_v62, %v1858_v50  ;;  %v744_v2 = vpop.permute.xlu0 %743  ;;  %v6750_v50 = vpop.f32.mrf.mxu2  ;;  %v7517_v16 = vld [vmem:[#allocation151_spill] sm:$0xff] }
 0x5cd   : > { %2611 = vst.msk [vmem:[#allocation2 + $0x130] sm:$0xff] %vm2572_vm0, %v2468_v63  ;;  %v2040_v11 = vadd.f32 %v7500_v24, %v1831_v30  ;;  %v1848_v20 = vadd.f32 %v7501_v31, %v744_v2  ;;  %4283 = vmatmul.msk.bf16.gmra.mxu2 %vm2572_vm0, %v2996_v22  ;;  %v2936_v63 = vld [vmem:[#allocation2 + $0xb0] sm:$0xff]  ;;  %v7519_v24 = vld [vmem:[#allocation52_spill] sm:$0xff]  ;;  %v7520_v31 = vld [vmem:[#allocation163_spill] sm:$0xff] }
 0x5ce   : > { %v2276_v51 = vadd.f32 %v7502_v52, %v2067_v43  ;;  %v7518_v22 = vld [vmem:[#allocation190_spill] sm:$0xff] }
 0x5cf   : > { %v2249_v14 = vadd.f32 %v7503_v9, %v2040_v11  ;;  %v2057_v8 = vadd.f32 %v7504_v53, %v1848_v20  ;;  %v7522_v9 = vld [vmem:[#allocation106_spill] sm:$0xff] }
 0x5d0   : > { %v2485_v35 = vadd.f32 %v7505_v18, %v2276_v51  ;;  %933 = vperm.xlu1 %4512, %v535_v37   ;;  %v7521_v37 = vld [vmem:[#allocation31_spill] sm:$0xff] }
 0x5d1   : > { %v2458_v54 = vadd.f32 %v7506_v44, %v2249_v14  ;;  %v2266_v13 = vadd.f32 %v7507_v59, %v2057_v8  ;;  %v779_v38 = vpop.permute.xlu2 %778  ;;  %v7523_v8 = vld [vmem:[#allocation95_spill] sm:$0xff]  ;;  %v7525_v59 = vld [vmem:[#allocation182_spill] sm:$0xff] }
 0x5d2   : > { %2618 = vst.msk [vmem:[#allocation2 + $0x168] sm:$0xff] %vm2572_vm0, %v2485_v35  ;;  %v724_v4 = vpop.permute.xlu1 %723  ;;  %v1866_v55 = vadd.f32 %v7508_v32, %v779_v38  ;;  %v7524_v35 = vld [vmem:[#allocation42_spill] sm:$0xff] }
 0x5d3   : > { %2607 = vst.msk [vmem:[#allocation2 + $0x110] sm:$0xff] %vm2572_vm0, %v2458_v54  ;;  %v2475_v12 = vadd.f32 %v7509_v28, %v2266_v13  ;;  %v1838_v6 = vadd.f32 %v7510_v41, %v724_v4  ;;  %v7526_v38 = vld [vmem:[#allocation102_spill] sm:$0xff]  ;;  %v6768_v32 = vpop.f32.mrf.mxu3 }
 0x5d4   : > { %v2075_v45 = vadd.f32 %v7511_v17, %v1866_v55  ;;  %v759_v10 = vpop.permute.xlu0 %758  ;;  %v7527_v55 = vld [vmem:[#allocation177_spill] sm:$0xff] }
 0x5d5   : > { %2614 = vst.msk [vmem:[#allocation2 + $0x148] sm:$0xff] %vm2572_vm0, %v2475_v12  ;;  %v2047_v47 = vadd.f32 %v7512_v29, %v1838_v6  ;;  %v1856_v60 = vadd.f32 %v7513_v26, %v759_v10  ;;  %v7528_v12 = vld [vmem:[#allocation156_spill] sm:$0xff]  ;;  %v7529_v29 = vld [vmem:[#allocation59_spill] sm:$0xff] }
 0x5d6   : > { %v2284_v23 = vadd.f32 %v6526_v49, %v2075_v45  ;;  %v2937_v49 = vld [vmem:[#allocation2 + $0xb8] sm:$0xff]  ;;  %v2303_v45 = vpop.f32.mrf.mxu2 }
 0x5d7   : > { %v2256_v56 = vadd.f32 %v7514_v40, %v2047_v47  ;;  %v2065_v5 = vadd.f32 %v7515_v33, %v1856_v60  ;;  %v2997_v51 = vpack.c.bf16 %v2937_v49, %v2936_v63  ;;  %v7531_v60 = vld [vmem:[#allocation34_spill] sm:$0xff]  ;;  %v7532_v40 = vld [vmem:[#allocation109_spill] sm:$0xff] }
 0x5d8   : > { %v2493_v7 = vadd.f32 %v7516_v19, %v2284_v23  ;;  %v7534_v19 = vld [vmem:[#allocation49_spill] sm:$0xff] }
 0x5d9   : > { %v2465_v30 = vadd.f32 %v7517_v16, %v2256_v56  ;;  %v2274_v62 = vadd.f32 %v7518_v22, %v2065_v5  ;;  %v794_v43 = vpop.permute.xlu2 %793  ;;  %v7533_v5 = vld [vmem:[#allocation98_spill] sm:$0xff]  ;;  %v7535_v16 = vld [vmem:[#allocation188_spill] sm:$0xff]  ;;  %v7536_v22 = vld [vmem:[#allocation105_spill] sm:$0xff] }
 0x5da   : > { %2621 = vst.msk [vmem:[#allocation2 + $0x180] sm:$0xff] %vm2572_vm0, %v2493_v7  ;;  %v739_v2 = vpop.permute.xlu1 %738  ;;  %v1873_v11 = vadd.f32 %v7519_v24, %v794_v43  ;;  %v7537_v43 = vld [vmem:[#allocation183_spill] sm:$0xff]  ;;  %v2939_v24 = vld [vmem:[#allocation2 + $0xc8] sm:$0xff] }
 0x5db   : > { %2610 = vst.msk [vmem:[#allocation2 + $0x128] sm:$0xff] %vm2572_vm0, %v2465_v30  ;;  %v2483_v20 = vadd.f32 %v7520_v31, %v2274_v62  ;;  %v1846_v52 = vadd.f32 %v7521_v37, %v739_v2  ;;  %v6788_v37 = vpop.f32.mrf.mxu3 }
 0x5dc   : > { %v2082_v14 = vadd.f32 %v7522_v9, %v1873_v11  ;;  %v774_v53 = vpop.permute.xlu0 %773  ;;  %v7538_v11 = vld [vmem:[#allocation161_spill] sm:$0xff] }
 0x5dd   : > { %2617 = vst.msk [vmem:[#allocation2 + $0x160] sm:$0xff] %vm2572_vm0, %v2483_v20  ;;  %v2055_v18 = vadd.f32 %v7523_v8, %v1846_v52  ;;  %v1863_v44 = vadd.f32 %v7524_v35, %v774_v53  ;;  %4284 = vmatmul.msk.bf16.gmra.mxu2 %vm2572_vm0, %v2997_v51  ;;  %v7539_v51 = vld [vmem:[#allocation67_spill] sm:$0xff]  ;;  %v7541_v8 = vld [vmem:[#allocation40_spill] sm:$0xff] }
 0x5de   : > { %v2291_v54 = vadd.f32 %v6636_v27, %v2082_v14  ;;  %v7530_v27 = vld [vmem:[#allocation169_spill] sm:$0xff]  ;;  %v7540_v14 = vld [vmem:[#allocation175_spill] sm:$0xff] }
 0x5df   : > { %v2264_v13 = vadd.f32 %v7525_v59, %v2055_v18  ;;  %v2072_v4 = vadd.f32 %v7526_v38, %v1863_v44  ;;  %v2305_v44 = vpop.f32.mrf.mxu2 }
 0x5e0   : > { %v2500_v28 = vadd.f32 %v7527_v55, %v2291_v54  ;;  %v7542_v54 = vld [vmem:[#allocation112_spill] sm:$0xff] }
 0x5e1   : > { %v2473_v41 = vadd.f32 %v7528_v12, %v2264_v13  ;;  %v2281_v6 = vadd.f32 %v6497_v57, %v2072_v4  ;;  %v809_v17 = vpop.permute.xlu2 %808  ;;  %v7543_v13 = vld [vmem:[#allocation101_spill] sm:$0xff]  ;;  %v7544_v4 = vld [vmem:[#allocation56_spill] sm:$0xff]  ;;  %v7545_v12 = vld [vmem:[#allocation195_spill] sm:$0xff] }
 0x5e2   : > { %2624 = vst.msk [vmem:[#allocation2 + $0x198] sm:$0xff] %vm2572_vm0, %v2500_v28  ;;  %v754_v10 = vpop.permute.xlu1 %753  ;;  %v1881_v47 = vadd.f32 %v7529_v29, %v809_v17 }
 0x5e3   : > { %2613 = vst.msk [vmem:[#allocation2 + $0x140] sm:$0xff] %vm2572_vm0, %v2473_v41  ;;  %v2490_v26 = vadd.f32 %v7530_v27, %v2281_v6  ;;  %v1853_v23 = vadd.f32 %v7531_v60, %v754_v10  ;;  %v7546_v6 = vld [vmem:[#allocation108_spill] sm:$0xff]  ;;  %v7547_v10 = vld [vmem:[#allocation189_spill] sm:$0xff] }
 0x5e4   : > { %v2090_v56 = vadd.f32 %v7532_v40, %v1881_v47  ;;  %v789_v33 = vpop.permute.xlu0 %788  ;;  %v7548_v47 = vld [vmem:[#allocation167_spill] sm:$0xff]  ;;  %v7549_v40 = vld [vmem:[#allocation76_spill] sm:$0xff] }
 0x5e5   : > { %2620 = vst.msk [vmem:[#allocation2 + $0x178] sm:$0xff] %vm2572_vm0, %v2490_v26  ;;  %v2062_v57 = vadd.f32 %v7533_v5, %v1853_v23  ;;  %v1871_v7 = vadd.f32 %v7534_v19, %v789_v33  ;;  %v7550_v33 = vld [vmem:[#allocation181_spill] sm:$0xff] }
 0x5e6   : > { %v2299_v63 = vadd.f32 %v6728_v48, %v2090_v56  ;;  %v2938_v48 = vld [vmem:[#allocation2 + $0xc0] sm:$0xff] }
 0x5e7   : > { %v2271_v30 = vadd.f32 %v7535_v16, %v2062_v57  ;;  %v2080_v62 = vadd.f32 %v7536_v22, %v1871_v7  ;;  %v2998_v35 = vpack.c.bf16 %v2939_v24, %v2938_v48  ;;  %v7551_v57 = vld [vmem:[#allocation47_spill] sm:$0xff]  ;;  %v6810_v7 = vpop.f32.mrf.mxu3  ;;  %v6813_v22 = vpop.f32.mrf.mxu2  ;;  %v7558_v48 = vld [vmem:[#allocation173_spill] sm:$0xff] }
 0x5e8   : > { %v2508_v2 = vadd.f32 %v7537_v43, %v2299_v63  ;;  %v7552_v63 = vld [vmem:[#allocation115_spill] sm:$0xff]  ;;  %v7554_v43 = vld [vmem:[#allocation64_spill] sm:$0xff] }
 0x5e9   : > { %v2480_v49 = vadd.f32 %v7538_v11, %v2271_v30  ;;  %v2289_v31 = vadd.f32 %v6601_v21, %v2080_v62  ;;  %v824_v20 = vpop.permute.xlu2 %823  ;;  %v7555_v24 = vld [vmem:[#allocation35_spill] sm:$0xff] }
 0x5ea   : > { %2627 = vst.msk [vmem:[#allocation2 + $0x1b0] sm:$0xff] %vm2572_vm0, %v2508_v2  ;;  %v769_v52 = vpop.permute.xlu1 %768  ;;  %v1888_v9 = vadd.f32 %v7539_v51, %v824_v20 }
 0x5eb   : > { %2616 = vst.msk [vmem:[#allocation2 + $0x158] sm:$0xff] %vm2572_vm0, %v2480_v49  ;;  %v2498_v53 = vadd.f32 %v7540_v14, %v2289_v31  ;;  %v1861_v18 = vadd.f32 %v7541_v8, %v769_v52  ;;  %v7556_v31 = vld [vmem:[#allocation111_spill] sm:$0xff]  ;;  %v7557_v52 = vld [vmem:[#allocation194_spill] sm:$0xff] }
 0x5ec   : > { %v2097_v59 = vadd.f32 %v7542_v54, %v1888_v9  ;;  %v804_v21 = vpop.permute.xlu0 %803  ;;  %v2940_v9 = vld [vmem:[#allocation2 + $0xd0] sm:$0xff]  ;;  %v2941_v54 = vld [vmem:[#allocation2 + $0xd8] sm:$0xff] }
 0x5ed   : > { %2623 = vst.msk [vmem:[#allocation2 + $0x190] sm:$0xff] %vm2572_vm0, %v2498_v53  ;;  %v2070_v38 = vadd.f32 %v7543_v13, %v1861_v18  ;;  %v1878_v55 = vadd.f32 %v7544_v4, %v804_v21  ;;  %4285 = vmatmul.msk.bf16.gmra.mxu2 %vm2572_vm0, %v2998_v35  ;;  %v7559_v35 = vld [vmem:[#allocation84_spill] sm:$0xff]  ;;  %v7562_v4 = vld [vmem:[#allocation119_spill] sm:$0xff] }
 0x5ee   : > { %v2306_v28 = vadd.f32 %v2305_v44, %v2097_v59  ;;  %v7560_v59 = vld [vmem:[#allocation187_spill] sm:$0xff] }
 0x5ef   : > { %v2279_v41 = vadd.f32 %v7545_v12, %v2070_v38  ;;  %v2087_v17 = vadd.f32 %v7546_v6, %v1878_v55  ;;  %v2999_v38 = vpack.c.bf16 %v2941_v54, %v2940_v9 }
 0x5f0   : > { %v2515_v29 = vadd.f32 %v7547_v10, %v2306_v28  ;;  %v7565_v10 = vld [vmem:[#allocation41_spill] sm:$0xff] }
 0x5f1   : > { %v2488_v27 = vadd.f32 %v7548_v47, %v2279_v41  ;;  %v2296_v26 = vadd.f32 %v6698_v0, %v2087_v17  ;;  %v839_v60 = vpop.permute.xlu2 %838  ;;  %v7553_v0 = vld [vmem:[#allocation104_spill] sm:$0xff]  ;;  %v7564_v41 = vld [vmem:[#allocation73_spill] sm:$0xff]  ;;  %v6833_v17 = vpop.f32.mrf.mxu3 }
 0x5f2   : > { %2630 = vst.msk [vmem:[#allocation2 + $0x1c8] sm:$0xff] %vm2572_vm0, %v2515_v29  ;;  %v784_v23 = vpop.permute.xlu1 %783  ;;  %v1896_v56 = vadd.f32 %v7549_v40, %v839_v60  ;;  %v2310_v47 = vpop.f32.mrf.mxu2  ;;  %v7567_v40 = vld [vmem:[#allocation179_spill] sm:$0xff] }
 0x5f3   : > { %2619 = vst.msk [vmem:[#allocation2 + $0x170] sm:$0xff] %vm2572_vm0, %v2488_v27  ;;  %v2505_v5 = vadd.f32 %v7550_v33, %v2296_v26  ;;  %v1868_v19 = vadd.f32 %v7551_v57, %v784_v23  ;;  %v7566_v26 = vld [vmem:[#allocation114_spill] sm:$0xff] }
 0x5f4   : > { %v2105_v16 = vadd.f32 %v7552_v63, %v1896_v56  ;;  %v819_v30 = vpop.permute.xlu0 %818 }
 0x5f5   : > { %2626 = vst.msk [vmem:[#allocation2 + $0x1a8] sm:$0xff] %vm2572_vm0, %v2505_v5  ;;  %v2077_v62 = vadd.f32 %v7553_v0, %v1868_v19  ;;  %v1886_v2 = vadd.f32 %v7554_v43, %v819_v30  ;;  %v7568_v19 = vld [vmem:[#allocation91_spill] sm:$0xff]  ;;  %v7570_v0 = vld [vmem:[#allocation62_spill] sm:$0xff] }
 0x5f6   : > { %v2314_v11 = vadd.f32 %v7555_v24, %v2105_v16  ;;  %v7569_v16 = vld [vmem:[#allocation192_spill] sm:$0xff] }
 0x5f7   : > { %v2286_v49 = vadd.f32 %v6562_v3, %v2077_v62  ;;  %v2095_v20 = vadd.f32 %v7556_v31, %v1886_v2  ;;  %v7561_v3 = vld [vmem:[#allocation54_spill] sm:$0xff]  ;;  %v7574_v31 = vld [vmem:[#allocation48_spill] sm:$0xff] }
 0x5f8   : > { %v2523_v51 = vadd.f32 %v7557_v52, %v2314_v11  ;;  %v7573_v11 = vld [vmem:[#allocation81_spill] sm:$0xff] }
 0x5f9   : > { %v2495_v14 = vadd.f32 %v7558_v48, %v2286_v49  ;;  %v2304_v53 = vadd.f32 %v2303_v45, %v2095_v20  ;;  %v854_v8 = vpop.permute.xlu2 %853  ;;  %v7563_v45 = vld [vmem:[#allocation107_spill] sm:$0xff]  ;;  %v6852_v48 = vpop.f32.mrf.mxu3 }
 0x5fa   : > { %2633 = vst.msk [vmem:[#allocation2 + $0x1e0] sm:$0xff] %vm2572_vm0, %v2523_v51  ;;  %v799_v18 = vpop.permute.xlu1 %798  ;;  %v1903_v44 = vadd.f32 %v7559_v35, %v854_v8  ;;  %v7575_v51 = vld [vmem:[#allocation118_spill] sm:$0xff]  ;;  %v7576_v8 = vld [vmem:[#allocation185_spill] sm:$0xff]  ;;  %v7577_v35 = vld [vmem:[#allocation39_spill] sm:$0xff] }
 0x5fb   : > { %2622 = vst.msk [vmem:[#allocation2 + $0x188] sm:$0xff] %vm2572_vm0, %v2495_v14  ;;  %v2513_v21 = vadd.f32 %v7560_v59, %v2304_v53  ;;  %v1876_v13 = vadd.f32 %v7561_v3, %v799_v18  ;;  %v2942_v53 = vld [vmem:[#allocation2 + $0xe0] sm:$0xff] }
 0x5fc   : > { %v2112_v55 = vadd.f32 %v7562_v4, %v1903_v44  ;;  %v834_v28 = vpop.permute.xlu0 %833 }
 0x5fd   : > { %2629 = vst.msk [vmem:[#allocation2 + $0x1c0] sm:$0xff] %vm2572_vm0, %v2513_v21  ;;  %v2085_v12 = vadd.f32 %v7563_v45, %v1876_v13  ;;  %v1893_v6 = vadd.f32 %v7564_v41, %v834_v28  ;;  %4286 = vmatmul.msk.bf16.gmra.mxu2 %vm2572_vm0, %v2999_v38  ;;  %v7578_v21 = vld [vmem:[#allocation5_spill] sm:$0xff]  ;;  %v7579_v38 = vld [vmem:[#allocation70_spill] sm:$0xff] }
 0x5fe   : > { %v2321_v29 = vadd.f32 %v7565_v10, %v2112_v55  ;;  %v2943_v13 = vld [vmem:[#allocation2 + $0xe8] sm:$0xff] }
 0x5ff   : > { %v2294_v27 = vadd.f32 %v6667_v15, %v2085_v12  ;;  %v2102_v60 = vadd.f32 %v7566_v26, %v1893_v6  ;;  %v7571_v15 = vld [vmem:[#allocation123_spill] sm:$0xff]  ;;  %v3000_v55 = vpack.c.bf16 %v2943_v13, %v2942_v53  ;;  %v7581_v12 = vld [vmem:[#allocation113_spill] sm:$0xff]  ;;  %v7584_v26 = vld [vmem:[#allocation122_spill] sm:$0xff] }
 0x600   : > { %v2530_v23 = vadd.f32 %v6530_v1, %v2321_v29  ;;  %v7572_v1 = vld [vmem:[#allocation110_spill] sm:$0xff]  ;;  %v7582_v6 = vld [vmem:[#allocation89_spill] sm:$0xff]  ;;  %v7583_v29 = vld [vmem:[#allocation55_spill] sm:$0xff] }
 0x601   : > { %v2503_v56 = vadd.f32 %v7567_v40, %v2294_v27  ;;  %v2311_v33 = vadd.f32 %v2310_v47, %v2102_v60  ;;  %v869_v5 = vpop.permute.xlu2 %868  ;;  %v7598_v13 = vld [vmem:[#allocation87_spill] sm:$0xff] }
 0x602   : > { %2636 = vst.msk [vmem:[#allocation2 + $0x1f8] sm:$0xff] %vm2572_vm0, %v2530_v23  ;;  %v814_v57 = vpop.permute.xlu1 %813  ;;  %v1911_v63 = vadd.f32 %v7568_v19, %v869_v5  ;;  %v7585_v23 = vld [vmem:[#allocation191_spill] sm:$0xff] }
 0x603   : > { %2625 = vst.msk [vmem:[#allocation2 + $0x1a0] sm:$0xff] %vm2572_vm0, %v2503_v56  ;;  %v2520_v30 = vadd.f32 %v7569_v16, %v2311_v33  ;;  %v1883_v62 = vadd.f32 %v7570_v0, %v814_v57  ;;  %v7586_v56 = vld [vmem:[#allocation46_spill] sm:$0xff]  ;;  %v6873_v57 = vpop.f32.mrf.mxu3 }
 0x604   : > { %v2120_v43 = vadd.f32 %v7571_v15, %v1911_v63  ;;  %v849_v2 = vpop.permute.xlu0 %848  ;;  %v7587_v63 = vld [vmem:[#allocation8_spill] sm:$0xff] }
 0x605   : > { %2632 = vst.msk [vmem:[#allocation2 + $0x1d8] sm:$0xff] %vm2572_vm0, %v2520_v30  ;;  %v2092_v24 = vadd.f32 %v7572_v1, %v1883_v62  ;;  %v1901_v49 = vadd.f32 %v7573_v11, %v849_v2  ;;  %v7588_v30 = vld [vmem:[#allocation79_spill] sm:$0xff]  ;;  %v7589_v62 = vld [vmem:[#allocation129_spill] sm:$0xff]  ;;  %v7591_v1 = vld [vmem:[#allocation4_spill] sm:$0xff] }
 0x606   : > { %v2329_v20 = vadd.f32 %v7574_v31, %v2120_v43  ;;  %v7590_v43 = vld [vmem:[#allocation116_spill] sm:$0xff]  ;;  %v7592_v11 = vld [vmem:[#allocation63_spill] sm:$0xff]  ;;  %v7593_v31 = vld [vmem:[#allocation37_spill] sm:$0xff] }
 0x607   : > { %v2301_v52 = vadd.f32 %v6750_v50, %v2092_v24  ;;  %v2110_v9 = vadd.f32 %v7575_v51, %v1901_v49 }
 0x608   : > { %v2538_v14 = vadd.f32 %v6628_v34, %v2329_v20  ;;  %v7580_v34 = vld [vmem:[#allocation126_spill] sm:$0xff] }
 0x609   : > { %v2510_v18 = vadd.f32 %v7576_v8, %v2301_v52  ;;  %v2319_v44 = vadd.f32 %v7577_v35, %v2110_v9  ;;  %v884_v54 = vpop.permute.xlu2 %883  ;;  %v7594_v52 = vld [vmem:[#allocation125_spill] sm:$0xff] }
 0x60a   : > { %2639 = vst.msk [vmem:[#allocation2 + $0x210] sm:$0xff] %vm2572_vm0, %v2538_v14  ;;  %v829_v59 = vpop.permute.xlu1 %828  ;;  %v1918_v3 = vadd.f32 %v7578_v21, %v884_v54  ;;  %v7595_v14 = vld [vmem:[#allocation196_spill] sm:$0xff]  ;;  %v7596_v8 = vld [vmem:[#allocation53_spill] sm:$0xff]  ;;  %v7597_v54 = vld [vmem:[#allocation11_spill] sm:$0xff] }
 0x60b   : > { %2628 = vst.msk [vmem:[#allocation2 + $0x1b8] sm:$0xff] %vm2572_vm0, %v2510_v18  ;;  %v2528_v50 = vadd.f32 %v6505_v61, %v2319_v44  ;;  %v1891_v4 = vadd.f32 %v7579_v38, %v829_v59  ;;  %v2944_v21 = vld [vmem:[#allocation2 + $0xf0] sm:$0xff] }
 0x60c   : > { %v2127_v28 = vadd.f32 %v7580_v34, %v1918_v3  ;;  %v864_v45 = vpop.permute.xlu0 %863 }
 0x60d   : > { %2635 = vst.msk [vmem:[#allocation2 + $0x1f0] sm:$0xff] %vm2572_vm0, %v2528_v50  ;;  %v2100_v41 = vadd.f32 %v7581_v12, %v1891_v4  ;;  %v1908_v10 = vadd.f32 %v7582_v6, %v864_v45  ;;  %4287 = vmatmul.msk.bf16.gmra.mxu2 %vm2572_vm0, %v3000_v55  ;;  %v7599_v4 = vld [vmem:[#allocation132_spill] sm:$0xff]  ;;  %v7601_v12 = vld [vmem:[#allocation7_spill] sm:$0xff] }
 0x60e   : > { %v2336_v47 = vadd.f32 %v7583_v29, %v2127_v28  ;;  %v7600_v28 = vld [vmem:[#allocation120_spill] sm:$0xff]  ;;  %v7602_v6 = vld [vmem:[#allocation71_spill] sm:$0xff] }
 0x60f   : > { %v2309_v27 = vadd.f32 %v6813_v22, %v2100_v41  ;;  %v2117_v61 = vadd.f32 %v7584_v26, %v1908_v10  ;;  %v7603_v29 = vld [vmem:[#allocation43_spill] sm:$0xff] }
 0x610   : > { %v2545_v60 = vadd.f32 %v6718_v42, %v2336_v47 }
 0x611   : > { %v2518_v40 = vadd.f32 %v7585_v23, %v2309_v27  ;;  %v2326_v33 = vadd.f32 %v7586_v56, %v2117_v61  ;;  %v899_v5 = vpop.permute.xlu2 %898 }
 0x612   : > { %2642 = vst.msk [vmem:[#allocation2 + $0x228] sm:$0xff] %vm2572_vm0, %v2545_v60  ;;  %v844_v19 = vpop.permute.xlu1 %843  ;;  %v1926_v16 = vadd.f32 %v7587_v63, %v899_v5  ;;  %v7605_v60 = vld [vmem:[#allocation60_spill] sm:$0xff]  ;;  %v7607_v63 = vld [vmem:[#allocation93_spill] sm:$0xff] }
 0x613   : > { %2631 = vst.msk [vmem:[#allocation2 + $0x1d0] sm:$0xff] %vm2572_vm0, %v2518_v40  ;;  %v2535_v22 = vadd.f32 %v6591_v39, %v2326_v33  ;;  %v1898_v0 = vadd.f32 %v7588_v30, %v844_v19  ;;  %v2945_v39 = vld [vmem:[#allocation2 + $0xf8] sm:$0xff]  ;;  %v7606_v33 = vld [vmem:[#allocation14_spill] sm:$0xff] }
 0x614   : > { %v2135_v42 = vadd.f32 %v7589_v62, %v1926_v16  ;;  %v879_v15 = vpop.permute.xlu0 %878  ;;  %v3001_v38 = vpack.c.bf16 %v2945_v39, %v2944_v21  ;;  %v7610_v62 = vld [vmem:[#allocation10_spill] sm:$0xff]  ;;  %v2947_v39 = vld [vmem:[#allocation2 + $0x108] sm:$0xff]  ;;  %v6928_v21 = vstv %s3303_s14 }
 0x615   : > { %2638 = vst.msk [vmem:[#allocation2 + $0x208] sm:$0xff] %vm2572_vm0, %v2535_v22  ;;  %v2107_v2 = vadd.f32 %v7590_v43, %v1898_v0  ;;  %v1916_v24 = vadd.f32 %v7591_v1, %v879_v15  ;;  %v7608_v22 = vld [vmem:[#allocation135_spill] sm:$0xff]  ;;  %v7611_v43 = vld [vmem:[#allocation82_spill] sm:$0xff] }
 0x616   : > { %v2344_v49 = vadd.f32 %v7592_v11, %v2135_v42  ;;  %v7612_v1 = vld [vmem:[#allocation50_spill] sm:$0xff]  ;;  %v7613_v11 = vld [vmem:[#allocation131_spill] sm:$0xff] }
 0x617   : > { %v2316_v20 = vadd.f32 %v7593_v31, %v2107_v2  ;;  %v2125_v51 = vadd.f32 %v7594_v52, %v1916_v24  ;;  %v2946_v31 = vld [vmem:[#allocation2 + $0x100] sm:$0xff] }
 0x618   : > { %v2553_v9 = vadd.f32 %v6788_v37, %v2344_v49  ;;  %v2564_v37 = vpop.f32.mrf.mxu3  ;;  %v7614_v52 = vld [vmem:[#allocation68_spill] sm:$0xff] }
 0x619   : > { %v2525_v53 = vadd.f32 %v7595_v14, %v2316_v20  ;;  %v2334_v18 = vadd.f32 %v7596_v8, %v2125_v51  ;;  %v914_v35 = vpop.permute.xlu2 %913 }
 0x61a   : > { %2645 = vst.msk [vmem:[#allocation2 + $0x240] sm:$0xff] %vm2572_vm0, %v2553_v9  ;;  %v859_v44 = vpop.permute.xlu1 %858  ;;  %v1933_v59 = vadd.f32 %v7597_v54, %v914_v35  ;;  %v7617_v54 = vld [vmem:[#allocation13_spill] sm:$0xff] }
 0x61b   : > { %2634 = vst.msk [vmem:[#allocation2 + $0x1e8] sm:$0xff] %vm2572_vm0, %v2525_v53  ;;  %v2543_v3 = vadd.f32 %v6691_v25, %v2334_v18  ;;  %v1906_v50 = vadd.f32 %v7598_v13, %v859_v44  ;;  %v7604_v25 = vld [vmem:[#allocation128_spill] sm:$0xff]  ;;  %v7615_v53 = vld [vmem:[#allocation6_spill] sm:$0xff]  ;;  %v3002_v18 = vpack.c.bf16 %v2947_v39, %v2946_v31  ;;  %v7616_v44 = vld [vmem:[#allocation127_spill] sm:$0xff] }
 0x61c   : > { %v2142_v55 = vadd.f32 %v7599_v4, %v1933_v59  ;;  %v894_v34 = vpop.permute.xlu0 %893  ;;  %v3369_v4 = vld [vmem:[%s4603_s23] sm:$0xff] }
 0x61d   : > { %2641 = vst.msk [vmem:[#allocation2 + $0x220] sm:$0xff] %vm2572_vm0, %v2543_v3  ;;  %v2115_v45 = vadd.f32 %v7600_v28, %v1906_v50  ;;  %v1923_v41 = vadd.f32 %v7601_v12, %v894_v34  ;;  %4288 = vmatmul.msk.bf16.gmra.mxu2 %vm2572_vm0, %v3001_v38  ;;  %v7618_v3 = vld [vmem:[#allocation57_spill] sm:$0xff]  ;;  %v7619_v50 = vld [vmem:[#allocation134_spill] sm:$0xff] }
 0x61e   : > { %v2351_v10 = vadd.f32 %v7602_v6, %v2142_v55  ;;  %v7620_v34 = vld [vmem:[#allocation78_spill] sm:$0xff] }
 0x61f   : > { %v2324_v47 = vadd.f32 %v7603_v29, %v2115_v45  ;;  %v2132_v27 = vadd.f32 %v7604_v25, %v1923_v41  ;;  %v7623_v25 = vld [vmem:[#allocation65_spill] sm:$0xff] }
 0x620   : > { %v2560_v26 = vadd.f32 %v6852_v48, %v2351_v10  ;;  %v2567_v15 = vpop.f32.mrf.mxu3  ;;  %v7621_v10 = vld [vmem:[#allocation9_spill] sm:$0xff] }
 0x621   : > { %v2533_v61 = vadd.f32 %v6555_v46, %v2324_v47  ;;  %v2341_v23 = vadd.f32 %v7605_v60, %v2132_v27  ;;  %v929_v40 = vpop.permute.xlu2 %928  ;;  %v7609_v46 = vld [vmem:[#allocation124_spill] sm:$0xff] }
 0x622   : > { %2648 = vst.msk [vmem:[#allocation2 + $0x258] sm:$0xff] %vm2572_vm0, %v2560_v26  ;;  %v874_v56 = vpop.permute.xlu1 %873  ;;  %v1941_v5 = vadd.f32 %v7606_v33, %v929_v40  ;;  %v3370_v26 = vld [vmem:[%s4603_s23 + $0x8] sm:$0xff] }
 0x623   : > { %2637 = vst.msk [vmem:[#allocation2 + $0x200] sm:$0xff] %vm2572_vm0, %v2533_v61  ;;  %v2550_v19 = vadd.f32 %v6768_v32, %v2341_v23  ;;  %v1913_v16 = vadd.f32 %v7607_v63, %v874_v56  ;;  %v2948_v61 = vld [vmem:[#allocation2 + $0x110] sm:$0xff]  ;;  %v2949_v56 = vld [vmem:[#allocation2 + $0x118] sm:$0xff] }
 0x624   : > { %v2150_v30 = vadd.f32 %v7608_v22, %v1941_v5  ;;  %v909_v0 = vpop.permute.xlu0 %908  ;;  %v7624_v5 = vld [vmem:[#allocation12_spill] sm:$0xff]  ;;  %v3003_v63 = vpack.c.bf16 %v2949_v56, %v2948_v61 }
 0x625   : > { %2644 = vst.msk [vmem:[#allocation2 + $0x238] sm:$0xff] %vm2572_vm0, %v2550_v19  ;;  %v2122_v48 = vadd.f32 %v7609_v46, %v1913_v16  ;;  %v1931_v42 = vadd.f32 %v7610_v62, %v909_v0  ;;  %v7625_v16 = vld [vmem:[#allocation133_spill] sm:$0xff]  ;;  %v3371_v46 = vld [vmem:[%s4603_s23 + $0x10] sm:$0xff] }
 0x626   : > { %v2359_v2 = vadd.f32 %v7611_v43, %v2150_v30  ;;  %v7626_v30 = vld [vmem:[#allocation74_spill] sm:$0xff]  ;;  %v7627_v43 = vld [vmem:[#allocation15_spill] sm:$0xff] }
 0x627   : > { %v2331_v24 = vadd.f32 %v7612_v1, %v2122_v48  ;;  %v2140_v49 = vadd.f32 %v7613_v11, %v1931_v42  ;;  %v7628_v1 = vld [vmem:[#allocation137_spill] sm:$0xff] }
 0x628   : > { %v2568_v32 = vadd.f32 %v2567_v15, %v2359_v2  ;;  %v2569_v11 = vpop.f32.mrf.mxu3 }
 0x629   : > { %v2540_v20 = vadd.f32 %v6662_v58, %v2331_v24  ;;  %v2349_v51 = vadd.f32 %v7614_v52, %v2140_v49  ;;  %v7629_v49 = vld [vmem:[#allocation85_spill] sm:$0xff] }
 0x62a   : > { %2651 = vst.msk [vmem:[#allocation2 + $0x270] sm:$0xff] %vm2572_vm0, %v2568_v32  ;;  %v889_v9 = vpop.permute.xlu1 %888 }
 0x62b   : > { %2640 = vst.msk [vmem:[#allocation2 + $0x218] sm:$0xff] %vm2572_vm0, %v2540_v20  ;;  %v2558_v14 = vadd.f32 %v6833_v17, %v2349_v51  ;;  %v1921_v8 = vadd.f32 %v7615_v53, %v889_v9  ;;  %v2951_v20 = vld [vmem:[#allocation2 + $0x128] sm:$0xff]  ;;  %v2950_v9 = vld [vmem:[#allocation2 + $0x120] sm:$0xff] }
 0x62c   : > { %v924_v35 = vpop.permute.xlu0 %923 }
 0x62d   : > { %2647 = vst.msk [vmem:[#allocation2 + $0x250] sm:$0xff] %vm2572_vm0, %v2558_v14  ;;  %v2130_v58 = vadd.f32 %v7616_v44, %v1921_v8  ;;  %v1938_v59 = vadd.f32 %v7617_v54, %v924_v35  ;;  %4289 = vmatmul.msk.bf16.gmra.mxu2 %vm2572_vm0, %v3002_v18  ;;  %v3004_v14 = vpack.c.bf16 %v2951_v20, %v2950_v9  ;;  %v3373_v8 = vld [vmem:[%s4603_s23 + $0x20] sm:$0xff]  ;;  %v2952_v54 = vld [vmem:[#allocation2 + $0x130] sm:$0xff]  ;;  %v3384_v9 = vld [vmem:[%s4603_s23 + $0x78] sm:$0xff] }
 0x62f   : > { %v2339_v13 = vadd.f32 %v7618_v3, %v2130_v58  ;;  %v2147_v38 = vadd.f32 %v7619_v50, %v1938_v59  ;;  %v3374_v58 = vld [vmem:[%s4603_s23 + $0x28] sm:$0xff]  ;;  %v2953_v3 = vld [vmem:[#allocation2 + $0x138] sm:$0xff] }
 0x630   : > { %v3143_v17 = vpop.f32.mrf.mxu2  ;;  %v3005_v50 = vpack.c.bf16 %v2953_v3, %v2952_v54  ;;  %v3386_v3 = vld [vmem:[%s4603_s23 + $0x88] sm:$0xff] }
 0x631   : > { %v2548_v55 = vadd.f32 %v6745_v36, %v2339_v13  ;;  %v2356_v28 = vadd.f32 %v7620_v34, %v2147_v38  ;;  %v3305_v45 = vmul.f32 %v6928_v21, %v3143_v17  ;;  %v7622_v36 = vld [vmem:[#allocation130_spill] sm:$0xff] }
 0x632   : > { %v904_v12 = vpop.permute.xlu1 %903  ;;  %v3375_v17 = vld [vmem:[%s4603_s23 + $0x30] sm:$0xff] }
 0x633   : > { %2643 = vst.msk [vmem:[#allocation2 + $0x230] sm:$0xff] %vm2572_vm0, %v2548_v55  ;;  %v2565_v41 = vadd.f32 %v2564_v37, %v2356_v28  ;;  %v3433_v6 = vadd.f32 %v3369_v4, %v3305_v45  ;;  %v1928_v29 = vadd.f32 %v7621_v10, %v904_v12  ;;  %v3376_v28 = vld [vmem:[%s4603_s23 + $0x38] sm:$0xff]  ;;  %v2954_v45 = vld [vmem:[#allocation2 + $0x140] sm:$0xff] }
 0x635   : > { %2650 = vst.msk [vmem:[#allocation2 + $0x268] sm:$0xff] %vm2572_vm0, %v2565_v41  ;;  %v2137_v47 = vadd.f32 %v7622_v36, %v1928_v29  ;;  %v2955_v41 = vld [vmem:[#allocation2 + $0x148] sm:$0xff]  ;;  %v3377_v36 = vld [vmem:[%s4603_s23 + $0x40] sm:$0xff] }
 0x636   : > { %3497 = vst.msk [vmem:[%s6942_s19] sm:$0xff] %vm2572_vm0, %v3433_v6  ;;  %v3006_v10 = vpack.c.bf16 %v2955_v41, %v2954_v45  ;;  %v3388_v41 = vld [vmem:[%s4603_s23 + $0x98] sm:$0xff] }
 0x637   : > { %v2346_v27 = vadd.f32 %v7623_v25, %v2137_v47 }
 0x638   : > { %v3145_v37 = vpop.f32.mrf.mxu2 }
 0x639   : > { %v2555_v60 = vadd.f32 %v6810_v7, %v2346_v27  ;;  %v3306_v23 = vmul.f32 %v6928_v21, %v3145_v37  ;;  %v3378_v37 = vld [vmem:[%s4603_s23 + $0x48] sm:$0xff] }
 0x63a   : > { %v919_v40 = vpop.permute.xlu1 %918 }
 0x63b   : > { %2646 = vst.msk [vmem:[#allocation2 + $0x248] sm:$0xff] %vm2572_vm0, %v2555_v60  ;;  %v3434_v33 = vadd.f32 %v3370_v26, %v3306_v23  ;;  %v1936_v19 = vadd.f32 %v7624_v5, %v919_v40  ;;  %v2957_v26 = vld [vmem:[#allocation2 + $0x158] sm:$0xff]  ;;  %v2956_v60 = vld [vmem:[#allocation2 + $0x150] sm:$0xff] }
 0x63c   : > { %v3007_v40 = vpack.c.bf16 %v2957_v26, %v2956_v60  ;;  %v3390_v60 = vld [vmem:[%s4603_s23 + $0xa8] sm:$0xff] }
 0x63d   : > { %3498 = vst.msk [vmem:[%s6942_s19 + $0x8] sm:$0xff] %vm2572_vm0, %v3434_v33  ;;  %v2145_v22 = vadd.f32 %v7625_v16, %v1936_v19  ;;  %4290 = vmatmul.msk.bf16.gmra.mxu2 %vm2572_vm0, %v3003_v63  ;;  %v3379_v33 = vld [vmem:[%s4603_s23 + $0x50] sm:$0xff]  ;;  %v3380_v16 = vld [vmem:[%s4603_s23 + $0x58] sm:$0xff] }
 0x63f   : > { %v2354_v7 = vadd.f32 %v7626_v30, %v2145_v22  ;;  %v2958_v22 = vld [vmem:[#allocation2 + $0x160] sm:$0xff] }
 0x640   : > { %v3148_v0 = vpop.f32.mrf.mxu2 }
 0x641   : > { %v2563_v48 = vadd.f32 %v6873_v57, %v2354_v7  ;;  %v3307_v62 = vmul.f32 %v6928_v21, %v3148_v0  ;;  %v3372_v57 = vld [vmem:[%s4603_s23 + $0x18] sm:$0xff]  ;;  %v2959_v7 = vld [vmem:[#allocation2 + $0x168] sm:$0xff] }
 0x642   : > { %v934_v42 = vpop.permute.xlu1 %933 }
 0x643   : > { %2649 = vst.msk [vmem:[#allocation2 + $0x260] sm:$0xff] %vm2572_vm0, %v2563_v48  ;;  %v3435_v15 = vadd.f32 %v3371_v46, %v3307_v62  ;;  %v1943_v2 = vadd.f32 %v7627_v43, %v934_v42  ;;  %v3008_v46 = vpack.c.bf16 %v2959_v7, %v2958_v22  ;;  %v3381_v62 = vld [vmem:[%s4603_s23 + $0x60] sm:$0xff]  ;;  %v3392_v7 = vld [vmem:[%s4603_s23 + $0xb8] sm:$0xff] }
 0x645   : > { %3499 = vst.msk [vmem:[%s6942_s19 + $0x10] sm:$0xff] %vm2572_vm0, %v3435_v15  ;;  %v2152_v24 = vadd.f32 %v7628_v1, %v1943_v2  ;;  %v3382_v2 = vld [vmem:[%s4603_s23 + $0x68] sm:$0xff]  ;;  %v2960_v1 = vld [vmem:[#allocation2 + $0x170] sm:$0xff] }
 0x647   : > { %v2361_v32 = vadd.f32 %v7629_v49, %v2152_v24 }
 0x648   : > { %v3150_v31 = vpop.f32.mrf.mxu2 }
 0x649   : > { %v2570_v52 = vadd.f32 %v2569_v11, %v2361_v32  ;;  %v3308_v51 = vmul.f32 %v6928_v21, %v3150_v31  ;;  %v2961_v11 = vld [vmem:[#allocation2 + $0x178] sm:$0xff] }
 0x64a   : > { %v3009_v32 = vpack.c.bf16 %v2961_v11, %v2960_v1  ;;  %v3394_v11 = vld [vmem:[%s4603_s23 + $0xc8] sm:$0xff] }
 0x64b   : > { %2652 = vst.msk [vmem:[#allocation2 + $0x278] sm:$0xff] %vm2572_vm0, %v2570_v52  ;;  %v3436_v39 = vadd.f32 %v3372_v57, %v3308_v51  ;;  %v3383_v57 = vld [vmem:[%s4603_s23 + $0x70] sm:$0xff] }
 0x64d   : > { %3500 = vst.msk [vmem:[%s6942_s19 + $0x18] sm:$0xff] %vm2572_vm0, %v3436_v39  ;;  %4291 = vmatmul.msk.bf16.gmra.mxu2 %vm2572_vm0, %v3004_v14  ;;  %v2963_v39 = vld [vmem:[#allocation2 + $0x188] sm:$0xff] }
 0x650   : > { %v3153_v53 = vpop.f32.mrf.mxu2 }
 0x651   : > { %v3309_v18 = vmul.f32 %v6928_v21, %v3153_v53  ;;  %v2962_v53 = vld [vmem:[#allocation2 + $0x180] sm:$0xff] }
 0x653   : > { %v3437_v35 = vadd.f32 %v3373_v8, %v3309_v18  ;;  %v3010_v18 = vpack.c.bf16 %v2963_v39, %v2962_v53  ;;  %v3396_v53 = vld [vmem:[%s4603_s23 + $0xd8] sm:$0xff] }
 0x655   : > { %3501 = vst.msk [vmem:[%s6942_s19 + $0x20] sm:$0xff] %vm2572_vm0, %v3437_v35 }
 0x658   : > { %v3155_v44 = vpop.f32.mrf.mxu2 }
 0x659   : > { %v3310_v59 = vmul.f32 %v6928_v21, %v3155_v44  ;;  %v3385_v44 = vld [vmem:[%s4603_s23 + $0x80] sm:$0xff] }
 0x65b   : > { %v3438_v13 = vadd.f32 %v3374_v58, %v3310_v59 }
 0x65d   : > { %3502 = vst.msk [vmem:[%s6942_s19 + $0x28] sm:$0xff] %vm2572_vm0, %v3438_v13  ;;  %4292 = vmatmul.msk.bf16.gmra.mxu2 %vm2572_vm0, %v3005_v50  ;;  %v2964_v13 = vld [vmem:[#allocation2 + $0x190] sm:$0xff] }
 0x660   : > { %v3158_v38 = vpop.f32.mrf.mxu2 }
 0x661   : > { %v3311_v4 = vmul.f32 %v6928_v21, %v3158_v38  ;;  %v2965_v38 = vld [vmem:[#allocation2 + $0x198] sm:$0xff] }
 0x663   : > { %v3439_v55 = vadd.f32 %v3375_v17, %v3311_v4  ;;  %v3011_v4 = vpack.c.bf16 %v2965_v38, %v2964_v13  ;;  %v3398_v38 = vld [vmem:[%s4603_s23 + $0xe8] sm:$0xff] }
 0x665   : > { %3503 = vst.msk [vmem:[%s6942_s19 + $0x30] sm:$0xff] %vm2572_vm0, %v3439_v55 }
 0x668   : > { %v3160_v34 = vpop.f32.mrf.mxu2 }
 0x669   : > { %v3312_v12 = vmul.f32 %v6928_v21, %v3160_v34  ;;  %v3387_v34 = vld [vmem:[%s4603_s23 + $0x90] sm:$0xff] }
 0x66b   : > { %v3440_v6 = vadd.f32 %v3376_v28, %v3312_v12 }
 0x66d   : > { %3504 = vst.msk [vmem:[%s6942_s19 + $0x38] sm:$0xff] %vm2572_vm0, %v3440_v6  ;;  %4293 = vmatmul.msk.bf16.gmra.mxu2 %vm2572_vm0, %v3006_v10  ;;  %v2966_v6 = vld [vmem:[#allocation2 + $0x1a0] sm:$0xff] }
 0x670   : > { %v3163_v29 = vpop.f32.mrf.mxu2 }
 0x671   : > { %v3313_v47 = vmul.f32 %v6928_v21, %v3163_v29  ;;  %v2967_v29 = vld [vmem:[#allocation2 + $0x1a8] sm:$0xff] }
 0x673   : > { %v3441_v25 = vadd.f32 %v3377_v36, %v3313_v47  ;;  %v3012_v47 = vpack.c.bf16 %v2967_v29, %v2966_v6  ;;  %v3400_v29 = vld [vmem:[%s4603_s23 + $0xf8] sm:$0xff] }
 0x675   : > { %3505 = vst.msk [vmem:[%s6942_s19 + $0x40] sm:$0xff] %vm2572_vm0, %v3441_v25 }
 0x678   : > { %v3165_v27 = vpop.f32.mrf.mxu2 }
 0x679   : > { %v3314_v61 = vmul.f32 %v6928_v21, %v3165_v27  ;;  %v3389_v27 = vld [vmem:[%s4603_s23 + $0xa0] sm:$0xff] }
 0x67b   : > { %v3442_v23 = vadd.f32 %v3378_v37, %v3314_v61 }
 0x67d   : > { %3506 = vst.msk [vmem:[%s6942_s19 + $0x48] sm:$0xff] %vm2572_vm0, %v3442_v23  ;;  %4294 = vmatmul.msk.bf16.gmra.mxu2 %vm2572_vm0, %v3007_v40  ;;  %v2969_v23 = vld [vmem:[#allocation2 + $0x1b8] sm:$0xff] }
 0x680   : > { %v3168_v56 = vpop.f32.mrf.mxu2 }
 0x681   : > { %v3315_v5 = vmul.f32 %v6928_v21, %v3168_v56  ;;  %v2968_v56 = vld [vmem:[#allocation2 + $0x1b0] sm:$0xff] }
 0x683   : > { %v3443_v19 = vadd.f32 %v3379_v33, %v3315_v5  ;;  %v3013_v5 = vpack.c.bf16 %v2969_v23, %v2968_v56  ;;  %v3402_v56 = vld [vmem:[%s4603_s23 + $0x108] sm:$0xff] }
 0x685   : > { %3507 = vst.msk [vmem:[%s6942_s19 + $0x50] sm:$0xff] %vm2572_vm0, %v3443_v19 }
 0x688   : > { %v3170_v63 = vpop.f32.mrf.mxu2 }
 0x689   : > { %v3316_v30 = vmul.f32 %v6928_v21, %v3170_v63  ;;  %v3391_v63 = vld [vmem:[%s4603_s23 + $0xb0] sm:$0xff] }
 0x68b   : > { %v3444_v0 = vadd.f32 %v3380_v16, %v3316_v30 }
 0x68d   : > { %3508 = vst.msk [vmem:[%s6942_s19 + $0x58] sm:$0xff] %vm2572_vm0, %v3444_v0  ;;  %4295 = vmatmul.msk.bf16.gmra.mxu2 %vm2572_vm0, %v3008_v46  ;;  %v2970_v0 = vld [vmem:[#allocation2 + $0x1c0] sm:$0xff] }
 0x690   : > { %v3173_v48 = vpop.f32.mrf.mxu2 }
 0x691   : > { %v3317_v42 = vmul.f32 %v6928_v21, %v3173_v48  ;;  %v2971_v48 = vld [vmem:[#allocation2 + $0x1c8] sm:$0xff] }
 0x693   : > { %v3445_v15 = vadd.f32 %v3381_v62, %v3317_v42  ;;  %v3014_v42 = vpack.c.bf16 %v2971_v48, %v2970_v0  ;;  %v3404_v48 = vld [vmem:[%s4603_s23 + $0x118] sm:$0xff] }
 0x695   : > { %3509 = vst.msk [vmem:[%s6942_s19 + $0x60] sm:$0xff] %vm2572_vm0, %v3445_v15 }
 0x698   : > { %v3175_v43 = vpop.f32.mrf.mxu2 }
 0x699   : > { %v3318_v24 = vmul.f32 %v6928_v21, %v3175_v43  ;;  %v3393_v43 = vld [vmem:[%s4603_s23 + $0xc0] sm:$0xff] }
 0x69b   : > { %v3446_v49 = vadd.f32 %v3382_v2, %v3318_v24 }
 0x69d   : > { %3510 = vst.msk [vmem:[%s6942_s19 + $0x68] sm:$0xff] %vm2572_vm0, %v3446_v49  ;;  %4296 = vmatmul.msk.bf16.gmra.mxu2 %vm2572_vm0, %v3009_v32  ;;  %v2972_v49 = vld [vmem:[#allocation2 + $0x1d0] sm:$0xff] }
 0x6a0   : > { %v3178_v31 = vpop.f32.mrf.mxu2 }
 0x6a1   : > { %v3319_v20 = vmul.f32 %v6928_v21, %v3178_v31  ;;  %v2973_v31 = vld [vmem:[#allocation2 + $0x1d8] sm:$0xff] }
 0x6a3   : > { %v3447_v52 = vadd.f32 %v3383_v57, %v3319_v20  ;;  %v3015_v20 = vpack.c.bf16 %v2973_v31, %v2972_v49  ;;  %v3406_v31 = vld [vmem:[%s4603_s23 + $0x128] sm:$0xff] }
 0x6a5   : > { %3511 = vst.msk [vmem:[%s6942_s19 + $0x70] sm:$0xff] %vm2572_vm0, %v3447_v52 }
 0x6a8   : > { %v3180_v51 = vpop.f32.mrf.mxu2 }
 0x6a9   : > { %v3320_v14 = vmul.f32 %v6928_v21, %v3180_v51  ;;  %v3395_v51 = vld [vmem:[%s4603_s23 + $0xd0] sm:$0xff] }
 0x6ab   : > { %v3448_v8 = vadd.f32 %v3384_v9, %v3320_v14 }
 0x6ad   : > { %3512 = vst.msk [vmem:[%s6942_s19 + $0x78] sm:$0xff] %vm2572_vm0, %v3448_v8  ;;  %4297 = vmatmul.msk.bf16.gmra.mxu2 %vm2572_vm0, %v3010_v18  ;;  %v2975_v8 = vld [vmem:[#allocation2 + $0x1e8] sm:$0xff] }
 0x6b0   : > { %v3183_v35 = vpop.f32.mrf.mxu2 }
 0x6b1   : > { %v3321_v58 = vmul.f32 %v6928_v21, %v3183_v35  ;;  %v2974_v35 = vld [vmem:[#allocation2 + $0x1e0] sm:$0xff] }
 0x6b3   : > { %v3449_v54 = vadd.f32 %v3385_v44, %v3321_v58  ;;  %v3016_v58 = vpack.c.bf16 %v2975_v8, %v2974_v35  ;;  %v3408_v35 = vld [vmem:[%s4603_s23 + $0x138] sm:$0xff] }
 0x6b5   : > { %3513 = vst.msk [vmem:[%s6942_s19 + $0x80] sm:$0xff] %vm2572_vm0, %v3449_v54 }
 0x6b8   : > { %v3185_v59 = vpop.f32.mrf.mxu2 }
 0x6b9   : > { %v3322_v50 = vmul.f32 %v6928_v21, %v3185_v59  ;;  %v3397_v59 = vld [vmem:[%s4603_s23 + $0xe0] sm:$0xff] }
 0x6bb   : > { %v3450_v17 = vadd.f32 %v3386_v3, %v3322_v50 }
 0x6bd   : > { %3514 = vst.msk [vmem:[%s6942_s19 + $0x88] sm:$0xff] %vm2572_vm0, %v3450_v17  ;;  %4298 = vmatmul.msk.bf16.gmra.mxu2 %vm2572_vm0, %v3011_v4  ;;  %v2976_v17 = vld [vmem:[#allocation2 + $0x1f0] sm:$0xff] }
 0x6c0   : > { %v3188_v55 = vpop.f32.mrf.mxu2 }
 0x6c1   : > { %v3323_v28 = vmul.f32 %v6928_v21, %v3188_v55  ;;  %v2977_v55 = vld [vmem:[#allocation2 + $0x1f8] sm:$0xff] }
 0x6c3   : > { %v3451_v45 = vadd.f32 %v3387_v34, %v3323_v28  ;;  %v3017_v28 = vpack.c.bf16 %v2977_v55, %v2976_v17  ;;  %v3410_v55 = vld [vmem:[%s4603_s23 + $0x148] sm:$0xff] }
 0x6c5   : > { %3515 = vst.msk [vmem:[%s6942_s19 + $0x90] sm:$0xff] %vm2572_vm0, %v3451_v45 }
 0x6c8   : > { %v3190_v12 = vpop.f32.mrf.mxu2 }
 0x6c9   : > { %v3324_v10 = vmul.f32 %v6928_v21, %v3190_v12  ;;  %v3399_v12 = vld [vmem:[%s4603_s23 + $0xf0] sm:$0xff] }
 0x6cb   : > { %v3452_v36 = vadd.f32 %v3388_v41, %v3324_v10 }
 0x6cd   : > { %3516 = vst.msk [vmem:[%s6942_s19 + $0x98] sm:$0xff] %vm2572_vm0, %v3452_v36  ;;  %4299 = vmatmul.msk.bf16.gmra.mxu2 %vm2572_vm0, %v3012_v47  ;;  %v2978_v36 = vld [vmem:[#allocation2 + $0x200] sm:$0xff] }
 0x6d0   : > { %v3193_v25 = vpop.f32.mrf.mxu2 }
 0x6d1   : > { %v3325_v37 = vmul.f32 %v6928_v21, %v3193_v25  ;;  %v2979_v25 = vld [vmem:[#allocation2 + $0x208] sm:$0xff] }
 0x6d3   : > { %v3453_v26 = vadd.f32 %v3389_v27, %v3325_v37  ;;  %v3018_v37 = vpack.c.bf16 %v2979_v25, %v2978_v36  ;;  %v3412_v25 = vld [vmem:[%s4603_s23 + $0x158] sm:$0xff] }
 0x6d5   : > { %3517 = vst.msk [vmem:[%s6942_s19 + $0xa0] sm:$0xff] %vm2572_vm0, %v3453_v26 }
 0x6d8   : > { %v3195_v61 = vpop.f32.mrf.mxu2 }
 0x6d9   : > { %v3326_v40 = vmul.f32 %v6928_v21, %v3195_v61  ;;  %v3401_v61 = vld [vmem:[%s4603_s23 + $0x100] sm:$0xff] }
 0x6db   : > { %v3454_v33 = vadd.f32 %v3390_v60, %v3326_v40 }
 0x6dd   : > { %3518 = vst.msk [vmem:[%s6942_s19 + $0xa8] sm:$0xff] %vm2572_vm0, %v3454_v33  ;;  %4300 = vmatmul.msk.bf16.gmra.mxu2 %vm2572_vm0, %v3013_v5  ;;  %v2981_v33 = vld [vmem:[#allocation2 + $0x218] sm:$0xff] }
 0x6e0   : > { %v3198_v19 = vpop.f32.mrf.mxu2 }
 0x6e1   : > { %v3327_v16 = vmul.f32 %v6928_v21, %v3198_v19  ;;  %v2980_v19 = vld [vmem:[#allocation2 + $0x210] sm:$0xff] }
 0x6e3   : > { %v3455_v22 = vadd.f32 %v3391_v63, %v3327_v16  ;;  %v3019_v16 = vpack.c.bf16 %v2981_v33, %v2980_v19  ;;  %v3414_v19 = vld [vmem:[%s4603_s23 + $0x168] sm:$0xff] }
 0x6e5   : > { %3519 = vst.msk [vmem:[%s6942_s19 + $0xb0] sm:$0xff] %vm2572_vm0, %v3455_v22 }
 0x6e8   : > { %v3200_v30 = vpop.f32.mrf.mxu2 }
 0x6e9   : > { %v3328_v46 = vmul.f32 %v6928_v21, %v3200_v30  ;;  %v3403_v30 = vld [vmem:[%s4603_s23 + $0x110] sm:$0xff] }
 0x6eb   : > { %v3456_v62 = vadd.f32 %v3392_v7, %v3328_v46 }
 0x6ed   : > { %3520 = vst.msk [vmem:[%s6942_s19 + $0xb8] sm:$0xff] %vm2572_vm0, %v3456_v62  ;;  %4301 = vmatmul.msk.bf16.gmra.mxu2 %vm2572_vm0, %v3014_v42  ;;  %v2982_v62 = vld [vmem:[#allocation2 + $0x220] sm:$0xff] }
 0x6f0   : > { %v3203_v15 = vpop.f32.mrf.mxu2 }
 0x6f1   : > { %v3329_v2 = vmul.f32 %v6928_v21, %v3203_v15  ;;  %v2983_v15 = vld [vmem:[#allocation2 + $0x228] sm:$0xff] }
 0x6f3   : > { %v3457_v1 = vadd.f32 %v3393_v43, %v3329_v2  ;;  %v3020_v2 = vpack.c.bf16 %v2983_v15, %v2982_v62  ;;  %v3416_v15 = vld [vmem:[%s4603_s23 + $0x178] sm:$0xff] }
 0x6f5   : > { %3521 = vst.msk [vmem:[%s6942_s19 + $0xc0] sm:$0xff] %vm2572_vm0, %v3457_v1 }
 0x6f8   : > { %v3205_v24 = vpop.f32.mrf.mxu2 }
 0x6f9   : > { %v3330_v32 = vmul.f32 %v6928_v21, %v3205_v24  ;;  %v3405_v24 = vld [vmem:[%s4603_s23 + $0x120] sm:$0xff] }
 0x6fb   : > { %v3458_v57 = vadd.f32 %v3394_v11, %v3330_v32 }
 0x6fd   : > { %3522 = vst.msk [vmem:[%s6942_s19 + $0xc8] sm:$0xff] %vm2572_vm0, %v3458_v57  ;;  %4302 = vmatmul.msk.bf16.gmra.mxu2 %vm2572_vm0, %v3015_v20  ;;  %v2984_v57 = vld [vmem:[#allocation2 + $0x230] sm:$0xff] }
 0x700   : > { %v3208_v52 = vpop.f32.mrf.mxu2 }
 0x701   : > { %v3331_v9 = vmul.f32 %v6928_v21, %v3208_v52  ;;  %v2985_v52 = vld [vmem:[#allocation2 + $0x238] sm:$0xff] }
 0x703   : > { %v3459_v39 = vadd.f32 %v3395_v51, %v3331_v9  ;;  %v3021_v9 = vpack.c.bf16 %v2985_v52, %v2984_v57 }
 0x705   : > { %3523 = vst.msk [vmem:[%s6942_s19 + $0xd0] sm:$0xff] %vm2572_vm0, %v3459_v39 }
 0x708   : > { %v3210_v14 = vpop.f32.mrf.mxu2 }
 0x709   : > { %v3332_v18 = vmul.f32 %v6928_v21, %v3210_v14  ;;  %v3407_v14 = vld [vmem:[%s4603_s23 + $0x130] sm:$0xff] }
 0x70b   : > { %v3460_v44 = vadd.f32 %v3396_v53, %v3332_v18 }
 0x70d   : > { %3524 = vst.msk [vmem:[%s6942_s19 + $0xd8] sm:$0xff] %vm2572_vm0, %v3460_v44  ;;  %4303 = vmatmul.msk.bf16.gmra.mxu2 %vm2572_vm0, %v3016_v58  ;;  %v2987_v44 = vld [vmem:[#allocation2 + $0x248] sm:$0xff] }
 0x710   : > { %v3213_v54 = vpop.f32.mrf.mxu2 }
 0x711   : > { %v3333_v3 = vmul.f32 %v6928_v21, %v3213_v54  ;;  %v2986_v54 = vld [vmem:[#allocation2 + $0x240] sm:$0xff] }
 0x713   : > { %v3461_v13 = vadd.f32 %v3397_v59, %v3333_v3  ;;  %v3022_v3 = vpack.c.bf16 %v2987_v44, %v2986_v54  ;;  %v3421_v44 = vld [vmem:[%s4603_s23 + $0x1a0] sm:$0xff] }
 0x715   : > { %3525 = vst.msk [vmem:[%s6942_s19 + $0xe0] sm:$0xff] %vm2572_vm0, %v3461_v13 }
 0x718   : > { %v3215_v50 = vpop.f32.mrf.mxu2 }
 0x719   : > { %v3334_v4 = vmul.f32 %v6928_v21, %v3215_v50  ;;  %v3409_v50 = vld [vmem:[%s4603_s23 + $0x140] sm:$0xff] }
 0x71b   : > { %v3462_v34 = vadd.f32 %v3398_v38, %v3334_v4 }
 0x71d   : > { %3526 = vst.msk [vmem:[%s6942_s19 + $0xe8] sm:$0xff] %vm2572_vm0, %v3462_v34  ;;  %4304 = vmatmul.msk.bf16.gmra.mxu2 %vm2572_vm0, %v3017_v28  ;;  %v2988_v34 = vld [vmem:[#allocation2 + $0x250] sm:$0xff] }
 0x720   : > { %v3218_v45 = vpop.f32.mrf.mxu2 }
 0x721   : > { %v3335_v41 = vmul.f32 %v6928_v21, %v3218_v45  ;;  %v2989_v45 = vld [vmem:[#allocation2 + $0x258] sm:$0xff] }
 0x723   : > { %v3463_v6 = vadd.f32 %v3399_v12, %v3335_v41  ;;  %v3023_v41 = vpack.c.bf16 %v2989_v45, %v2988_v34 }
 0x725   : > { %3527 = vst.msk [vmem:[%s6942_s19 + $0xf0] sm:$0xff] %vm2572_vm0, %v3463_v6 }
 0x728   : > { %v3220_v10 = vpop.f32.mrf.mxu2 }
 0x729   : > { %v3336_v47 = vmul.f32 %v6928_v21, %v3220_v10  ;;  %v3411_v10 = vld [vmem:[%s4603_s23 + $0x150] sm:$0xff] }
 0x72b   : > { %v3464_v27 = vadd.f32 %v3400_v29, %v3336_v47 }
 0x72d   : > { %3528 = vst.msk [vmem:[%s6942_s19 + $0xf8] sm:$0xff] %vm2572_vm0, %v3464_v27  ;;  %4305 = vmatmul.msk.bf16.gmra.mxu2 %vm2572_vm0, %v3018_v37  ;;  %v2990_v27 = vld [vmem:[#allocation2 + $0x260] sm:$0xff] }
 0x730   : > { %v3223_v26 = vpop.f32.mrf.mxu2 }
 0x731   : > { %v3337_v60 = vmul.f32 %v6928_v21, %v3223_v26  ;;  %v2991_v26 = vld [vmem:[#allocation2 + $0x268] sm:$0xff] }
 0x733   : > { %v3465_v23 = vadd.f32 %v3401_v61, %v3337_v60  ;;  %v3024_v60 = vpack.c.bf16 %v2991_v26, %v2990_v27  ;;  %v3427_v26 = vld [vmem:[%s4603_s23 + $0x1d0] sm:$0xff] }
 0x735   : > { %3529 = vst.msk [vmem:[%s6942_s19 + $0x100] sm:$0xff] %vm2572_vm0, %v3465_v23 }
 0x738   : > { %v3225_v40 = vpop.f32.mrf.mxu2 }
 0x739   : > { %v3338_v5 = vmul.f32 %v6928_v21, %v3225_v40  ;;  %v3413_v40 = vld [vmem:[%s4603_s23 + $0x160] sm:$0xff] }
 0x73b   : > { %v3466_v63 = vadd.f32 %v3402_v56, %v3338_v5 }
 0x73d   : > { %3530 = vst.msk [vmem:[%s6942_s19 + $0x108] sm:$0xff] %vm2572_vm0, %v3466_v63  ;;  %4306 = vmatmul.msk.bf16.gmra.mxu2 %vm2572_vm0, %v3019_v16  ;;  %v2993_v63 = vld [vmem:[#allocation2 + $0x278] sm:$0xff] }
 0x740   : > { %v3228_v22 = vpop.f32.mrf.mxu2 }
 0x741   : > { %v3339_v7 = vmul.f32 %v6928_v21, %v3228_v22  ;;  %v2992_v22 = vld [vmem:[#allocation2 + $0x270] sm:$0xff] }
 0x743   : > { %v3467_v0 = vadd.f32 %v3403_v30, %v3339_v7  ;;  %v3025_v7 = vpack.c.bf16 %v2993_v63, %v2992_v22 }
 0x745   : > { %3531 = vst.msk [vmem:[%s6942_s19 + $0x110] sm:$0xff] %vm2572_vm0, %v3467_v0 }
 0x748   : > { %v3230_v46 = vpop.f32.mrf.mxu2 }
 0x749   : > { %v3340_v42 = vmul.f32 %v6928_v21, %v3230_v46  ;;  %v3415_v46 = vld [vmem:[%s4603_s23 + $0x170] sm:$0xff] }
 0x74b   : > { %v3468_v43 = vadd.f32 %v3404_v48, %v3340_v42 }
 0x74d   : > { %3532 = vst.msk [vmem:[%s6942_s19 + $0x118] sm:$0xff] %vm2572_vm0, %v3468_v43  ;;  %4307 = vmatmul.msk.bf16.gmra.mxu2 %vm2572_vm0, %v3020_v2 }
 0x750   : > { %v3233_v1 = vpop.f32.mrf.mxu2 }
 0x751   : > { %v3341_v11 = vmul.f32 %v6928_v21, %v3233_v1 }
 0x753   : > { %v3469_v49 = vadd.f32 %v3405_v24, %v3341_v11  ;;  %v3417_v24 = vld [vmem:[%s4603_s23 + $0x180] sm:$0xff] }
 0x755   : > { %3533 = vst.msk [vmem:[%s6942_s19 + $0x120] sm:$0xff] %vm2572_vm0, %v3469_v49 }
 0x758   : > { %v3235_v32 = vpop.f32.mrf.mxu2 }
 0x759   : > { %v3342_v20 = vmul.f32 %v6928_v21, %v3235_v32 }
 0x75b   : > { %v3470_v51 = vadd.f32 %v3406_v31, %v3342_v20  ;;  %v3418_v31 = vld [vmem:[%s4603_s23 + $0x188] sm:$0xff] }
 0x75d   : > { %3534 = vst.msk [vmem:[%s6942_s19 + $0x128] sm:$0xff] %vm2572_vm0, %v3470_v51  ;;  %4308 = vmatmul.msk.bf16.gmra.mxu2 %vm2572_vm0, %v3021_v9  ;;  %v3419_v51 = vld [vmem:[%s4603_s23 + $0x190] sm:$0xff] }
 0x760   : > { %v3238_v39 = vpop.f32.mrf.mxu2 }
 0x761   : > { %v3343_v53 = vmul.f32 %v6928_v21, %v3238_v39 }
 0x763   : > { %v3471_v8 = vadd.f32 %v3407_v14, %v3343_v53  ;;  %v3420_v53 = vld [vmem:[%s4603_s23 + $0x198] sm:$0xff] }
 0x765   : > { %3535 = vst.msk [vmem:[%s6942_s19 + $0x130] sm:$0xff] %vm2572_vm0, %v3471_v8 }
 0x768   : > { %v3240_v18 = vpop.f32.mrf.mxu2 }
 0x769   : > { %v3344_v58 = vmul.f32 %v6928_v21, %v3240_v18 }
 0x76b   : > { %v3472_v59 = vadd.f32 %v3408_v35, %v3344_v58 }
 0x76d   : > { %3536 = vst.msk [vmem:[%s6942_s19 + $0x138] sm:$0xff] %vm2572_vm0, %v3472_v59  ;;  %4309 = vmatmul.msk.bf16.gmra.mxu2 %vm2572_vm0, %v3022_v3  ;;  %v3422_v3 = vld [vmem:[%s4603_s23 + $0x1a8] sm:$0xff] }
 0x770   : > { %v3243_v13 = vpop.f32.mrf.mxu2 }
 0x771   : > { %v3345_v38 = vmul.f32 %v6928_v21, %v3243_v13 }
 0x773   : > { %v3473_v17 = vadd.f32 %v3409_v50, %v3345_v38 }
 0x775   : > { %3537 = vst.msk [vmem:[%s6942_s19 + $0x140] sm:$0xff] %vm2572_vm0, %v3473_v17  ;;  %v3423_v17 = vld [vmem:[%s4603_s23 + $0x1b0] sm:$0xff] }
 0x778   : > { %v3245_v4 = vpop.f32.mrf.mxu2 }
 0x779   : > { %v3346_v28 = vmul.f32 %v6928_v21, %v3245_v4 }
 0x77b   : > { %v3474_v12 = vadd.f32 %v3410_v55, %v3346_v28  ;;  %v3424_v28 = vld [vmem:[%s4603_s23 + $0x1b8] sm:$0xff] }
 0x77d   : > { %3538 = vst.msk [vmem:[%s6942_s19 + $0x148] sm:$0xff] %vm2572_vm0, %v3474_v12  ;;  %4310 = vmatmul.msk.bf16.gmra.mxu2 %vm2572_vm0, %v3023_v41 }
 0x780   : > { %v3248_v6 = vpop.f32.mrf.mxu2 }
 0x781   : > { %v3347_v29 = vmul.f32 %v6928_v21, %v3248_v6  ;;  %v3425_v6 = vld [vmem:[%s4603_s23 + $0x1c0] sm:$0xff] }
 0x783   : > { %v3475_v36 = vadd.f32 %v3411_v10, %v3347_v29 }
 0x785   : > { %3539 = vst.msk [vmem:[%s6942_s19 + $0x150] sm:$0xff] %vm2572_vm0, %v3475_v36 }
 0x788   : > { %v3250_v47 = vpop.f32.mrf.mxu2 }
 0x789   : > { %v3348_v37 = vmul.f32 %v6928_v21, %v3250_v47  ;;  %v3426_v47 = vld [vmem:[%s4603_s23 + $0x1c8] sm:$0xff] }
 0x78b   : > { %v3476_v61 = vadd.f32 %v3412_v25, %v3348_v37 }
 0x78d   : > { %3540 = vst.msk [vmem:[%s6942_s19 + $0x158] sm:$0xff] %vm2572_vm0, %v3476_v61  ;;  %4311 = vmatmul.msk.bf16.gmra.mxu2 %vm2572_vm0, %v3024_v60 }
 0x790   : > { %v3253_v23 = vpop.f32.mrf.mxu2 }
 0x791   : > { %v3349_v56 = vmul.f32 %v6928_v21, %v3253_v23 }
 0x793   : > { %v3477_v33 = vadd.f32 %v3413_v40, %v3349_v56  ;;  %v3428_v40 = vld [vmem:[%s4603_s23 + $0x1d8] sm:$0xff] }
 0x795   : > { %3541 = vst.msk [vmem:[%s6942_s19 + $0x160] sm:$0xff] %vm2572_vm0, %v3477_v33 }
 0x798   : > { %v3255_v5 = vpop.f32.mrf.mxu2 }
 0x799   : > { %v3350_v16 = vmul.f32 %v6928_v21, %v3255_v5 }
 0x79b   : > { %v3478_v30 = vadd.f32 %v3414_v19, %v3350_v16  ;;  %v3429_v19 = vld [vmem:[%s4603_s23 + $0x1e0] sm:$0xff] }
 0x79d   : > { %3542 = vst.msk [vmem:[%s6942_s19 + $0x168] sm:$0xff] %vm2572_vm0, %v3478_v30  ;;  %4312 = vmatmul.msk.bf16.gmra.mxu2 %vm2572_vm0, %v3025_v7  ;;  %v3430_v30 = vld [vmem:[%s4603_s23 + $0x1e8] sm:$0xff] }
 0x7a0   : > { %v3258_v0 = vpop.f32.mrf.mxu2 }
 0x7a1   : > { %v3351_v48 = vmul.f32 %v6928_v21, %v3258_v0 }
 0x7a3   : > { %v3479_v62 = vadd.f32 %v3415_v46, %v3351_v48  ;;  %v3431_v48 = vld [vmem:[%s4603_s23 + $0x1f0] sm:$0xff] }
 0x7a5   : > { %3543 = vst.msk [vmem:[%s6942_s19 + $0x170] sm:$0xff] %vm2572_vm0, %v3479_v62 }
 0x7a8   : > { %v3260_v42 = vpop.f32.mrf.mxu2 }
 0x7a9   : > { %v3352_v43 = vmul.f32 %v6928_v21, %v3260_v42 }
 0x7ab   : > { %v3480_v2 = vadd.f32 %v3416_v15, %v3352_v43  ;;  %v3432_v43 = vld [vmem:[%s4603_s23 + $0x1f8] sm:$0xff] }
 0x7ad   : > { %3544 = vst.msk [vmem:[%s6942_s19 + $0x178] sm:$0xff] %vm2572_vm0, %v3480_v2 }
 0x7b0   : > { %v3263_v1 = vpop.f32.mrf.mxu2 }
 0x7b1   : > { %v3353_v11 = vmul.f32 %v6928_v21, %v3263_v1 }
 0x7b3   : > { %v3481_v49 = vadd.f32 %v3417_v24, %v3353_v11 }
 0x7b5   : > { %3545 = vst.msk [vmem:[%s6942_s19 + $0x180] sm:$0xff] %vm2572_vm0, %v3481_v49 }
 0x7b8   : > { %v3265_v32 = vpop.f32.mrf.mxu2 }
 0x7b9   : > { %v3354_v57 = vmul.f32 %v6928_v21, %v3265_v32 }
 0x7bb   : > { %v3482_v20 = vadd.f32 %v3418_v31, %v3354_v57 }
 0x7bd   : > { %3546 = vst.msk [vmem:[%s6942_s19 + $0x188] sm:$0xff] %vm2572_vm0, %v3482_v20 }
 0x7c0   : > { %v3268_v52 = vpop.f32.mrf.mxu2 }
 0x7c1   : > { %v3355_v9 = vmul.f32 %v6928_v21, %v3268_v52 }
 0x7c3   : > { %v3483_v39 = vadd.f32 %v3419_v51, %v3355_v9 }
 0x7c5   : > { %3547 = vst.msk [vmem:[%s6942_s19 + $0x190] sm:$0xff] %vm2572_vm0, %v3483_v39 }
 0x7c8   : > { %v3270_v14 = vpop.f32.mrf.mxu2 }
 0x7c9   : > { %v3356_v8 = vmul.f32 %v6928_v21, %v3270_v14 }
 0x7cb   : > { %v3484_v18 = vadd.f32 %v3420_v53, %v3356_v8 }
 0x7cd   : > { %3548 = vst.msk [vmem:[%s6942_s19 + $0x198] sm:$0xff] %vm2572_vm0, %v3484_v18 }
 0x7d0   : > { %v3273_v35 = vpop.f32.mrf.mxu2 }
 0x7d1   : > { %v3357_v58 = vmul.f32 %v6928_v21, %v3273_v35 }
 0x7d3   : > { %v3485_v54 = vadd.f32 %v3421_v44, %v3357_v58 }
 0x7d5   : > { %3549 = vst.msk [vmem:[%s6942_s19 + $0x1a0] sm:$0xff] %vm2572_vm0, %v3485_v54 }
 0x7d8   : > { %v3275_v59 = vpop.f32.mrf.mxu2 }
 0x7d9   : > { %v3358_v13 = vmul.f32 %v6928_v21, %v3275_v59 }
 0x7db   : > { %v3486_v50 = vadd.f32 %v3422_v3, %v3358_v13 }
 0x7dd   : > { %3550 = vst.msk [vmem:[%s6942_s19 + $0x1a8] sm:$0xff] %vm2572_vm0, %v3486_v50 }
 0x7e0   : > { %v3278_v38 = vpop.f32.mrf.mxu2 }
 0x7e1   : > { %v3359_v4 = vmul.f32 %v6928_v21, %v3278_v38 }
 0x7e3   : > { %v3487_v55 = vadd.f32 %v3423_v17, %v3359_v4 }
 0x7e5   : > { %3551 = vst.msk [vmem:[%s6942_s19 + $0x1b0] sm:$0xff] %vm2572_vm0, %v3487_v55 }
 0x7e8   : > { %v3280_v34 = vpop.f32.mrf.mxu2 }
 0x7e9   : > { %v3360_v45 = vmul.f32 %v6928_v21, %v3280_v34 }
 0x7eb   : > { %v3488_v12 = vadd.f32 %v3424_v28, %v3360_v45 }
 0x7ed   : > { %3552 = vst.msk [vmem:[%s6942_s19 + $0x1b8] sm:$0xff] %vm2572_vm0, %v3488_v12 }
 0x7f0   : > { %v3283_v41 = vpop.f32.mrf.mxu2 }
 0x7f1   : > { %v3361_v10 = vmul.f32 %v6928_v21, %v3283_v41 }
 0x7f3   : > { %v3489_v29 = vadd.f32 %v3425_v6, %v3361_v10 }
 0x7f5   : > { %3553 = vst.msk [vmem:[%s6942_s19 + $0x1c0] sm:$0xff] %vm2572_vm0, %v3489_v29 }
 0x7f8   : > { %v3285_v36 = vpop.f32.mrf.mxu2 }
 0x7f9   : > { %v3362_v25 = vmul.f32 %v6928_v21, %v3285_v36 }
 0x7fb   : > { %v3490_v27 = vadd.f32 %v3426_v47, %v3362_v25 }
 0x7fd   : > { %3554 = vst.msk [vmem:[%s6942_s19 + $0x1c8] sm:$0xff] %vm2572_vm0, %v3490_v27 }
 0x800   : > { %v3288_v37 = vpop.f32.mrf.mxu2 }
 0x801   : > { %v3363_v61 = vmul.f32 %v6928_v21, %v3288_v37 }
 0x803   : > { %v3491_v60 = vadd.f32 %v3427_v26, %v3363_v61 }
 0x805   : > { %3555 = vst.msk [vmem:[%s6942_s19 + $0x1d0] sm:$0xff] %vm2572_vm0, %v3491_v60 }
 0x808   : > { %v3290_v23 = vpop.f32.mrf.mxu2 }
 0x809   : > { %v3364_v56 = vmul.f32 %v6928_v21, %v3290_v23 }
 0x80b   : > { %v3492_v33 = vadd.f32 %v3428_v40, %v3364_v56 }
 0x80d   : > { %3556 = vst.msk [vmem:[%s6942_s19 + $0x1d8] sm:$0xff] %vm2572_vm0, %v3492_v33 }
 0x810   : > { %v3293_v5 = vpop.f32.mrf.mxu2 }
 0x811   : > { %v3365_v63 = vmul.f32 %v6928_v21, %v3293_v5 }
 0x813   : > { %v3493_v16 = vadd.f32 %v3429_v19, %v3365_v63 }
 0x815   : > { %3557 = vst.msk [vmem:[%s6942_s19 + $0x1e0] sm:$0xff] %vm2572_vm0, %v3493_v16 }
 0x818   : > { %v3295_v22 = vpop.f32.mrf.mxu2 }
 0x819   : > { %v3366_v7 = vmul.f32 %v6928_v21, %v3295_v22 }
 0x81b   : > { %v3494_v0 = vadd.f32 %v3430_v30, %v3366_v7 }
 0x81d   : > { %3558 = vst.msk [vmem:[%s6942_s19 + $0x1e8] sm:$0xff] %vm2572_vm0, %v3494_v0 }
 0x820   : > { %v3298_v46 = vpop.f32.mrf.mxu2 }
 0x821   : > { %v3367_v62 = vmul.f32 %v6928_v21, %v3298_v46 }
 0x823   : > { %v3495_v42 = vadd.f32 %v3431_v48, %v3367_v62 }
 0x825   : > { %3559 = vst.msk [vmem:[%s6942_s19 + $0x1f0] sm:$0xff] %vm2572_vm0, %v3495_v42 }
 0x828   : > { %v3300_v15 = vpop.f32.mrf.mxu2 }
 0x829   : > { %v3368_v2 = vmul.f32 %v6928_v21, %v3300_v15 }
 0x82b   : > { %v3496_v1 = vadd.f32 %v3432_v43, %v3368_v2 }
 0x82d   : > { %3560 = vst.msk [vmem:[%s6942_s19 + $0x1f8] sm:$0xff] %vm2572_vm0, %v3496_v1 }
 0x82e PF: > { %s15_s17 = sadd.s32 1, %s4552_s17  }
 0x82f   : > { %p12_p4 = scmp.ge.s32.totalorder %s15_s17, 4  }
 0x831   :  { %14 = sbr.rel (!%p12_p4) target bundleno = 2 (0x2), region = 66 }

</bundles_post_ra>
